<compile_context>
chip_gen: v7x
topology: tpu7x:2x2x1
jax: 0.10.0
libtpu: 0.0.40
codegen_flags: <defaults>
</compile_context>

<pallas_src>
import math

import jax
import jax.numpy as jnp
from jax import lax
from jax.experimental import pallas as pl
from jax.experimental.pallas import tpu as pltpu


LANE = 128     # pad hidden size to a multiple of this (vreg lane width)
SUBLANE = 8    # pad batch to a multiple of this (f32 sublane width)
UNROLL = 8     # partial unroll of the time loop


def _round_up(x, m):
    return ((x + m - 1) // m) * m


# ----------------------------------------------------------------------------
# Padded weight construction (host-side glue, done once at init).
# Per-direction gate layout over 4*Hp columns: [ i | f | g | o ], each Hp wide.
# Fused per-layer input weight columns are direction-major: [ fwd 4Hp | bwd 4Hp ].
# ----------------------------------------------------------------------------
def _pad_w_ih_layer0(w_ih, H, Hp):
    """(D, 4H) -> (D, 4Hp): zero-pad each gate's columns from H to Hp."""
    D = w_ih.shape[0]
    out = jnp.zeros((D, 4 * Hp), jnp.float32)
    for k in range(4):
        out = out.at[:, k * Hp:k * Hp + H].set(w_ih[:, k * H:(k + 1) * H])
    return out


def _pad_w_ih_deep(w_ih, H, Hp):
    """(2H, 4H) -> (2Hp, 4Hp): rows [0:H]->fwd-hidden block, [H:2H]->bwd-hidden block."""
    out = jnp.zeros((2 * Hp, 4 * Hp), jnp.float32)
    for k in range(4):
        out = out.at[:H, k * Hp:k * Hp + H].set(w_ih[:H, k * H:(k + 1) * H])
        out = out.at[Hp:Hp + H, k * Hp:k * Hp + H].set(w_ih[H:, k * H:(k + 1) * H])
    return out


def _pad_w_hh(w_hh, H, Hp):
    """(H, 4H) -> (Hp, 4Hp)."""
    out = jnp.zeros((Hp, 4 * Hp), jnp.float32)
    for k in range(4):
        out = out.at[:H, k * Hp:k * Hp + H].set(w_hh[:, k * H:(k + 1) * H])
    return out


def _pad_bias(b, H, Hp):
    """(1, 4H) -> (1, 4Hp)."""
    out = jnp.zeros((1, 4 * Hp), jnp.float32)
    for k in range(4):
        out = out.at[:, k * Hp:k * Hp + H].set(b[:, k * H:(k + 1) * H])
    return out


# ----------------------------------------------------------------------------
# Kernel 1: hoisted input projection  gx = sum_i x_i @ W_i + b  (row-tiled matmul)
# ----------------------------------------------------------------------------
def _make_proj_kernel(n_inputs):
    def kernel(*refs):
        xs = refs[:n_inputs]
        ws = refs[n_inputs:2 * n_inputs]
        b_ref = refs[2 * n_inputs]
        out_ref = refs[2 * n_inputs + 1]
        acc = jnp.dot(xs[0][...], ws[0][...], preferred_element_type=jnp.float32)
        for i in range(1, n_inputs):
            acc = acc + jnp.dot(xs[i][...], ws[i][...],
                                preferred_element_type=jnp.float32)
        out_ref[...] = acc + b_ref[...]
    return kernel


def _pick_row_tile(rows):
    """Largest row tile <= 512 that divides `rows` (rows is a multiple of 8)."""
    if rows <= 512:
        return rows
    for t in (512, 256, 128, 64, 32, 16, 8):
        if rows % t == 0:
            return t
    return rows


def input_projection(xs, w_parts, b):
    """xs: tuple of (N, Din_i); w_parts: tuple of (Din_i, 8Hp); b: (1, 8Hp) -> (N, 8Hp)."""
    n = len(xs)
    rows = xs[0].shape[0]
    cols = b.shape[1]
    tile = _pick_row_tile(rows)
    in_specs = [pl.BlockSpec((tile, x.shape[1]), lambda i: (i, 0)) for x in xs]
    in_specs += [pl.BlockSpec(w.shape, lambda i: (0, 0)) for w in w_parts]
    in_specs += [pl.BlockSpec(b.shape, lambda i: (0, 0))]
    return pl.pallas_call(
        _make_proj_kernel(n),
        out_shape=jax.ShapeDtypeStruct((rows, cols), jnp.float32),
        grid_spec=pltpu.PrefetchScalarGridSpec(
            num_scalar_prefetch=0,
            grid=(rows // tile,),
            in_specs=in_specs,
            out_specs=pl.BlockSpec((tile, cols), lambda i: (i, 0)),
        ),
        compiler_params=pltpu.CompilerParams(
            dimension_semantics=("parallel",)),
    )(*xs, *w_parts, b)


# ----------------------------------------------------------------------------
# Shared LSTM cell math on a per-direction (B, 4Hp) gate vector.
# ----------------------------------------------------------------------------
def _lstm_cell(gates, c, Hp):
    i_g = jax.nn.sigmoid(gates[:, 0 * Hp:1 * Hp])
    f_g = jax.nn.sigmoid(gates[:, 1 * Hp:2 * Hp])
    g_g = jnp.tanh(gates[:, 2 * Hp:3 * Hp])
    o_g = jax.nn.sigmoid(gates[:, 3 * Hp:4 * Hp])
    c_new = f_g * c + i_g * g_g
    h_new = o_g * jnp.tanh(c_new)
    return h_new, c_new


# ----------------------------------------------------------------------------
# Kernel 2: per-direction recurrence for an intermediate layer.
# grid = (2,) over directions ("parallel"); whole time loop inside one grid step.
# ----------------------------------------------------------------------------
def _lstm_dir_kernel(gx_ref, whh_ref, out_ref):
    T, B, G4 = gx_ref.shape
    Hp = G4 // 4
    d = pl.program_id(0)          # 0 = forward, 1 = backward
    whh = whh_ref[...]            # (Hp, 4Hp), resident across all timesteps

    def step(s, carry):
        h, c = carry                                  # (B, Hp) each, in vregs
        t = jnp.where(d == 0, s, T - 1 - s)           # scalar select only
        gates = gx_ref[t] + jnp.dot(h, whh, preferred_element_type=jnp.float32)
        h_new, c_new = _lstm_cell(gates, c, Hp)
        out_ref[t] = h_new                            # lane-dense (B, Hp) store
        return h_new, c_new

    init = (jnp.zeros((B, Hp), jnp.float32), jnp.zeros((B, Hp), jnp.float32))
    lax.fori_loop(0, T, step, init, unroll=min(T, UNROLL))


def bilstm_sequence(gx, w_hh):
    """gx: (T,B,8Hp) direction-major gates; w_hh: (2,Hp,4Hp) -> (2,T,B,Hp) outputs."""
    T, B, G8 = gx.shape
    G4 = G8 // 2
    Hp = G4 // 4
    return pl.pallas_call(
        _lstm_dir_kernel,
        out_shape=jax.ShapeDtypeStruct((2, T, B, Hp), jnp.float32),
        grid_spec=pltpu.PrefetchScalarGridSpec(
            num_scalar_prefetch=0,
            grid=(2,),
            in_specs=[
                pl.BlockSpec((T, B, G4), lambda d: (0, 0, d)),      # this direction's gx cols
                pl.BlockSpec((None, Hp, G4), lambda d: (d, 0, 0)),  # this direction's W_hh
            ],
            out_specs=pl.BlockSpec((None, T, B, Hp), lambda d: (d, 0, 0, 0)),
        ),
        compiler_params=pltpu.CompilerParams(
            dimension_semantics=("parallel",)),
    )(gx, w_hh)


# ----------------------------------------------------------------------------
# Kernel 3: final layer + head.  Only lstm_out[:, -1, :] is needed, so:
#   * forward direction: full recurrence (backward half NOT computed),
#   * backward direction: ONE step (original t=T-1, zero initial state),
#   * fc + log_softmax fused in the same kernel.
# No (T,B,2H) output is ever written to HBM for the last layer.
# ----------------------------------------------------------------------------
def _bilstm_final_kernel(gxf_ref, gxb_last_ref, whhf_ref, fcw_ref, fcb_ref, out_ref):
    T, B, G4 = gxf_ref.shape
    Hp = G4 // 4
    whh = whhf_ref[...]            # forward-direction (Hp, 4Hp)

    def step(s, carry):
        h, c = carry
        gates = gxf_ref[s] + jnp.dot(h, whh, preferred_element_type=jnp.float32)
        return _lstm_cell(gates, c, Hp)

    init = (jnp.zeros((B, Hp), jnp.float32), jnp.zeros((B, Hp), jnp.float32))
    h_fwd_last, _ = lax.fori_loop(0, T, step, init, unroll=min(T, UNROLL))

    # Backward hidden at t = T-1: first step of the reversed recurrence from zero
    # state, so the recurrent matmul and the forget gate contribute nothing.
    gxb = gxb_last_ref[...]        # (B, 4Hp), backward-direction gates at t = T-1
    i_b = jax.nn.sigmoid(gxb[:, 0 * Hp:1 * Hp])
    g_b = jnp.tanh(gxb[:, 2 * Hp:3 * Hp])
    o_b = jax.nn.sigmoid(gxb[:, 3 * Hp:4 * Hp])
    h_bwd_last = o_b * jnp.tanh(i_b * g_b)

    # fc on [h_fwd_last | h_bwd_last] without materialising the concat.
    logits = (jnp.dot(h_fwd_last, fcw_ref[:Hp, :], preferred_element_type=jnp.float32)
              + jnp.dot(h_bwd_last, fcw_ref[Hp:, :], preferred_element_type=jnp.float32)
              + fcb_ref[...])
    m = jnp.max(logits, axis=-1, keepdims=True)
    shifted = logits - m
    lse = jnp.log(jnp.sum(jnp.exp(shifted), axis=-1, keepdims=True))
    out_ref[...] = shifted - lse


def bilstm_final_with_head(gx, w_hh, fc_w, fc_b):
    T, B, G8 = gx.shape
    G4 = G8 // 2
    Hp = G4 // 4
    out_dim = fc_w.shape[1]
    return pl.pallas_call(
        _bilstm_final_kernel,
        out_shape=jax.ShapeDtypeStruct((B, out_dim), jnp.float32),
        grid_spec=pltpu.PrefetchScalarGridSpec(
            num_scalar_prefetch=0,
            grid=(1,),
            in_specs=[
                pl.BlockSpec((T, B, G4), lambda i: (0, 0, 0)),          # fwd gates, all T
                pl.BlockSpec((None, B, G4), lambda i: (T - 1, 0, 1)),   # bwd gates at t=T-1
                pl.BlockSpec((None, Hp, G4), lambda i: (0, 0, 0)),      # fwd W_hh only
                pl.BlockSpec(fc_w.shape, lambda i: (0, 0)),
                pl.BlockSpec(fc_b.shape, lambda i: (0, 0)),
            ],
            out_specs=pl.BlockSpec((B, out_dim), lambda i: (0, 0)),
        ),
        compiler_params=pltpu.CompilerParams(
            dimension_semantics=("arbitrary",)),
    )(gx, gx, w_hh, fc_w, fc_b)


# ----------------------------------------------------------------------------
# Parameter construction: raw per-direction PyTorch-style weights + padded fused forms.
# ----------------------------------------------------------------------------
def init_params(key, word_count, embedding_dim, num_layers, hidden_size, output_size):
    H = hidden_size
    Hp = _round_up(H, LANE)
    fused, raw = {}, {}

    key, k_emb = jax.random.split(key)
    emb = jax.random.normal(k_emb, (word_count, embedding_dim), jnp.float32)
    fused["embedding"] = emb
    raw["embedding"] = emb

    bound = 1.0 / math.sqrt(H)
    fused_layers, raw_layers = [], []
    for layer in range(num_layers):
        in_dim = embedding_dim if layer == 0 else 2 * H
        dirs = {}
        for d in ("fwd", "bwd"):
            key, k1, k2, k3, k4 = jax.random.split(key, 5)
            dirs[d] = {
                "w_ih": jax.random.uniform(k1, (in_dim, 4 * H), jnp.float32,
                                           -bound, bound),
                "w_hh": jax.random.uniform(k2, (H, 4 * H), jnp.float32,
                                           -bound, bound),
                "b": (jax.random.uniform(k3, (4 * H,), jnp.float32, -bound, bound)
                      + jax.random.uniform(k4, (4 * H,), jnp.float32, -bound,
                                           bound))[None, :],
            }
        raw_layers.append(dirs)

        if layer == 0:
            wf = _pad_w_ih_layer0(dirs["fwd"]["w_ih"], H, Hp)
            wb = _pad_w_ih_layer0(dirs["bwd"]["w_ih"], H, Hp)
            w_big = jnp.concatenate([wf, wb], axis=1)            # (D, 8Hp)
            w_parts = (w_big,)
        else:
            wf = _pad_w_ih_deep(dirs["fwd"]["w_ih"], H, Hp)
            wb = _pad_w_ih_deep(dirs["bwd"]["w_ih"], H, Hp)
            w_big = jnp.concatenate([wf, wb], axis=1)            # (2Hp, 8Hp)
            # Split rows so the next layer consumes fwd/bwd outputs without a concat.
            w_parts = (w_big[:Hp, :], w_big[Hp:, :])

        b_big = jnp.concatenate([_pad_bias(dirs["fwd"]["b"], H, Hp),
                                 _pad_bias(dirs["bwd"]["b"], H, Hp)], axis=1)  # (1, 8Hp)
        w_hh = jnp.stack([_pad_w_hh(dirs["fwd"]["w_hh"], H, Hp),
                          _pad_w_hh(dirs["bwd"]["w_hh"], H, Hp)], axis=0)      # (2, Hp, 4Hp)
        fused_layers.append({"w_ih_parts": w_parts, "b": b_big, "w_hh": w_hh})

    fused["layers"] = fused_layers
    raw["layers"] = raw_layers

    key, k_w, k_b = jax.random.split(key, 3)
    fc_bound = 1.0 / math.sqrt(2 * H)
    fc_w = jax.random.uniform(k_w, (2 * H, output_size), jnp.float32,
                              -fc_bound, fc_bound)
    fc_b = jax.random.uniform(k_b, (1, output_size), jnp.float32,
                              -fc_bound, fc_bound)
    fc_w_pad = jnp.zeros((2 * Hp, output_size), jnp.float32)
    fc_w_pad = fc_w_pad.at[:H, :].set(fc_w[:H, :])          # fwd hidden rows
    fc_w_pad = fc_w_pad.at[Hp:Hp + H, :].set(fc_w[H:, :])   # bwd hidden rows
    fused["fc_w"], fused["fc_b"] = fc_w_pad, fc_b
    raw["fc_w"], raw["fc_b"] = fc_w, fc_b
    return fused, raw


# ----------------------------------------------------------------------------
# Full forward pass (eval mode: dropouts are identity).
# ----------------------------------------------------------------------------
@jax.jit
def forward(params, tokens):
    B, T = tokens.shape
    Bp = _round_up(B, SUBLANE)
    Hp = params["layers"][0]["w_hh"].shape[1]
    num_layers = len(params["layers"])

    # Embedding lookup directly in TIME-MAJOR order: (T, B, D); pad batch to a
    # sublane multiple with zero rows (sliced off at the end).  dropout_emb: identity.
    x_tbd = jnp.take(params["embedding"], tokens.T, axis=0)
    x_tbd = jnp.pad(x_tbd, ((0, 0), (0, Bp - B), (0, 0)))
    D = x_tbd.shape[-1]
    xs = (x_tbd.reshape(T * Bp, D),)

    for layer in range(num_layers - 1):
        p = params["layers"][layer]
        gx = input_projection(xs, p["w_ih_parts"], p["b"]).reshape(T, Bp, 8 * Hp)
        outs = bilstm_sequence(gx, p["w_hh"])            # (2, T, Bp, Hp)
        # dropout between LSTM layers: identity in eval mode.
        xs = (outs[0].reshape(T * Bp, Hp), outs[1].reshape(T * Bp, Hp))

    p = params["layers"][-1]
    gx = input_projection(xs, p["w_ih_parts"], p["b"]).reshape(T, Bp, 8 * Hp)
    log_probs = bilstm_final_with_head(gx, p["w_hh"], params["fc_w"], params["fc_b"])
    return log_probs[:B]


# ----------------------------------------------------------------------------
# Pure-JAX reference (mirrors torch biLSTM semantics) for a correctness check.
# ----------------------------------------------------------------------------
def reference_forward(raw, tokens):
    x = jnp.take(raw["embedding"], tokens, axis=0)     # (B, T, D)
    for dirs in raw["layers"]:
        outs = []
        for name, reverse in (("fwd", False), ("bwd", True)):
            w_ih, w_hh, b = dirs[name]["w_ih"], dirs[name]["w_hh"], dirs[name]["b"]
            H = w_hh.shape[0]
            seq = x[:, ::-1, :] if reverse else x
            Bsz, T, _ = seq.shape
            h = jnp.zeros((Bsz, H), jnp.float32)
            c = jnp.zeros((Bsz, H), jnp.float32)
            hs = []
            for t in range(T):
                g = seq[:, t, :] @ w_ih + h @ w_hh + b
                i = jax.nn.sigmoid(g[:, :H])
                f = jax.nn.sigmoid(g[:, H:2 * H])
                gg = jnp.tanh(g[:, 2 * H:3 * H])
                o = jax.nn.sigmoid(g[:, 3 * H:])
                c = f * c + i * gg
                h = o * jnp.tanh(c)
                hs.append(h)
            out = jnp.stack(hs, axis=1)
            if reverse:
                out = out[:, ::-1, :]
            outs.append(out)
        x = jnp.concatenate(outs, axis=-1)
    last = x[:, -1, :]
    logits = last @ raw["fc_w"] + raw["fc_b"]
    return jax.nn.log_softmax(logits, axis=1)


if __name__ == "__main__":
    word_count = 50
    embedding_dim = 16
    num_layers = 2
    hidden_size = 32
    output_size = 8
    batch = 2
    seq_len = 8

    key = jax.random.PRNGKey(0)
    k_params, k_tokens = jax.random.split(key)

    params, raw_params = init_params(k_params, word_count, embedding_dim,
                                     num_layers, hidden_size, output_size)
    tokens = jax.random.randint(k_tokens, (batch, seq_len), 0, word_count,
                                dtype=jnp.int32)

    log_probs = forward(params, tokens)
    jax.block_until_ready(log_probs)

    assert log_probs.shape == (batch, output_size)
    # log_softmax rows must sum (in prob space) to ~1.
    assert bool(jnp.allclose(jnp.sum(jnp.exp(log_probs), axis=1), 1.0, atol=1e-4))
    # Cross-check against a pure-JAX biLSTM reference (loose tol for MXU precision).
    ref = reference_forward(raw_params, tokens)
    assert bool(jnp.allclose(log_probs, ref, atol=2e-2, rtol=2e-2))
    print("KERNEL_OK")
</pallas_src>

<mosaic_0001>
module attributes {stable_mosaic.version = 11 : i64} {
  func.func @kernel(%arg0: i32, %arg1: memref<64x16xf32, #tpu.memory_space<vmem>>, %arg2: memref<16x1024xf32, #tpu.memory_space<vmem>>, %arg3: memref<1x1024xf32, #tpu.memory_space<vmem>>, %arg4: memref<64x1024xf32, #tpu.memory_space<vmem>>) attributes {dimension_semantics = [#tpu.dimension_semantics<parallel>], iteration_bounds = array<i64: 1>, scalar_prefetch = 0 : i64, scratch_operands = 0 : i64, tpu.core_type = #tpu.core_type<tc>, window_params = [{transform_indices = @transform_0, window_bounds = array<i64: 64, 16>}, {pipeline_mode = #tpu.pipeline_mode<synchronous>, transform_indices = @transform_1, window_bounds = array<i64: 16, 1024>}, {pipeline_mode = #tpu.pipeline_mode<synchronous>, transform_indices = @transform_2, window_bounds = array<i64: 1, 1024>}, {transform_indices = @transform_3, window_bounds = array<i64: 64, 1024>}]} {
    %c0 = arith.constant 0 : index
    %c0_0 = arith.constant 0 : index
    %0 = vector.load %arg1[%c0, %c0_0] : memref<64x16xf32, #tpu.memory_space<vmem>>, vector<64x16xf32>
    %c0_1 = arith.constant 0 : index
    %c0_2 = arith.constant 0 : index
    %1 = vector.load %arg2[%c0_1, %c0_2] : memref<16x1024xf32, #tpu.memory_space<vmem>>, vector<16x1024xf32>
    %cst = arith.constant dense<0.000000e+00> : vector<64x1024xf32>
    %2 = tpu.matmul %0, %1, %cst {dimension_numbers = #tpu.dot_dimension_numbers<[1], [0], [0], [1], [0, 0, 1, 1], [], []>} : vector<64x16xf32>, vector<16x1024xf32>, vector<64x1024xf32> -> vector<64x1024xf32>
    %c0_3 = arith.constant 0 : index
    %c0_4 = arith.constant 0 : index
    %3 = vector.load %arg3[%c0_3, %c0_4] : memref<1x1024xf32, #tpu.memory_space<vmem>>, vector<1x1024xf32>
    %4 = vector.broadcast %3 : vector<1x1024xf32> to vector<64x1024xf32>
    %5 = arith.addf %2, %4 : vector<64x1024xf32>
    %c0_5 = arith.constant 0 : index
    %c0_6 = arith.constant 0 : index
    %6 = vector.load %arg4[%c0_5, %c0_6] : memref<64x1024xf32, #tpu.memory_space<vmem>>, vector<64x1024xf32>
    tpu.vector_store %arg4[%c0_5, %c0_6], %5 {strides = array<i32>} : memref<64x1024xf32, #tpu.memory_space<vmem>>, vector<64x1024xf32>,
    return
  }
  func.func @transform_0(%arg0: i32) -> (i32, i32) {
    %c0_i32 = arith.constant 0 : i32
    %c0_i32_0 = arith.constant 0 : i32
    return %arg0, %c0_i32 : i32, i32
  }
  func.func @transform_1(%arg0: i32) -> (i32, i32) {
    %c0_i32 = arith.constant 0 : i32
    %c0_i32_0 = arith.constant 0 : i32
    %c0_i32_1 = arith.constant 0 : i32
    return %c0_i32, %c0_i32_0 : i32, i32
  }
  func.func @transform_2(%arg0: i32) -> (i32, i32) {
    %c0_i32 = arith.constant 0 : i32
    %c0_i32_0 = arith.constant 0 : i32
    %c0_i32_1 = arith.constant 0 : i32
    return %c0_i32, %c0_i32_0 : i32, i32
  }
  func.func @transform_3(%arg0: i32) -> (i32, i32) {
    %c0_i32 = arith.constant 0 : i32
    %c0_i32_0 = arith.constant 0 : i32
    return %arg0, %c0_i32 : i32, i32
  }
}

module attributes {stable_mosaic.version = 11 : i64} {
  func.func @_lstm_dir_kernel(%arg0: i32, %arg1: memref<8x8x512xf32, #tpu.memory_space<vmem>>, %arg2: memref<1x128x512xf32, #tpu.memory_space<vmem>>, %arg3: memref<1x8x8x128xf32, #tpu.memory_space<vmem>>) attributes {dimension_semantics = [#tpu.dimension_semantics<parallel>], iteration_bounds = array<i64: 2>, scalar_prefetch = 0 : i64, scratch_operands = 0 : i64, tpu.core_type = #tpu.core_type<tc>, window_params = [{transform_indices = @transform_0, window_bounds = array<i64: 8, 8, 512>}, {transform_indices = @transform_1, window_bounds = array<i64: 1, 128, 512>}, {transform_indices = @transform_2, window_bounds = array<i64: 1, 8, 8, 128>}]} {
    %c0 = arith.constant 0 : index
    %c0_0 = arith.constant 0 : index
    %c0_1 = arith.constant 0 : index
    %0 = vector.load %arg2[%c0, %c0_0, %c0_1] : memref<1x128x512xf32, #tpu.memory_space<vmem>>, vector<1x128x512xf32>
    %1 = vector.shape_cast %0 : vector<1x128x512xf32> to vector<128x512xf32>
    %cst = arith.constant 0.000000e+00 : f32
    %2 = vector.broadcast %cst : f32 to vector<8x128xf32>
    %cst_2 = arith.constant 0.000000e+00 : f32
    %3 = vector.broadcast %cst_2 : f32 to vector<8x128xf32>
    %c0_i32 = arith.constant 0 : i32
    %c0_i32_3 = arith.constant 0 : i32
    %4 = arith.cmpi eq, %arg0, %c0_i32_3 : i32
    %c7_i32 = arith.constant 7 : i32
    %5 = arith.subi %c7_i32, %c0_i32 : i32
    %6 = arith.select %4, %c0_i32, %5 : i32
    %7 = arith.index_cast %6 : i32 to index
    %c0_4 = arith.constant 0 : index
    %c0_5 = arith.constant 0 : index
    %8 = vector.load %arg1[%7, %c0_4, %c0_5] : memref<8x8x512xf32, #tpu.memory_space<vmem>>, vector<1x8x512xf32>
    %9 = vector.shape_cast %8 : vector<1x8x512xf32> to vector<8x512xf32>
    %cst_6 = arith.constant dense<0.000000e+00> : vector<8x512xf32>
    %10 = tpu.matmul %2, %1, %cst_6 {dimension_numbers = #tpu.dot_dimension_numbers<[1], [0], [0], [1], [0, 0, 1, 1], [], []>} : vector<8x128xf32>, vector<128x512xf32>, vector<8x512xf32> -> vector<8x512xf32>
    %11 = arith.addf %9, %10 : vector<8x512xf32>
    %12 = vector.extract_strided_slice %11 {offsets = [0, 0], sizes = [8, 128], strides = [1, 1]} : vector<8x512xf32> to vector<8x128xf32>
    %13 = arith.negf %12 : vector<8x128xf32>
    %14 = math.exp %13 : vector<8x128xf32>
    %cst_7 = arith.constant 1.000000e+00 : f32
    %15 = vector.broadcast %cst_7 : f32 to vector<8x128xf32>
    %16 = arith.addf %15, %14 : vector<8x128xf32>
    %17 = arith.divf %15, %16 : vector<8x128xf32>
    %18 = vector.extract_strided_slice %11 {offsets = [0, 128], sizes = [8, 128], strides = [1, 1]} : vector<8x512xf32> to vector<8x128xf32>
    %19 = arith.negf %18 : vector<8x128xf32>
    %20 = math.exp %19 : vector<8x128xf32>
    %cst_8 = arith.constant 1.000000e+00 : f32
    %21 = vector.broadcast %cst_8 : f32 to vector<8x128xf32>
    %22 = arith.addf %21, %20 : vector<8x128xf32>
    %23 = arith.divf %21, %22 : vector<8x128xf32>
    %24 = vector.extract_strided_slice %11 {offsets = [0, 256], sizes = [8, 128], strides = [1, 1]} : vector<8x512xf32> to vector<8x128xf32>
    %25 = math.tanh %24 : vector<8x128xf32>
    %26 = vector.extract_strided_slice %11 {offsets = [0, 384], sizes = [8, 128], strides = [1, 1]} : vector<8x512xf32> to vector<8x128xf32>
    %27 = arith.negf %26 : vector<8x128xf32>
    %28 = math.exp %27 : vector<8x128xf32>
    %cst_9 = arith.constant 1.000000e+00 : f32
    %29 = vector.broadcast %cst_9 : f32 to vector<8x128xf32>
    %30 = arith.addf %29, %28 : vector<8x128xf32>
    %31 = arith.divf %29, %30 : vector<8x128xf32>
    %32 = arith.mulf %23, %3 : vector<8x128xf32>
    %33 = arith.mulf %17, %25 : vector<8x128xf32>
    %34 = arith.addf %32, %33 : vector<8x128xf32>
    %35 = math.tanh %34 : vector<8x128xf32>
    %36 = arith.mulf %31, %35 : vector<8x128xf32>
    %c0_10 = arith.constant 0 : index
    %37 = arith.index_cast %6 : i32 to index
    %c0_11 = arith.constant 0 : index
    %c0_12 = arith.constant 0 : index
    %38 = vector.load %arg3[%c0_10, %37, %c0_11, %c0_12] : memref<1x8x8x128xf32, #tpu.memory_space<vmem>>, vector<1x1x8x128xf32>
    %39 = vector.shape_cast %38 : vector<1x1x8x128xf32> to vector<8x128xf32>
    %40 = vector.shape_cast %36 : vector<8x128xf32> to vector<1x1x8x128xf32>
    tpu.vector_store %arg3[%c0_10, %37, %c0_11, %c0_12], %40 {strides = array<i32>} : memref<1x8x8x128xf32, #tpu.memory_space<vmem>>, vector<1x1x8x128xf32>,
    %c1_i32 = arith.constant 1 : i32
    %c0_i32_13 = arith.constant 0 : i32
    %41 = arith.cmpi eq, %arg0, %c0_i32_13 : i32
    %c7_i32_14 = arith.constant 7 : i32
    %42 = arith.subi %c7_i32_14, %c1_i32 : i32
    %43 = arith.select %41, %c1_i32, %42 : i32
    %44 = arith.index_cast %43 : i32 to index
    %c0_15 = arith.constant 0 : index
    %c0_16 = arith.constant 0 : index
    %45 = vector.load %arg1[%44, %c0_15, %c0_16] : memref<8x8x512xf32, #tpu.memory_space<vmem>>, vector<1x8x512xf32>
    %46 = vector.shape_cast %45 : vector<1x8x512xf32> to vector<8x512xf32>
    %cst_17 = arith.constant dense<0.000000e+00> : vector<8x512xf32>
    %47 = tpu.matmul %36, %1, %cst_17 {dimension_numbers = #tpu.dot_dimension_numbers<[1], [0], [0], [1], [0, 0, 1, 1], [], []>} : vector<8x128xf32>, vector<128x512xf32>, vector<8x512xf32> -> vector<8x512xf32>
    %48 = arith.addf %46, %47 : vector<8x512xf32>
    %49 = vector.extract_strided_slice %48 {offsets = [0, 0], sizes = [8, 128], strides = [1, 1]} : vector<8x512xf32> to vector<8x128xf32>
    %50 = arith.negf %49 : vector<8x128xf32>
    %51 = math.exp %50 : vector<8x128xf32>
    %cst_18 = arith.constant 1.000000e+00 : f32
    %52 = vector.broadcast %cst_18 : f32 to vector<8x128xf32>
    %53 = arith.addf %52, %51 : vector<8x128xf32>
    %54 = arith.divf %52, %53 : vector<8x128xf32>
    %55 = vector.extract_strided_slice %48 {offsets = [0, 128], sizes = [8, 128], strides = [1, 1]} : vector<8x512xf32> to vector<8x128xf32>
    %56 = arith.negf %55 : vector<8x128xf32>
    %57 = math.exp %56 : vector<8x128xf32>
    %cst_19 = arith.constant 1.000000e+00 : f32
    %58 = vector.broadcast %cst_19 : f32 to vector<8x128xf32>
    %59 = arith.addf %58, %57 : vector<8x128xf32>
    %60 = arith.divf %58, %59 : vector<8x128xf32>
    %61 = vector.extract_strided_slice %48 {offsets = [0, 256], sizes = [8, 128], strides = [1, 1]} : vector<8x512xf32> to vector<8x128xf32>
    %62 = math.tanh %61 : vector<8x128xf32>
    %63 = vector.extract_strided_slice %48 {offsets = [0, 384], sizes = [8, 128], strides = [1, 1]} : vector<8x512xf32> to vector<8x128xf32>
    %64 = arith.negf %63 : vector<8x128xf32>
    %65 = math.exp %64 : vector<8x128xf32>
    %cst_20 = arith.constant 1.000000e+00 : f32
    %66 = vector.broadcast %cst_20 : f32 to vector<8x128xf32>
    %67 = arith.addf %66, %65 : vector<8x128xf32>
    %68 = arith.divf %66, %67 : vector<8x128xf32>
    %69 = arith.mulf %60, %34 : vector<8x128xf32>
    %70 = arith.mulf %54, %62 : vector<8x128xf32>
    %71 = arith.addf %69, %70 : vector<8x128xf32>
    %72 = math.tanh %71 : vector<8x128xf32>
    %73 = arith.mulf %68, %72 : vector<8x128xf32>
    %c0_21 = arith.constant 0 : index
    %74 = arith.index_cast %43 : i32 to index
    %c0_22 = arith.constant 0 : index
    %c0_23 = arith.constant 0 : index
    %75 = vector.load %arg3[%c0_21, %74, %c0_22, %c0_23] : memref<1x8x8x128xf32, #tpu.memory_space<vmem>>, vector<1x1x8x128xf32>
    %76 = vector.shape_cast %75 : vector<1x1x8x128xf32> to vector<8x128xf32>
    %77 = vector.shape_cast %73 : vector<8x128xf32> to vector<1x1x8x128xf32>
    tpu.vector_store %arg3[%c0_21, %74, %c0_22, %c0_23], %77 {strides = array<i32>} : memref<1x8x8x128xf32, #tpu.memory_space<vmem>>, vector<1x1x8x128xf32>,
    %c2_i32 = arith.constant 2 : i32
    %c0_i32_24 = arith.constant 0 : i32
    %78 = arith.cmpi eq, %arg0, %c0_i32_24 : i32
    %c7_i32_25 = arith.constant 7 : i32
    %79 = arith.subi %c7_i32_25, %c2_i32 : i32
    %80 = arith.select %78, %c2_i32, %79 : i32
    %81 = arith.index_cast %80 : i32 to index
    %c0_26 = arith.constant 0 : index
    %c0_27 = arith.constant 0 : index
    %82 = vector.load %arg1[%81, %c0_26, %c0_27] : memref<8x8x512xf32, #tpu.memory_space<vmem>>, vector<1x8x512xf32>
    %83 = vector.shape_cast %82 : vector<1x8x512xf32> to vector<8x512xf32>
    %cst_28 = arith.constant dense<0.000000e+00> : vector<8x512xf32>
    %84 = tpu.matmul %73, %1, %cst_28 {dimension_numbers = #tpu.dot_dimension_numbers<[1], [0], [0], [1], [0, 0, 1, 1], [], []>} : vector<8x128xf32>, vector<128x512xf32>, vector<8x512xf32> -> vector<8x512xf32>
    %85 = arith.addf %83, %84 : vector<8x512xf32>
    %86 = vector.extract_strided_slice %85 {offsets = [0, 0], sizes = [8, 128], strides = [1, 1]} : vector<8x512xf32> to vector<8x128xf32>
    %87 = arith.negf %86 : vector<8x128xf32>
    %88 = math.exp %87 : vector<8x128xf32>
    %cst_29 = arith.constant 1.000000e+00 : f32
    %89 = vector.broadcast %cst_29 : f32 to vector<8x128xf32>
    %90 = arith.addf %89, %88 : vector<8x128xf32>
    %91 = arith.divf %89, %90 : vector<8x128xf32>
    %92 = vector.extract_strided_slice %85 {offsets = [0, 128], sizes = [8, 128], strides = [1, 1]} : vector<8x512xf32> to vector<8x128xf32>
    %93 = arith.negf %92 : vector<8x128xf32>
    %94 = math.exp %93 : vector<8x128xf32>
    %cst_30 = arith.constant 1.000000e+00 : f32
    %95 = vector.broadcast %cst_30 : f32 to vector<8x128xf32>
    %96 = arith.addf %95, %94 : vector<8x128xf32>
    %97 = arith.divf %95, %96 : vector<8x128xf32>
    %98 = vector.extract_strided_slice %85 {offsets = [0, 256], sizes = [8, 128], strides = [1, 1]} : vector<8x512xf32> to vector<8x128xf32>
    %99 = math.tanh %98 : vector<8x128xf32>
    %100 = vector.extract_strided_slice %85 {offsets = [0, 384], sizes = [8, 128], strides = [1, 1]} : vector<8x512xf32> to vector<8x128xf32>
    %101 = arith.negf %100 : vector<8x128xf32>
    %102 = math.exp %101 : vector<8x128xf32>
    %cst_31 = arith.constant 1.000000e+00 : f32
    %103 = vector.broadcast %cst_31 : f32 to vector<8x128xf32>
    %104 = arith.addf %103, %102 : vector<8x128xf32>
    %105 = arith.divf %103, %104 : vector<8x128xf32>
    %106 = arith.mulf %97, %71 : vector<8x128xf32>
    %107 = arith.mulf %91, %99 : vector<8x128xf32>
    %108 = arith.addf %106, %107 : vector<8x128xf32>
    %109 = math.tanh %108 : vector<8x128xf32>
    %110 = arith.mulf %105, %109 : vector<8x128xf32>
    %c0_32 = arith.constant 0 : index
    %111 = arith.index_cast %80 : i32 to index
    %c0_33 = arith.constant 0 : index
    %c0_34 = arith.constant 0 : index
    %112 = vector.load %arg3[%c0_32, %111, %c0_33, %c0_34] : memref<1x8x8x128xf32, #tpu.memory_space<vmem>>, vector<1x1x8x128xf32>
    %113 = vector.shape_cast %112 : vector<1x1x8x128xf32> to vector<8x128xf32>
    %114 = vector.shape_cast %110 : vector<8x128xf32> to vector<1x1x8x128xf32>
    tpu.vector_store %arg3[%c0_32, %111, %c0_33, %c0_34], %114 {strides = array<i32>} : memref<1x8x8x128xf32, #tpu.memory_space<vmem>>, vector<1x1x8x128xf32>,
    %c3_i32 = arith.constant 3 : i32
    %c0_i32_35 = arith.constant 0 : i32
    %115 = arith.cmpi eq, %arg0, %c0_i32_35 : i32
    %c7_i32_36 = arith.constant 7 : i32
    %116 = arith.subi %c7_i32_36, %c3_i32 : i32
    %117 = arith.select %115, %c3_i32, %116 : i32
    %118 = arith.index_cast %117 : i32 to index
    %c0_37 = arith.constant 0 : index
    %c0_38 = arith.constant 0 : index
    %119 = vector.load %arg1[%118, %c0_37, %c0_38] : memref<8x8x512xf32, #tpu.memory_space<vmem>>, vector<1x8x512xf32>
    %120 = vector.shape_cast %119 : vector<1x8x512xf32> to vector<8x512xf32>
    %cst_39 = arith.constant dense<0.000000e+00> : vector<8x512xf32>
    %121 = tpu.matmul %110, %1, %cst_39 {dimension_numbers = #tpu.dot_dimension_numbers<[1], [0], [0], [1], [0, 0, 1, 1], [], []>} : vector<8x128xf32>, vector<128x512xf32>, vector<8x512xf32> -> vector<8x512xf32>
    %122 = arith.addf %120, %121 : vector<8x512xf32>
    %123 = vector.extract_strided_slice %122 {offsets = [0, 0], sizes = [8, 128], strides = [1, 1]} : vector<8x512xf32> to vector<8x128xf32>
    %124 = arith.negf %123 : vector<8x128xf32>
    %125 = math.exp %124 : vector<8x128xf32>
    %cst_40 = arith.constant 1.000000e+00 : f32
    %126 = vector.broadcast %cst_40 : f32 to vector<8x128xf32>
    %127 = arith.addf %126, %125 : vector<8x128xf32>
    %128 = arith.divf %126, %127 : vector<8x128xf32>
    %129 = vector.extract_strided_slice %122 {offsets = [0, 128], sizes = [8, 128], strides = [1, 1]} : vector<8x512xf32> to vector<8x128xf32>
    %130 = arith.negf %129 : vector<8x128xf32>
    %131 = math.exp %130 : vector<8x128xf32>
    %cst_41 = arith.constant 1.000000e+00 : f32
    %132 = vector.broadcast %cst_41 : f32 to vector<8x128xf32>
    %133 = arith.addf %132, %131 : vector<8x128xf32>
    %134 = arith.divf %132, %133 : vector<8x128xf32>
    %135 = vector.extract_strided_slice %122 {offsets = [0, 256], sizes = [8, 128], strides = [1, 1]} : vector<8x512xf32> to vector<8x128xf32>
    %136 = math.tanh %135 : vector<8x128xf32>
    %137 = vector.extract_strided_slice %122 {offsets = [0, 384], sizes = [8, 128], strides = [1, 1]} : vector<8x512xf32> to vector<8x128xf32>
    %138 = arith.negf %137 : vector<8x128xf32>
    %139 = math.exp %138 : vector<8x128xf32>
    %cst_42 = arith.constant 1.000000e+00 : f32
    %140 = vector.broadcast %cst_42 : f32 to vector<8x128xf32>
    %141 = arith.addf %140, %139 : vector<8x128xf32>
    %142 = arith.divf %140, %141 : vector<8x128xf32>
    %143 = arith.mulf %134, %108 : vector<8x128xf32>
    %144 = arith.mulf %128, %136 : vector<8x128xf32>
    %145 = arith.addf %143, %144 : vector<8x128xf32>
    %146 = math.tanh %145 : vector<8x128xf32>
    %147 = arith.mulf %142, %146 : vector<8x128xf32>
    %c0_43 = arith.constant 0 : index
    %148 = arith.index_cast %117 : i32 to index
    %c0_44 = arith.constant 0 : index
    %c0_45 = arith.constant 0 : index
    %149 = vector.load %arg3[%c0_43, %148, %c0_44, %c0_45] : memref<1x8x8x128xf32, #tpu.memory_space<vmem>>, vector<1x1x8x128xf32>
    %150 = vector.shape_cast %149 : vector<1x1x8x128xf32> to vector<8x128xf32>
    %151 = vector.shape_cast %147 : vector<8x128xf32> to vector<1x1x8x128xf32>
    tpu.vector_store %arg3[%c0_43, %148, %c0_44, %c0_45], %151 {strides = array<i32>} : memref<1x8x8x128xf32, #tpu.memory_space<vmem>>, vector<1x1x8x128xf32>,
    %c4_i32 = arith.constant 4 : i32
    %c0_i32_46 = arith.constant 0 : i32
    %152 = arith.cmpi eq, %arg0, %c0_i32_46 : i32
    %c7_i32_47 = arith.constant 7 : i32
    %153 = arith.subi %c7_i32_47, %c4_i32 : i32
    %154 = arith.select %152, %c4_i32, %153 : i32
    %155 = arith.index_cast %154 : i32 to index
    %c0_48 = arith.constant 0 : index
    %c0_49 = arith.constant 0 : index
    %156 = vector.load %arg1[%155, %c0_48, %c0_49] : memref<8x8x512xf32, #tpu.memory_space<vmem>>, vector<1x8x512xf32>
    %157 = vector.shape_cast %156 : vector<1x8x512xf32> to vector<8x512xf32>
    %cst_50 = arith.constant dense<0.000000e+00> : vector<8x512xf32>
    %158 = tpu.matmul %147, %1, %cst_50 {dimension_numbers = #tpu.dot_dimension_numbers<[1], [0], [0], [1], [0, 0, 1, 1], [], []>} : vector<8x128xf32>, vector<128x512xf32>, vector<8x512xf32> -> vector<8x512xf32>
    %159 = arith.addf %157, %158 : vector<8x512xf32>
    %160 = vector.extract_strided_slice %159 {offsets = [0, 0], sizes = [8, 128], strides = [1, 1]} : vector<8x512xf32> to vector<8x128xf32>
    %161 = arith.negf %160 : vector<8x128xf32>
    %162 = math.exp %161 : vector<8x128xf32>
    %cst_51 = arith.constant 1.000000e+00 : f32
    %163 = vector.broadcast %cst_51 : f32 to vector<8x128xf32>
    %164 = arith.addf %163, %162 : vector<8x128xf32>
    %165 = arith.divf %163, %164 : vector<8x128xf32>
    %166 = vector.extract_strided_slice %159 {offsets = [0, 128], sizes = [8, 128], strides = [1, 1]} : vector<8x512xf32> to vector<8x128xf32>
    %167 = arith.negf %166 : vector<8x128xf32>
    %168 = math.exp %167 : vector<8x128xf32>
    %cst_52 = arith.constant 1.000000e+00 : f32
    %169 = vector.broadcast %cst_52 : f32 to vector<8x128xf32>
    %170 = arith.addf %169, %168 : vector<8x128xf32>
    %171 = arith.divf %169, %170 : vector<8x128xf32>
    %172 = vector.extract_strided_slice %159 {offsets = [0, 256], sizes = [8, 128], strides = [1, 1]} : vector<8x512xf32> to vector<8x128xf32>
    %173 = math.tanh %172 : vector<8x128xf32>
    %174 = vector.extract_strided_slice %159 {offsets = [0, 384], sizes = [8, 128], strides = [1, 1]} : vector<8x512xf32> to vector<8x128xf32>
    %175 = arith.negf %174 : vector<8x128xf32>
    %176 = math.exp %175 : vector<8x128xf32>
    %cst_53 = arith.constant 1.000000e+00 : f32
    %177 = vector.broadcast %cst_53 : f32 to vector<8x128xf32>
    %178 = arith.addf %177, %176 : vector<8x128xf32>
    %179 = arith.divf %177, %178 : vector<8x128xf32>
    %180 = arith.mulf %171, %145 : vector<8x128xf32>
    %181 = arith.mulf %165, %173 : vector<8x128xf32>
    %182 = arith.addf %180, %181 : vector<8x128xf32>
    %183 = math.tanh %182 : vector<8x128xf32>
    %184 = arith.mulf %179, %183 : vector<8x128xf32>
    %c0_54 = arith.constant 0 : index
    %185 = arith.index_cast %154 : i32 to index
    %c0_55 = arith.constant 0 : index
    %c0_56 = arith.constant 0 : index
    %186 = vector.load %arg3[%c0_54, %185, %c0_55, %c0_56] : memref<1x8x8x128xf32, #tpu.memory_space<vmem>>, vector<1x1x8x128xf32>
    %187 = vector.shape_cast %186 : vector<1x1x8x128xf32> to vector<8x128xf32>
    %188 = vector.shape_cast %184 : vector<8x128xf32> to vector<1x1x8x128xf32>
    tpu.vector_store %arg3[%c0_54, %185, %c0_55, %c0_56], %188 {strides = array<i32>} : memref<1x8x8x128xf32, #tpu.memory_space<vmem>>, vector<1x1x8x128xf32>,
    %c5_i32 = arith.constant 5 : i32
    %c0_i32_57 = arith.constant 0 : i32
    %189 = arith.cmpi eq, %arg0, %c0_i32_57 : i32
    %c7_i32_58 = arith.constant 7 : i32
    %190 = arith.subi %c7_i32_58, %c5_i32 : i32
    %191 = arith.select %189, %c5_i32, %190 : i32
    %192 = arith.index_cast %191 : i32 to index
    %c0_59 = arith.constant 0 : index
    %c0_60 = arith.constant 0 : index
    %193 = vector.load %arg1[%192, %c0_59, %c0_60] : memref<8x8x512xf32, #tpu.memory_space<vmem>>, vector<1x8x512xf32>
    %194 = vector.shape_cast %193 : vector<1x8x512xf32> to vector<8x512xf32>
    %cst_61 = arith.constant dense<0.000000e+00> : vector<8x512xf32>
    %195 = tpu.matmul %184, %1, %cst_61 {dimension_numbers = #tpu.dot_dimension_numbers<[1], [0], [0], [1], [0, 0, 1, 1], [], []>} : vector<8x128xf32>, vector<128x512xf32>, vector<8x512xf32> -> vector<8x512xf32>
    %196 = arith.addf %194, %195 : vector<8x512xf32>
    %197 = vector.extract_strided_slice %196 {offsets = [0, 0], sizes = [8, 128], strides = [1, 1]} : vector<8x512xf32> to vector<8x128xf32>
    %198 = arith.negf %197 : vector<8x128xf32>
    %199 = math.exp %198 : vector<8x128xf32>
    %cst_62 = arith.constant 1.000000e+00 : f32
    %200 = vector.broadcast %cst_62 : f32 to vector<8x128xf32>
    %201 = arith.addf %200, %199 : vector<8x128xf32>
    %202 = arith.divf %200, %201 : vector<8x128xf32>
    %203 = vector.extract_strided_slice %196 {offsets = [0, 128], sizes = [8, 128], strides = [1, 1]} : vector<8x512xf32> to vector<8x128xf32>
    %204 = arith.negf %203 : vector<8x128xf32>
    %205 = math.exp %204 : vector<8x128xf32>
    %cst_63 = arith.constant 1.000000e+00 : f32
    %206 = vector.broadcast %cst_63 : f32 to vector<8x128xf32>
    %207 = arith.addf %206, %205 : vector<8x128xf32>
    %208 = arith.divf %206, %207 : vector<8x128xf32>
    %209 = vector.extract_strided_slice %196 {offsets = [0, 256], sizes = [8, 128], strides = [1, 1]} : vector<8x512xf32> to vector<8x128xf32>
    %210 = math.tanh %209 : vector<8x128xf32>
    %211 = vector.extract_strided_slice %196 {offsets = [0, 384], sizes = [8, 128], strides = [1, 1]} : vector<8x512xf32> to vector<8x128xf32>
    %212 = arith.negf %211 : vector<8x128xf32>
    %213 = math.exp %212 : vector<8x128xf32>
    %cst_64 = arith.constant 1.000000e+00 : f32
    %214 = vector.broadcast %cst_64 : f32 to vector<8x128xf32>
    %215 = arith.addf %214, %213 : vector<8x128xf32>
    %216 = arith.divf %214, %215 : vector<8x128xf32>
    %217 = arith.mulf %208, %182 : vector<8x128xf32>
    %218 = arith.mulf %202, %210 : vector<8x128xf32>
    %219 = arith.addf %217, %218 : vector<8x128xf32>
    %220 = math.tanh %219 : vector<8x128xf32>
    %221 = arith.mulf %216, %220 : vector<8x128xf32>
    %c0_65 = arith.constant 0 : index
    %222 = arith.index_cast %191 : i32 to index
    %c0_66 = arith.constant 0 : index
    %c0_67 = arith.constant 0 : index
    %223 = vector.load %arg3[%c0_65, %222, %c0_66, %c0_67] : memref<1x8x8x128xf32, #tpu.memory_space<vmem>>, vector<1x1x8x128xf32>
    %224 = vector.shape_cast %223 : vector<1x1x8x128xf32> to vector<8x128xf32>
    %225 = vector.shape_cast %221 : vector<8x128xf32> to vector<1x1x8x128xf32>
    tpu.vector_store %arg3[%c0_65, %222, %c0_66, %c0_67], %225 {strides = array<i32>} : memref<1x8x8x128xf32, #tpu.memory_space<vmem>>, vector<1x1x8x128xf32>,
    %c6_i32 = arith.constant 6 : i32
    %c0_i32_68 = arith.constant 0 : i32
    %226 = arith.cmpi eq, %arg0, %c0_i32_68 : i32
    %c7_i32_69 = arith.constant 7 : i32
    %227 = arith.subi %c7_i32_69, %c6_i32 : i32
    %228 = arith.select %226, %c6_i32, %227 : i32
    %229 = arith.index_cast %228 : i32 to index
    %c0_70 = arith.constant 0 : index
    %c0_71 = arith.constant 0 : index
    %230 = vector.load %arg1[%229, %c0_70, %c0_71] : memref<8x8x512xf32, #tpu.memory_space<vmem>>, vector<1x8x512xf32>
    %231 = vector.shape_cast %230 : vector<1x8x512xf32> to vector<8x512xf32>
    %cst_72 = arith.constant dense<0.000000e+00> : vector<8x512xf32>
    %232 = tpu.matmul %221, %1, %cst_72 {dimension_numbers = #tpu.dot_dimension_numbers<[1], [0], [0], [1], [0, 0, 1, 1], [], []>} : vector<8x128xf32>, vector<128x512xf32>, vector<8x512xf32> -> vector<8x512xf32>
    %233 = arith.addf %231, %232 : vector<8x512xf32>
    %234 = vector.extract_strided_slice %233 {offsets = [0, 0], sizes = [8, 128], strides = [1, 1]} : vector<8x512xf32> to vector<8x128xf32>
    %235 = arith.negf %234 : vector<8x128xf32>
    %236 = math.exp %235 : vector<8x128xf32>
    %cst_73 = arith.constant 1.000000e+00 : f32
    %237 = vector.broadcast %cst_73 : f32 to vector<8x128xf32>
    %238 = arith.addf %237, %236 : vector<8x128xf32>
    %239 = arith.divf %237, %238 : vector<8x128xf32>
    %240 = vector.extract_strided_slice %233 {offsets = [0, 128], sizes = [8, 128], strides = [1, 1]} : vector<8x512xf32> to vector<8x128xf32>
    %241 = arith.negf %240 : vector<8x128xf32>
    %242 = math.exp %241 : vector<8x128xf32>
    %cst_74 = arith.constant 1.000000e+00 : f32
    %243 = vector.broadcast %cst_74 : f32 to vector<8x128xf32>
    %244 = arith.addf %243, %242 : vector<8x128xf32>
    %245 = arith.divf %243, %244 : vector<8x128xf32>
    %246 = vector.extract_strided_slice %233 {offsets = [0, 256], sizes = [8, 128], strides = [1, 1]} : vector<8x512xf32> to vector<8x128xf32>
    %247 = math.tanh %246 : vector<8x128xf32>
    %248 = vector.extract_strided_slice %233 {offsets = [0, 384], sizes = [8, 128], strides = [1, 1]} : vector<8x512xf32> to vector<8x128xf32>
    %249 = arith.negf %248 : vector<8x128xf32>
    %250 = math.exp %249 : vector<8x128xf32>
    %cst_75 = arith.constant 1.000000e+00 : f32
    %251 = vector.broadcast %cst_75 : f32 to vector<8x128xf32>
    %252 = arith.addf %251, %250 : vector<8x128xf32>
    %253 = arith.divf %251, %252 : vector<8x128xf32>
    %254 = arith.mulf %245, %219 : vector<8x128xf32>
    %255 = arith.mulf %239, %247 : vector<8x128xf32>
    %256 = arith.addf %254, %255 : vector<8x128xf32>
    %257 = math.tanh %256 : vector<8x128xf32>
    %258 = arith.mulf %253, %257 : vector<8x128xf32>
    %c0_76 = arith.constant 0 : index
    %259 = arith.index_cast %228 : i32 to index
    %c0_77 = arith.constant 0 : index
    %c0_78 = arith.constant 0 : index
    %260 = vector.load %arg3[%c0_76, %259, %c0_77, %c0_78] : memref<1x8x8x128xf32, #tpu.memory_space<vmem>>, vector<1x1x8x128xf32>
    %261 = vector.shape_cast %260 : vector<1x1x8x128xf32> to vector<8x128xf32>
    %262 = vector.shape_cast %258 : vector<8x128xf32> to vector<1x1x8x128xf32>
    tpu.vector_store %arg3[%c0_76, %259, %c0_77, %c0_78], %262 {strides = array<i32>} : memref<1x8x8x128xf32, #tpu.memory_space<vmem>>, vector<1x1x8x128xf32>,
    %c7_i32_79 = arith.constant 7 : i32
    %c0_i32_80 = arith.constant 0 : i32
    %263 = arith.cmpi eq, %arg0, %c0_i32_80 : i32
    %c7_i32_81 = arith.constant 7 : i32
    %264 = arith.subi %c7_i32_81, %c7_i32_79 : i32
    %265 = arith.select %263, %c7_i32_79, %264 : i32
    %266 = arith.index_cast %265 : i32 to index
    %c0_82 = arith.constant 0 : index
    %c0_83 = arith.constant 0 : index
    %267 = vector.load %arg1[%266, %c0_82, %c0_83] : memref<8x8x512xf32, #tpu.memory_space<vmem>>, vector<1x8x512xf32>
    %268 = vector.shape_cast %267 : vector<1x8x512xf32> to vector<8x512xf32>
    %cst_84 = arith.constant dense<0.000000e+00> : vector<8x512xf32>
    %269 = tpu.matmul %258, %1, %cst_84 {dimension_numbers = #tpu.dot_dimension_numbers<[1], [0], [0], [1], [0, 0, 1, 1], [], []>} : vector<8x128xf32>, vector<128x512xf32>, vector<8x512xf32> -> vector<8x512xf32>
    %270 = arith.addf %268, %269 : vector<8x512xf32>
    %271 = vector.extract_strided_slice %270 {offsets = [0, 0], sizes = [8, 128], strides = [1, 1]} : vector<8x512xf32> to vector<8x128xf32>
    %272 = arith.negf %271 : vector<8x128xf32>
    %273 = math.exp %272 : vector<8x128xf32>
    %cst_85 = arith.constant 1.000000e+00 : f32
    %274 = vector.broadcast %cst_85 : f32 to vector<8x128xf32>
    %275 = arith.addf %274, %273 : vector<8x128xf32>
    %276 = arith.divf %274, %275 : vector<8x128xf32>
    %277 = vector.extract_strided_slice %270 {offsets = [0, 128], sizes = [8, 128], strides = [1, 1]} : vector<8x512xf32> to vector<8x128xf32>
    %278 = arith.negf %277 : vector<8x128xf32>
    %279 = math.exp %278 : vector<8x128xf32>
    %cst_86 = arith.constant 1.000000e+00 : f32
    %280 = vector.broadcast %cst_86 : f32 to vector<8x128xf32>
    %281 = arith.addf %280, %279 : vector<8x128xf32>
    %282 = arith.divf %280, %281 : vector<8x128xf32>
    %283 = vector.extract_strided_slice %270 {offsets = [0, 256], sizes = [8, 128], strides = [1, 1]} : vector<8x512xf32> to vector<8x128xf32>
    %284 = math.tanh %283 : vector<8x128xf32>
    %285 = vector.extract_strided_slice %270 {offsets = [0, 384], sizes = [8, 128], strides = [1, 1]} : vector<8x512xf32> to vector<8x128xf32>
    %286 = arith.negf %285 : vector<8x128xf32>
    %287 = math.exp %286 : vector<8x128xf32>
    %cst_87 = arith.constant 1.000000e+00 : f32
    %288 = vector.broadcast %cst_87 : f32 to vector<8x128xf32>
    %289 = arith.addf %288, %287 : vector<8x128xf32>
    %290 = arith.divf %288, %289 : vector<8x128xf32>
    %291 = arith.mulf %282, %256 : vector<8x128xf32>
    %292 = arith.mulf %276, %284 : vector<8x128xf32>
    %293 = arith.addf %291, %292 : vector<8x128xf32>
    %294 = math.tanh %293 : vector<8x128xf32>
    %295 = arith.mulf %290, %294 : vector<8x128xf32>
    %c0_88 = arith.constant 0 : index
    %296 = arith.index_cast %265 : i32 to index
    %c0_89 = arith.constant 0 : index
    %c0_90 = arith.constant 0 : index
    %297 = vector.load %arg3[%c0_88, %296, %c0_89, %c0_90] : memref<1x8x8x128xf32, #tpu.memory_space<vmem>>, vector<1x1x8x128xf32>
    %298 = vector.shape_cast %297 : vector<1x1x8x128xf32> to vector<8x128xf32>
    %299 = vector.shape_cast %295 : vector<8x128xf32> to vector<1x1x8x128xf32>
    tpu.vector_store %arg3[%c0_88, %296, %c0_89, %c0_90], %299 {strides = array<i32>} : memref<1x8x8x128xf32, #tpu.memory_space<vmem>>, vector<1x1x8x128xf32>,
    %c8_i32 = arith.constant 8 : i32
    return
  }
  func.func @transform_0(%arg0: i32) -> (i32, i32, i32) {
    %c0_i32 = arith.constant 0 : i32
    %c0_i32_0 = arith.constant 0 : i32
    %c0_i32_1 = arith.constant 0 : i32
    return %c0_i32, %c0_i32_0, %arg0 : i32, i32, i32
  }
  func.func @transform_1(%arg0: i32) -> (i32, i32, i32) {
    %c0_i32 = arith.constant 0 : i32
    %c0_i32_0 = arith.constant 0 : i32
    %c0_i32_1 = arith.constant 0 : i32
    return %arg0, %c0_i32, %c0_i32_0 : i32, i32, i32
  }
  func.func @transform_2(%arg0: i32) -> (i32, i32, i32, i32) {
    %c0_i32 = arith.constant 0 : i32
    %c0_i32_0 = arith.constant 0 : i32
    %c0_i32_1 = arith.constant 0 : i32
    %c0_i32_2 = arith.constant 0 : i32
    return %arg0, %c0_i32, %c0_i32_0, %c0_i32_1 : i32, i32, i32, i32
  }
}

module attributes {stable_mosaic.version = 11 : i64} {
  func.func @kernel(%arg0: i32, %arg1: memref<64x128xf32, #tpu.memory_space<vmem>>, %arg2: memref<64x128xf32, #tpu.memory_space<vmem>>, %arg3: memref<128x1024xf32, #tpu.memory_space<vmem>>, %arg4: memref<128x1024xf32, #tpu.memory_space<vmem>>, %arg5: memref<1x1024xf32, #tpu.memory_space<vmem>>, %arg6: memref<64x1024xf32, #tpu.memory_space<vmem>>) attributes {dimension_semantics = [#tpu.dimension_semantics<parallel>], iteration_bounds = array<i64: 1>, scalar_prefetch = 0 : i64, scratch_operands = 0 : i64, tpu.core_type = #tpu.core_type<tc>, window_params = [{transform_indices = @transform_0, window_bounds = array<i64: 64, 128>}, {transform_indices = @transform_1, window_bounds = array<i64: 64, 128>}, {pipeline_mode = #tpu.pipeline_mode<synchronous>, transform_indices = @transform_2, window_bounds = array<i64: 128, 1024>}, {pipeline_mode = #tpu.pipeline_mode<synchronous>, transform_indices = @transform_3, window_bounds = array<i64: 128, 1024>}, {pipeline_mode = #tpu.pipeline_mode<synchronous>, transform_indices = @transform_4, window_bounds = array<i64: 1, 1024>}, {transform_indices = @transform_5, window_bounds = array<i64: 64, 1024>}]} {
    %c0 = arith.constant 0 : index
    %c0_0 = arith.constant 0 : index
    %0 = vector.load %arg1[%c0, %c0_0] : memref<64x128xf32, #tpu.memory_space<vmem>>, vector<64x128xf32>
    %c0_1 = arith.constant 0 : index
    %c0_2 = arith.constant 0 : index
    %1 = vector.load %arg3[%c0_1, %c0_2] : memref<128x1024xf32, #tpu.memory_space<vmem>>, vector<128x1024xf32>
    %cst = arith.constant dense<0.000000e+00> : vector<64x1024xf32>
    %2 = tpu.matmul %0, %1, %cst {dimension_numbers = #tpu.dot_dimension_numbers<[1], [0], [0], [1], [0, 0, 1, 1], [], []>} : vector<64x128xf32>, vector<128x1024xf32>, vector<64x1024xf32> -> vector<64x1024xf32>
    %c0_3 = arith.constant 0 : index
    %c0_4 = arith.constant 0 : index
    %3 = vector.load %arg2[%c0_3, %c0_4] : memref<64x128xf32, #tpu.memory_space<vmem>>, vector<64x128xf32>
    %c0_5 = arith.constant 0 : index
    %c0_6 = arith.constant 0 : index
    %4 = vector.load %arg4[%c0_5, %c0_6] : memref<128x1024xf32, #tpu.memory_space<vmem>>, vector<128x1024xf32>
    %cst_7 = arith.constant dense<0.000000e+00> : vector<64x1024xf32>
    %5 = tpu.matmul %3, %4, %cst_7 {dimension_numbers = #tpu.dot_dimension_numbers<[1], [0], [0], [1], [0, 0, 1, 1], [], []>} : vector<64x128xf32>, vector<128x1024xf32>, vector<64x1024xf32> -> vector<64x1024xf32>
    %6 = arith.addf %2, %5 : vector<64x1024xf32>
    %c0_8 = arith.constant 0 : index
    %c0_9 = arith.constant 0 : index
    %7 = vector.load %arg5[%c0_8, %c0_9] : memref<1x1024xf32, #tpu.memory_space<vmem>>, vector<1x1024xf32>
    %8 = vector.broadcast %7 : vector<1x1024xf32> to vector<64x1024xf32>
    %9 = arith.addf %6, %8 : vector<64x1024xf32>
    %c0_10 = arith.constant 0 : index
    %c0_11 = arith.constant 0 : index
    %10 = vector.load %arg6[%c0_10, %c0_11] : memref<64x1024xf32, #tpu.memory_space<vmem>>, vector<64x1024xf32>
    tpu.vector_store %arg6[%c0_10, %c0_11], %9 {strides = array<i32>} : memref<64x1024xf32, #tpu.memory_space<vmem>>, vector<64x1024xf32>,
    return
  }
  func.func @transform_0(%arg0: i32) -> (i32, i32) {
    %c0_i32 = arith.constant 0 : i32
    %c0_i32_0 = arith.constant 0 : i32
    return %arg0, %c0_i32 : i32, i32
  }
  func.func @transform_1(%arg0: i32) -> (i32, i32) {
    %c0_i32 = arith.constant 0 : i32
    %c0_i32_0 = arith.constant 0 : i32
    return %arg0, %c0_i32 : i32, i32
  }
  func.func @transform_2(%arg0: i32) -> (i32, i32) {
    %c0_i32 = arith.constant 0 : i32
    %c0_i32_0 = arith.constant 0 : i32
    %c0_i32_1 = arith.constant 0 : i32
    return %c0_i32, %c0_i32_0 : i32, i32
  }
  func.func @transform_3(%arg0: i32) -> (i32, i32) {
    %c0_i32 = arith.constant 0 : i32
    %c0_i32_0 = arith.constant 0 : i32
    %c0_i32_1 = arith.constant 0 : i32
    return %c0_i32, %c0_i32_0 : i32, i32
  }
  func.func @transform_4(%arg0: i32) -> (i32, i32) {
    %c0_i32 = arith.constant 0 : i32
    %c0_i32_0 = arith.constant 0 : i32
    %c0_i32_1 = arith.constant 0 : i32
    return %c0_i32, %c0_i32_0 : i32, i32
  }
  func.func @transform_5(%arg0: i32) -> (i32, i32) {
    %c0_i32 = arith.constant 0 : i32
    %c0_i32_0 = arith.constant 0 : i32
    return %arg0, %c0_i32 : i32, i32
  }
}

module attributes {stable_mosaic.version = 11 : i64} {
  func.func @_bilstm_final_kernel(%arg0: i32, %arg1: memref<8x8x512xf32, #tpu.memory_space<vmem>>, %arg2: memref<1x8x512xf32, #tpu.memory_space<vmem>>, %arg3: memref<1x128x512xf32, #tpu.memory_space<vmem>>, %arg4: memref<256x8xf32, #tpu.memory_space<vmem>>, %arg5: memref<1x8xf32, #tpu.memory_space<vmem>>, %arg6: memref<8x8xf32, #tpu.memory_space<vmem>>) attributes {dimension_semantics = [#tpu.dimension_semantics<arbitrary>], iteration_bounds = array<i64: 1>, scalar_prefetch = 0 : i64, scratch_operands = 0 : i64, tpu.core_type = #tpu.core_type<tc>, window_params = [{transform_indices = @transform_0, window_bounds = array<i64: 8, 8, 512>}, {transform_indices = @transform_1, window_bounds = array<i64: 1, 8, 512>}, {transform_indices = @transform_2, window_bounds = array<i64: 1, 128, 512>}, {pipeline_mode = #tpu.pipeline_mode<synchronous>, transform_indices = @transform_3, window_bounds = array<i64: 256, 8>}, {pipeline_mode = #tpu.pipeline_mode<synchronous>, transform_indices = @transform_4, window_bounds = array<i64: 1, 8>}, {pipeline_mode = #tpu.pipeline_mode<synchronous>, transform_indices = @transform_5, window_bounds = array<i64: 8, 8>}]} {
    %c0 = arith.constant 0 : index
    %c0_0 = arith.constant 0 : index
    %c0_1 = arith.constant 0 : index
    %0 = vector.load %arg3[%c0, %c0_0, %c0_1] : memref<1x128x512xf32, #tpu.memory_space<vmem>>, vector<1x128x512xf32>
    %1 = vector.shape_cast %0 : vector<1x128x512xf32> to vector<128x512xf32>
    %cst = arith.constant 0.000000e+00 : f32
    %2 = vector.broadcast %cst : f32 to vector<8x128xf32>
    %cst_2 = arith.constant 0.000000e+00 : f32
    %3 = vector.broadcast %cst_2 : f32 to vector<8x128xf32>
    %c0_i32 = arith.constant 0 : i32
    %4 = arith.index_cast %c0_i32 : i32 to index
    %c0_3 = arith.constant 0 : index
    %c0_4 = arith.constant 0 : index
    %5 = vector.load %arg1[%4, %c0_3, %c0_4] : memref<8x8x512xf32, #tpu.memory_space<vmem>>, vector<1x8x512xf32>
    %6 = vector.shape_cast %5 : vector<1x8x512xf32> to vector<8x512xf32>
    %cst_5 = arith.constant dense<0.000000e+00> : vector<8x512xf32>
    %7 = tpu.matmul %2, %1, %cst_5 {dimension_numbers = #tpu.dot_dimension_numbers<[1], [0], [0], [1], [0, 0, 1, 1], [], []>} : vector<8x128xf32>, vector<128x512xf32>, vector<8x512xf32> -> vector<8x512xf32>
    %8 = arith.addf %6, %7 : vector<8x512xf32>
    %9 = vector.extract_strided_slice %8 {offsets = [0, 0], sizes = [8, 128], strides = [1, 1]} : vector<8x512xf32> to vector<8x128xf32>
    %10 = arith.negf %9 : vector<8x128xf32>
    %11 = math.exp %10 : vector<8x128xf32>
    %cst_6 = arith.constant 1.000000e+00 : f32
    %12 = vector.broadcast %cst_6 : f32 to vector<8x128xf32>
    %13 = arith.addf %12, %11 : vector<8x128xf32>
    %14 = arith.divf %12, %13 : vector<8x128xf32>
    %15 = vector.extract_strided_slice %8 {offsets = [0, 128], sizes = [8, 128], strides = [1, 1]} : vector<8x512xf32> to vector<8x128xf32>
    %16 = arith.negf %15 : vector<8x128xf32>
    %17 = math.exp %16 : vector<8x128xf32>
    %cst_7 = arith.constant 1.000000e+00 : f32
    %18 = vector.broadcast %cst_7 : f32 to vector<8x128xf32>
    %19 = arith.addf %18, %17 : vector<8x128xf32>
    %20 = arith.divf %18, %19 : vector<8x128xf32>
    %21 = vector.extract_strided_slice %8 {offsets = [0, 256], sizes = [8, 128], strides = [1, 1]} : vector<8x512xf32> to vector<8x128xf32>
    %22 = math.tanh %21 : vector<8x128xf32>
    %23 = vector.extract_strided_slice %8 {offsets = [0, 384], sizes = [8, 128], strides = [1, 1]} : vector<8x512xf32> to vector<8x128xf32>
    %24 = arith.negf %23 : vector<8x128xf32>
    %25 = math.exp %24 : vector<8x128xf32>
    %cst_8 = arith.constant 1.000000e+00 : f32
    %26 = vector.broadcast %cst_8 : f32 to vector<8x128xf32>
    %27 = arith.addf %26, %25 : vector<8x128xf32>
    %28 = arith.divf %26, %27 : vector<8x128xf32>
    %29 = arith.mulf %20, %3 : vector<8x128xf32>
    %30 = arith.mulf %14, %22 : vector<8x128xf32>
    %31 = arith.addf %29, %30 : vector<8x128xf32>
    %32 = math.tanh %31 : vector<8x128xf32>
    %33 = arith.mulf %28, %32 : vector<8x128xf32>
    %c1_i32 = arith.constant 1 : i32
    %34 = arith.index_cast %c1_i32 : i32 to index
    %c0_9 = arith.constant 0 : index
    %c0_10 = arith.constant 0 : index
    %35 = vector.load %arg1[%34, %c0_9, %c0_10] : memref<8x8x512xf32, #tpu.memory_space<vmem>>, vector<1x8x512xf32>
    %36 = vector.shape_cast %35 : vector<1x8x512xf32> to vector<8x512xf32>
    %cst_11 = arith.constant dense<0.000000e+00> : vector<8x512xf32>
    %37 = tpu.matmul %33, %1, %cst_11 {dimension_numbers = #tpu.dot_dimension_numbers<[1], [0], [0], [1], [0, 0, 1, 1], [], []>} : vector<8x128xf32>, vector<128x512xf32>, vector<8x512xf32> -> vector<8x512xf32>
    %38 = arith.addf %36, %37 : vector<8x512xf32>
    %39 = vector.extract_strided_slice %38 {offsets = [0, 0], sizes = [8, 128], strides = [1, 1]} : vector<8x512xf32> to vector<8x128xf32>
    %40 = arith.negf %39 : vector<8x128xf32>
    %41 = math.exp %40 : vector<8x128xf32>
    %cst_12 = arith.constant 1.000000e+00 : f32
    %42 = vector.broadcast %cst_12 : f32 to vector<8x128xf32>
    %43 = arith.addf %42, %41 : vector<8x128xf32>
    %44 = arith.divf %42, %43 : vector<8x128xf32>
    %45 = vector.extract_strided_slice %38 {offsets = [0, 128], sizes = [8, 128], strides = [1, 1]} : vector<8x512xf32> to vector<8x128xf32>
    %46 = arith.negf %45 : vector<8x128xf32>
    %47 = math.exp %46 : vector<8x128xf32>
    %cst_13 = arith.constant 1.000000e+00 : f32
    %48 = vector.broadcast %cst_13 : f32 to vector<8x128xf32>
    %49 = arith.addf %48, %47 : vector<8x128xf32>
    %50 = arith.divf %48, %49 : vector<8x128xf32>
    %51 = vector.extract_strided_slice %38 {offsets = [0, 256], sizes = [8, 128], strides = [1, 1]} : vector<8x512xf32> to vector<8x128xf32>
    %52 = math.tanh %51 : vector<8x128xf32>
    %53 = vector.extract_strided_slice %38 {offsets = [0, 384], sizes = [8, 128], strides = [1, 1]} : vector<8x512xf32> to vector<8x128xf32>
    %54 = arith.negf %53 : vector<8x128xf32>
    %55 = math.exp %54 : vector<8x128xf32>
    %cst_14 = arith.constant 1.000000e+00 : f32
    %56 = vector.broadcast %cst_14 : f32 to vector<8x128xf32>
    %57 = arith.addf %56, %55 : vector<8x128xf32>
    %58 = arith.divf %56, %57 : vector<8x128xf32>
    %59 = arith.mulf %50, %31 : vector<8x128xf32>
    %60 = arith.mulf %44, %52 : vector<8x128xf32>
    %61 = arith.addf %59, %60 : vector<8x128xf32>
    %62 = math.tanh %61 : vector<8x128xf32>
    %63 = arith.mulf %58, %62 : vector<8x128xf32>
    %c2_i32 = arith.constant 2 : i32
    %64 = arith.index_cast %c2_i32 : i32 to index
    %c0_15 = arith.constant 0 : index
    %c0_16 = arith.constant 0 : index
    %65 = vector.load %arg1[%64, %c0_15, %c0_16] : memref<8x8x512xf32, #tpu.memory_space<vmem>>, vector<1x8x512xf32>
    %66 = vector.shape_cast %65 : vector<1x8x512xf32> to vector<8x512xf32>
    %cst_17 = arith.constant dense<0.000000e+00> : vector<8x512xf32>
    %67 = tpu.matmul %63, %1, %cst_17 {dimension_numbers = #tpu.dot_dimension_numbers<[1], [0], [0], [1], [0, 0, 1, 1], [], []>} : vector<8x128xf32>, vector<128x512xf32>, vector<8x512xf32> -> vector<8x512xf32>
    %68 = arith.addf %66, %67 : vector<8x512xf32>
    %69 = vector.extract_strided_slice %68 {offsets = [0, 0], sizes = [8, 128], strides = [1, 1]} : vector<8x512xf32> to vector<8x128xf32>
    %70 = arith.negf %69 : vector<8x128xf32>
    %71 = math.exp %70 : vector<8x128xf32>
    %cst_18 = arith.constant 1.000000e+00 : f32
    %72 = vector.broadcast %cst_18 : f32 to vector<8x128xf32>
    %73 = arith.addf %72, %71 : vector<8x128xf32>
    %74 = arith.divf %72, %73 : vector<8x128xf32>
    %75 = vector.extract_strided_slice %68 {offsets = [0, 128], sizes = [8, 128], strides = [1, 1]} : vector<8x512xf32> to vector<8x128xf32>
    %76 = arith.negf %75 : vector<8x128xf32>
    %77 = math.exp %76 : vector<8x128xf32>
    %cst_19 = arith.constant 1.000000e+00 : f32
    %78 = vector.broadcast %cst_19 : f32 to vector<8x128xf32>
    %79 = arith.addf %78, %77 : vector<8x128xf32>
    %80 = arith.divf %78, %79 : vector<8x128xf32>
    %81 = vector.extract_strided_slice %68 {offsets = [0, 256], sizes = [8, 128], strides = [1, 1]} : vector<8x512xf32> to vector<8x128xf32>
    %82 = math.tanh %81 : vector<8x128xf32>
    %83 = vector.extract_strided_slice %68 {offsets = [0, 384], sizes = [8, 128], strides = [1, 1]} : vector<8x512xf32> to vector<8x128xf32>
    %84 = arith.negf %83 : vector<8x128xf32>
    %85 = math.exp %84 : vector<8x128xf32>
    %cst_20 = arith.constant 1.000000e+00 : f32
    %86 = vector.broadcast %cst_20 : f32 to vector<8x128xf32>
    %87 = arith.addf %86, %85 : vector<8x128xf32>
    %88 = arith.divf %86, %87 : vector<8x128xf32>
    %89 = arith.mulf %80, %61 : vector<8x128xf32>
    %90 = arith.mulf %74, %82 : vector<8x128xf32>
    %91 = arith.addf %89, %90 : vector<8x128xf32>
    %92 = math.tanh %91 : vector<8x128xf32>
    %93 = arith.mulf %88, %92 : vector<8x128xf32>
    %c3_i32 = arith.constant 3 : i32
    %94 = arith.index_cast %c3_i32 : i32 to index
    %c0_21 = arith.constant 0 : index
    %c0_22 = arith.constant 0 : index
    %95 = vector.load %arg1[%94, %c0_21, %c0_22] : memref<8x8x512xf32, #tpu.memory_space<vmem>>, vector<1x8x512xf32>
    %96 = vector.shape_cast %95 : vector<1x8x512xf32> to vector<8x512xf32>
    %cst_23 = arith.constant dense<0.000000e+00> : vector<8x512xf32>
    %97 = tpu.matmul %93, %1, %cst_23 {dimension_numbers = #tpu.dot_dimension_numbers<[1], [0], [0], [1], [0, 0, 1, 1], [], []>} : vector<8x128xf32>, vector<128x512xf32>, vector<8x512xf32> -> vector<8x512xf32>
    %98 = arith.addf %96, %97 : vector<8x512xf32>
    %99 = vector.extract_strided_slice %98 {offsets = [0, 0], sizes = [8, 128], strides = [1, 1]} : vector<8x512xf32> to vector<8x128xf32>
    %100 = arith.negf %99 : vector<8x128xf32>
    %101 = math.exp %100 : vector<8x128xf32>
    %cst_24 = arith.constant 1.000000e+00 : f32
    %102 = vector.broadcast %cst_24 : f32 to vector<8x128xf32>
    %103 = arith.addf %102, %101 : vector<8x128xf32>
    %104 = arith.divf %102, %103 : vector<8x128xf32>
    %105 = vector.extract_strided_slice %98 {offsets = [0, 128], sizes = [8, 128], strides = [1, 1]} : vector<8x512xf32> to vector<8x128xf32>
    %106 = arith.negf %105 : vector<8x128xf32>
    %107 = math.exp %106 : vector<8x128xf32>
    %cst_25 = arith.constant 1.000000e+00 : f32
    %108 = vector.broadcast %cst_25 : f32 to vector<8x128xf32>
    %109 = arith.addf %108, %107 : vector<8x128xf32>
    %110 = arith.divf %108, %109 : vector<8x128xf32>
    %111 = vector.extract_strided_slice %98 {offsets = [0, 256], sizes = [8, 128], strides = [1, 1]} : vector<8x512xf32> to vector<8x128xf32>
    %112 = math.tanh %111 : vector<8x128xf32>
    %113 = vector.extract_strided_slice %98 {offsets = [0, 384], sizes = [8, 128], strides = [1, 1]} : vector<8x512xf32> to vector<8x128xf32>
    %114 = arith.negf %113 : vector<8x128xf32>
    %115 = math.exp %114 : vector<8x128xf32>
    %cst_26 = arith.constant 1.000000e+00 : f32
    %116 = vector.broadcast %cst_26 : f32 to vector<8x128xf32>
    %117 = arith.addf %116, %115 : vector<8x128xf32>
    %118 = arith.divf %116, %117 : vector<8x128xf32>
    %119 = arith.mulf %110, %91 : vector<8x128xf32>
    %120 = arith.mulf %104, %112 : vector<8x128xf32>
    %121 = arith.addf %119, %120 : vector<8x128xf32>
    %122 = math.tanh %121 : vector<8x128xf32>
    %123 = arith.mulf %118, %122 : vector<8x128xf32>
    %c4_i32 = arith.constant 4 : i32
    %124 = arith.index_cast %c4_i32 : i32 to index
    %c0_27 = arith.constant 0 : index
    %c0_28 = arith.constant 0 : index
    %125 = vector.load %arg1[%124, %c0_27, %c0_28] : memref<8x8x512xf32, #tpu.memory_space<vmem>>, vector<1x8x512xf32>
    %126 = vector.shape_cast %125 : vector<1x8x512xf32> to vector<8x512xf32>
    %cst_29 = arith.constant dense<0.000000e+00> : vector<8x512xf32>
    %127 = tpu.matmul %123, %1, %cst_29 {dimension_numbers = #tpu.dot_dimension_numbers<[1], [0], [0], [1], [0, 0, 1, 1], [], []>} : vector<8x128xf32>, vector<128x512xf32>, vector<8x512xf32> -> vector<8x512xf32>
    %128 = arith.addf %126, %127 : vector<8x512xf32>
    %129 = vector.extract_strided_slice %128 {offsets = [0, 0], sizes = [8, 128], strides = [1, 1]} : vector<8x512xf32> to vector<8x128xf32>
    %130 = arith.negf %129 : vector<8x128xf32>
    %131 = math.exp %130 : vector<8x128xf32>
    %cst_30 = arith.constant 1.000000e+00 : f32
    %132 = vector.broadcast %cst_30 : f32 to vector<8x128xf32>
    %133 = arith.addf %132, %131 : vector<8x128xf32>
    %134 = arith.divf %132, %133 : vector<8x128xf32>
    %135 = vector.extract_strided_slice %128 {offsets = [0, 128], sizes = [8, 128], strides = [1, 1]} : vector<8x512xf32> to vector<8x128xf32>
    %136 = arith.negf %135 : vector<8x128xf32>
    %137 = math.exp %136 : vector<8x128xf32>
    %cst_31 = arith.constant 1.000000e+00 : f32
    %138 = vector.broadcast %cst_31 : f32 to vector<8x128xf32>
    %139 = arith.addf %138, %137 : vector<8x128xf32>
    %140 = arith.divf %138, %139 : vector<8x128xf32>
    %141 = vector.extract_strided_slice %128 {offsets = [0, 256], sizes = [8, 128], strides = [1, 1]} : vector<8x512xf32> to vector<8x128xf32>
    %142 = math.tanh %141 : vector<8x128xf32>
    %143 = vector.extract_strided_slice %128 {offsets = [0, 384], sizes = [8, 128], strides = [1, 1]} : vector<8x512xf32> to vector<8x128xf32>
    %144 = arith.negf %143 : vector<8x128xf32>
    %145 = math.exp %144 : vector<8x128xf32>
    %cst_32 = arith.constant 1.000000e+00 : f32
    %146 = vector.broadcast %cst_32 : f32 to vector<8x128xf32>
    %147 = arith.addf %146, %145 : vector<8x128xf32>
    %148 = arith.divf %146, %147 : vector<8x128xf32>
    %149 = arith.mulf %140, %121 : vector<8x128xf32>
    %150 = arith.mulf %134, %142 : vector<8x128xf32>
    %151 = arith.addf %149, %150 : vector<8x128xf32>
    %152 = math.tanh %151 : vector<8x128xf32>
    %153 = arith.mulf %148, %152 : vector<8x128xf32>
    %c5_i32 = arith.constant 5 : i32
    %154 = arith.index_cast %c5_i32 : i32 to index
    %c0_33 = arith.constant 0 : index
    %c0_34 = arith.constant 0 : index
    %155 = vector.load %arg1[%154, %c0_33, %c0_34] : memref<8x8x512xf32, #tpu.memory_space<vmem>>, vector<1x8x512xf32>
    %156 = vector.shape_cast %155 : vector<1x8x512xf32> to vector<8x512xf32>
    %cst_35 = arith.constant dense<0.000000e+00> : vector<8x512xf32>
    %157 = tpu.matmul %153, %1, %cst_35 {dimension_numbers = #tpu.dot_dimension_numbers<[1], [0], [0], [1], [0, 0, 1, 1], [], []>} : vector<8x128xf32>, vector<128x512xf32>, vector<8x512xf32> -> vector<8x512xf32>
    %158 = arith.addf %156, %157 : vector<8x512xf32>
    %159 = vector.extract_strided_slice %158 {offsets = [0, 0], sizes = [8, 128], strides = [1, 1]} : vector<8x512xf32> to vector<8x128xf32>
    %160 = arith.negf %159 : vector<8x128xf32>
    %161 = math.exp %160 : vector<8x128xf32>
    %cst_36 = arith.constant 1.000000e+00 : f32
    %162 = vector.broadcast %cst_36 : f32 to vector<8x128xf32>
    %163 = arith.addf %162, %161 : vector<8x128xf32>
    %164 = arith.divf %162, %163 : vector<8x128xf32>
    %165 = vector.extract_strided_slice %158 {offsets = [0, 128], sizes = [8, 128], strides = [1, 1]} : vector<8x512xf32> to vector<8x128xf32>
    %166 = arith.negf %165 : vector<8x128xf32>
    %167 = math.exp %166 : vector<8x128xf32>
    %cst_37 = arith.constant 1.000000e+00 : f32
    %168 = vector.broadcast %cst_37 : f32 to vector<8x128xf32>
    %169 = arith.addf %168, %167 : vector<8x128xf32>
    %170 = arith.divf %168, %169 : vector<8x128xf32>
    %171 = vector.extract_strided_slice %158 {offsets = [0, 256], sizes = [8, 128], strides = [1, 1]} : vector<8x512xf32> to vector<8x128xf32>
    %172 = math.tanh %171 : vector<8x128xf32>
    %173 = vector.extract_strided_slice %158 {offsets = [0, 384], sizes = [8, 128], strides = [1, 1]} : vector<8x512xf32> to vector<8x128xf32>
    %174 = arith.negf %173 : vector<8x128xf32>
    %175 = math.exp %174 : vector<8x128xf32>
    %cst_38 = arith.constant 1.000000e+00 : f32
    %176 = vector.broadcast %cst_38 : f32 to vector<8x128xf32>
    %177 = arith.addf %176, %175 : vector<8x128xf32>
    %178 = arith.divf %176, %177 : vector<8x128xf32>
    %179 = arith.mulf %170, %151 : vector<8x128xf32>
    %180 = arith.mulf %164, %172 : vector<8x128xf32>
    %181 = arith.addf %179, %180 : vector<8x128xf32>
    %182 = math.tanh %181 : vector<8x128xf32>
    %183 = arith.mulf %178, %182 : vector<8x128xf32>
    %c6_i32 = arith.constant 6 : i32
    %184 = arith.index_cast %c6_i32 : i32 to index
    %c0_39 = arith.constant 0 : index
    %c0_40 = arith.constant 0 : index
    %185 = vector.load %arg1[%184, %c0_39, %c0_40] : memref<8x8x512xf32, #tpu.memory_space<vmem>>, vector<1x8x512xf32>
    %186 = vector.shape_cast %185 : vector<1x8x512xf32> to vector<8x512xf32>
    %cst_41 = arith.constant dense<0.000000e+00> : vector<8x512xf32>
    %187 = tpu.matmul %183, %1, %cst_41 {dimension_numbers = #tpu.dot_dimension_numbers<[1], [0], [0], [1], [0, 0, 1, 1], [], []>} : vector<8x128xf32>, vector<128x512xf32>, vector<8x512xf32> -> vector<8x512xf32>
    %188 = arith.addf %186, %187 : vector<8x512xf32>
    %189 = vector.extract_strided_slice %188 {offsets = [0, 0], sizes = [8, 128], strides = [1, 1]} : vector<8x512xf32> to vector<8x128xf32>
    %190 = arith.negf %189 : vector<8x128xf32>
    %191 = math.exp %190 : vector<8x128xf32>
    %cst_42 = arith.constant 1.000000e+00 : f32
    %192 = vector.broadcast %cst_42 : f32 to vector<8x128xf32>
    %193 = arith.addf %192, %191 : vector<8x128xf32>
    %194 = arith.divf %192, %193 : vector<8x128xf32>
    %195 = vector.extract_strided_slice %188 {offsets = [0, 128], sizes = [8, 128], strides = [1, 1]} : vector<8x512xf32> to vector<8x128xf32>
    %196 = arith.negf %195 : vector<8x128xf32>
    %197 = math.exp %196 : vector<8x128xf32>
    %cst_43 = arith.constant 1.000000e+00 : f32
    %198 = vector.broadcast %cst_43 : f32 to vector<8x128xf32>
    %199 = arith.addf %198, %197 : vector<8x128xf32>
    %200 = arith.divf %198, %199 : vector<8x128xf32>
    %201 = vector.extract_strided_slice %188 {offsets = [0, 256], sizes = [8, 128], strides = [1, 1]} : vector<8x512xf32> to vector<8x128xf32>
    %202 = math.tanh %201 : vector<8x128xf32>
    %203 = vector.extract_strided_slice %188 {offsets = [0, 384], sizes = [8, 128], strides = [1, 1]} : vector<8x512xf32> to vector<8x128xf32>
    %204 = arith.negf %203 : vector<8x128xf32>
    %205 = math.exp %204 : vector<8x128xf32>
    %cst_44 = arith.constant 1.000000e+00 : f32
    %206 = vector.broadcast %cst_44 : f32 to vector<8x128xf32>
    %207 = arith.addf %206, %205 : vector<8x128xf32>
    %208 = arith.divf %206, %207 : vector<8x128xf32>
    %209 = arith.mulf %200, %181 : vector<8x128xf32>
    %210 = arith.mulf %194, %202 : vector<8x128xf32>
    %211 = arith.addf %209, %210 : vector<8x128xf32>
    %212 = math.tanh %211 : vector<8x128xf32>
    %213 = arith.mulf %208, %212 : vector<8x128xf32>
    %c7_i32 = arith.constant 7 : i32
    %214 = arith.index_cast %c7_i32 : i32 to index
    %c0_45 = arith.constant 0 : index
    %c0_46 = arith.constant 0 : index
    %215 = vector.load %arg1[%214, %c0_45, %c0_46] : memref<8x8x512xf32, #tpu.memory_space<vmem>>, vector<1x8x512xf32>
    %216 = vector.shape_cast %215 : vector<1x8x512xf32> to vector<8x512xf32>
    %cst_47 = arith.constant dense<0.000000e+00> : vector<8x512xf32>
    %217 = tpu.matmul %213, %1, %cst_47 {dimension_numbers = #tpu.dot_dimension_numbers<[1], [0], [0], [1], [0, 0, 1, 1], [], []>} : vector<8x128xf32>, vector<128x512xf32>, vector<8x512xf32> -> vector<8x512xf32>
    %218 = arith.addf %216, %217 : vector<8x512xf32>
    %219 = vector.extract_strided_slice %218 {offsets = [0, 0], sizes = [8, 128], strides = [1, 1]} : vector<8x512xf32> to vector<8x128xf32>
    %220 = arith.negf %219 : vector<8x128xf32>
    %221 = math.exp %220 : vector<8x128xf32>
    %cst_48 = arith.constant 1.000000e+00 : f32
    %222 = vector.broadcast %cst_48 : f32 to vector<8x128xf32>
    %223 = arith.addf %222, %221 : vector<8x128xf32>
    %224 = arith.divf %222, %223 : vector<8x128xf32>
    %225 = vector.extract_strided_slice %218 {offsets = [0, 128], sizes = [8, 128], strides = [1, 1]} : vector<8x512xf32> to vector<8x128xf32>
    %226 = arith.negf %225 : vector<8x128xf32>
    %227 = math.exp %226 : vector<8x128xf32>
    %cst_49 = arith.constant 1.000000e+00 : f32
    %228 = vector.broadcast %cst_49 : f32 to vector<8x128xf32>
    %229 = arith.addf %228, %227 : vector<8x128xf32>
    %230 = arith.divf %228, %229 : vector<8x128xf32>
    %231 = vector.extract_strided_slice %218 {offsets = [0, 256], sizes = [8, 128], strides = [1, 1]} : vector<8x512xf32> to vector<8x128xf32>
    %232 = math.tanh %231 : vector<8x128xf32>
    %233 = vector.extract_strided_slice %218 {offsets = [0, 384], sizes = [8, 128], strides = [1, 1]} : vector<8x512xf32> to vector<8x128xf32>
    %234 = arith.negf %233 : vector<8x128xf32>
    %235 = math.exp %234 : vector<8x128xf32>
    %cst_50 = arith.constant 1.000000e+00 : f32
    %236 = vector.broadcast %cst_50 : f32 to vector<8x128xf32>
    %237 = arith.addf %236, %235 : vector<8x128xf32>
    %238 = arith.divf %236, %237 : vector<8x128xf32>
    %239 = arith.mulf %230, %211 : vector<8x128xf32>
    %240 = arith.mulf %224, %232 : vector<8x128xf32>
    %241 = arith.addf %239, %240 : vector<8x128xf32>
    %242 = math.tanh %241 : vector<8x128xf32>
    %243 = arith.mulf %238, %242 : vector<8x128xf32>
    %c8_i32 = arith.constant 8 : i32
    %c0_51 = arith.constant 0 : index
    %c0_52 = arith.constant 0 : index
    %c0_53 = arith.constant 0 : index
    %244 = vector.load %arg2[%c0_51, %c0_52, %c0_53] : memref<1x8x512xf32, #tpu.memory_space<vmem>>, vector<1x8x512xf32>
    %245 = vector.shape_cast %244 : vector<1x8x512xf32> to vector<8x512xf32>
    %246 = vector.extract_strided_slice %245 {offsets = [0, 0], sizes = [8, 128], strides = [1, 1]} : vector<8x512xf32> to vector<8x128xf32>
    %247 = arith.negf %246 : vector<8x128xf32>
    %248 = math.exp %247 : vector<8x128xf32>
    %cst_54 = arith.constant 1.000000e+00 : f32
    %249 = vector.broadcast %cst_54 : f32 to vector<8x128xf32>
    %250 = arith.addf %249, %248 : vector<8x128xf32>
    %251 = arith.divf %249, %250 : vector<8x128xf32>
    %252 = vector.extract_strided_slice %245 {offsets = [0, 256], sizes = [8, 128], strides = [1, 1]} : vector<8x512xf32> to vector<8x128xf32>
    %253 = math.tanh %252 : vector<8x128xf32>
    %254 = vector.extract_strided_slice %245 {offsets = [0, 384], sizes = [8, 128], strides = [1, 1]} : vector<8x512xf32> to vector<8x128xf32>
    %255 = arith.negf %254 : vector<8x128xf32>
    %256 = math.exp %255 : vector<8x128xf32>
    %cst_55 = arith.constant 1.000000e+00 : f32
    %257 = vector.broadcast %cst_55 : f32 to vector<8x128xf32>
    %258 = arith.addf %257, %256 : vector<8x128xf32>
    %259 = arith.divf %257, %258 : vector<8x128xf32>
    %260 = arith.mulf %251, %253 : vector<8x128xf32>
    %261 = math.tanh %260 : vector<8x128xf32>
    %262 = arith.mulf %259, %261 : vector<8x128xf32>
    %c0_56 = arith.constant 0 : index
    %c0_57 = arith.constant 0 : index
    %263 = vector.load %arg4[%c0_56, %c0_57] : memref<256x8xf32, #tpu.memory_space<vmem>>, vector<128x8xf32>
    %cst_58 = arith.constant dense<0.000000e+00> : vector<8x8xf32>
    %264 = tpu.matmul %243, %263, %cst_58 {dimension_numbers = #tpu.dot_dimension_numbers<[1], [0], [0], [1], [0, 0, 1, 1], [], []>} : vector<8x128xf32>, vector<128x8xf32>, vector<8x8xf32> -> vector<8x8xf32>
    %c128 = arith.constant 128 : index
    %c0_59 = arith.constant 0 : index
    %265 = vector.load %arg4[%c128, %c0_59] : memref<256x8xf32, #tpu.memory_space<vmem>>, vector<128x8xf32>
    %cst_60 = arith.constant dense<0.000000e+00> : vector<8x8xf32>
    %266 = tpu.matmul %262, %265, %cst_60 {dimension_numbers = #tpu.dot_dimension_numbers<[1], [0], [0], [1], [0, 0, 1, 1], [], []>} : vector<8x128xf32>, vector<128x8xf32>, vector<8x8xf32> -> vector<8x8xf32>
    %267 = arith.addf %264, %266 : vector<8x8xf32>
    %c0_61 = arith.constant 0 : index
    %c0_62 = arith.constant 0 : index
    %268 = vector.load %arg5[%c0_61, %c0_62] : memref<1x8xf32, #tpu.memory_space<vmem>>, vector<1x8xf32>
    %269 = vector.broadcast %268 : vector<1x8xf32> to vector<8x8xf32>
    %270 = arith.addf %267, %269 : vector<8x8xf32>
    %cst_63 = arith.constant dense<0xFF800000> : vector<8xf32>
    %271 = vector.multi_reduction <maximumf>, %270, %cst_63 [1] : vector<8x8xf32> to vector<8xf32>
    %272 = vector.shape_cast %271 : vector<8xf32> to vector<8x1xf32>
    %273 = vector.broadcast %272 : vector<8x1xf32> to vector<8x8xf32>
    %274 = arith.subf %270, %273 : vector<8x8xf32>
    %275 = math.exp %274 : vector<8x8xf32>
    %cst_64 = arith.constant dense<0.000000e+00> : vector<8xf32>
    %276 = vector.multi_reduction <add>, %275, %cst_64 [1] : vector<8x8xf32> to vector<8xf32>
    %277 = vector.shape_cast %276 : vector<8xf32> to vector<8x1xf32>
    %278 = math.log %277 : vector<8x1xf32>
    %279 = vector.broadcast %278 : vector<8x1xf32> to vector<8x8xf32>
    %280 = arith.subf %274, %279 : vector<8x8xf32>
    %c0_65 = arith.constant 0 : index
    %c0_66 = arith.constant 0 : index
    %281 = vector.load %arg6[%c0_65, %c0_66] : memref<8x8xf32, #tpu.memory_space<vmem>>, vector<8x8xf32>
    tpu.vector_store %arg6[%c0_65, %c0_66], %280 {strides = array<i32>} : memref<8x8xf32, #tpu.memory_space<vmem>>, vector<8x8xf32>,
    return
  }
  func.func @transform_0(%arg0: i32) -> (i32, i32, i32) {
    %c0_i32 = arith.constant 0 : i32
    %c0_i32_0 = arith.constant 0 : i32
    %c0_i32_1 = arith.constant 0 : i32
    %c0_i32_2 = arith.constant 0 : i32
    return %c0_i32, %c0_i32_0, %c0_i32_1 : i32, i32, i32
  }
  func.func @transform_1(%arg0: i32) -> (i32, i32, i32) {
    %c7_i32 = arith.constant 7 : i32
    %c0_i32 = arith.constant 0 : i32
    %c1_i32 = arith.constant 1 : i32
    %c0_i32_0 = arith.constant 0 : i32
    return %c7_i32, %c0_i32, %c1_i32 : i32, i32, i32
  }
  func.func @transform_2(%arg0: i32) -> (i32, i32, i32) {
    %c0_i32 = arith.constant 0 : i32
    %c0_i32_0 = arith.constant 0 : i32
    %c0_i32_1 = arith.constant 0 : i32
    %c0_i32_2 = arith.constant 0 : i32
    return %c0_i32, %c0_i32_0, %c0_i32_1 : i32, i32, i32
  }
  func.func @transform_3(%arg0: i32) -> (i32, i32) {
    %c0_i32 = arith.constant 0 : i32
    %c0_i32_0 = arith.constant 0 : i32
    %c0_i32_1 = arith.constant 0 : i32
    return %c0_i32, %c0_i32_0 : i32, i32
  }
  func.func @transform_4(%arg0: i32) -> (i32, i32) {
    %c0_i32 = arith.constant 0 : i32
    %c0_i32_0 = arith.constant 0 : i32
    %c0_i32_1 = arith.constant 0 : i32
    return %c0_i32, %c0_i32_0 : i32, i32
  }
  func.func @transform_5(%arg0: i32) -> (i32, i32) {
    %c0_i32 = arith.constant 0 : i32
    %c0_i32_0 = arith.constant 0 : i32
    %c0_i32_1 = arith.constant 0 : i32
    return %c0_i32, %c0_i32_0 : i32, i32
  }
}

</mosaic_0001>

<bundles_post_ra>
// kernel: forward.4
= control target key start
LH: loop header
LB: loop body
LE: loop exit
PB: predicated region body
PF: predicated region fallthrough
CT: control target
= control target key end

     0   :  { %v674_v3 = vmov 0.0   ;;  %vm80_vm0 = vcmask 130048   ;;  %v40_v33 = vlaneseq  ;;  %s1132_s1 = inlined_call_operand.vmem [shape: f32[16,1024], index: 1, kind: input, shape index: {}]   ;;  %s1133_s0 = inlined_call_operand.vmem [shape: f32[64,16], index: 0, kind: input, shape index: {}]   ;;  %s1134_s2 = inlined_call_operand.vmem [shape: f32[1,1024], index: 2, kind: input, shape index: {}]   ;;  %s1135_s3 = inlined_call_operand.vmem [shape: f32[64,1024], index: 3, kind: output, shape index: {}]  }
   0x1   :  { %v23_v0 = vld [vmem:[%s1132_s1 + $0x8] sm:$0xff]  ;;  %v25_v2 = vld [vmem:[%s1132_s1 + $0x18] sm:$0xff]  ;;  %169 = vmatprep.mubr.f32.mxu0 %v674_v3  ;;  %282 = vmatprep.mubr.f32.mxu1 %v674_v3  ;;  %v22_v6 = vld [vmem:[%s1132_s1] sm:$0xff] }
   0x2   :  { %v31_v1 = vld [vmem:[%s1132_s1 + $0x48] sm:$0xff]  ;;  %v33_v5 = vld [vmem:[%s1132_s1 + $0x58] sm:$0xff]  ;;  %v30_v7 = vld [vmem:[%s1132_s1 + $0x40] sm:$0xff]  ;;  %v837_v34 = vshrl.u32 %v40_v33, 7 }
   0x3   :  { %v657_v4 = vpack.c.bf16 %v31_v1, %v23_v0  ;;  %v661_v8 = vpack.c.bf16 %v33_v5, %v25_v2  ;;  %v659_v9 = vpack.c.bf16 %v30_v7, %v22_v6  ;;  %v24_v10 = vld [vmem:[%s1132_s1 + $0x10] sm:$0xff]  ;;  %v724_v12 = vld [vmem:[%s1133_s0] sm:$0xff]  ;;  %v27_v14 = vld [vmem:[%s1132_s1 + $0x28] sm:$0xff] }
   0x4   :  { %v32_v11 = vld [vmem:[%s1132_s1 + $0x50] sm:$0xff]  ;;  %v35_v15 = vld [vmem:[%s1132_s1 + $0x68] sm:$0xff]  ;;  %v29_v16 = vld [vmem:[%s1132_s1 + $0x38] sm:$0xff]  ;;  %v42_v35 = vsub.s32 0, %v837_v34  ;;  %v50_v37 = vsub.s32 2, %v837_v34  ;;  %v46_v38 = vsub.s32 1, %v837_v34 }
   0x5   :  { %658 = vmatprep.subr.bf16.mxu0 %v657_v4  ;;  %v663_v13 = vpack.c.bf16 %v32_v11, %v24_v10  ;;  %662 = vmatprep.subr.bf16.mxu1 %v661_v8  ;;  %v665_v17 = vpack.c.bf16 %v35_v15, %v27_v14  ;;  %v37_v18 = vld [vmem:[%s1132_s1 + $0x78] sm:$0xff]  ;;  %v26_v19 = vld [vmem:[%s1132_s1 + $0x20] sm:$0xff]  ;;  %v28_v23 = vld [vmem:[%s1132_s1 + $0x30] sm:$0xff]  ;;  %v54_v39 = vsub.s32 3, %v837_v34 }
   0x6   :  { %660 = vmatpush1.bf16.msra.mxu0 %v659_v9  ;;  %v34_v20 = vld [vmem:[%s1132_s1 + $0x60] sm:$0xff]  ;;  %v669_v21 = vpack.c.bf16 %v37_v18, %v29_v16  ;;  %v36_v24 = vld [vmem:[%s1132_s1 + $0x70] sm:$0xff]  ;;  %v15_v26 = vld [vmem:[%s1133_s0 + $0x8] sm:$0xff] }
   0x7   :  { %664 = vmatpush1.bf16.msra.mxu1 %v663_v13  ;;  %v667_v22 = vpack.c.bf16 %v34_v20, %v26_v19  ;;  %666 = vmatprep.subr.bf16.mxu0 %v665_v17  ;;  %v671_v25 = vpack.c.bf16 %v36_v24, %v28_v23  ;;  %v16_v27 = vld [vmem:[%s1133_s0 + $0x10] sm:$0xff]  ;;  %v17_v28 = vld [vmem:[%s1133_s0 + $0x18] sm:$0xff]  ;;  %v18_v29 = vld [vmem:[%s1133_s0 + $0x20] sm:$0xff] }
   0x8   :  { %670 = vmatprep.subr.bf16.mxu1 %v669_v21  ;;  %v19_v30 = vld [vmem:[%s1133_s0 + $0x28] sm:$0xff]  ;;  %v20_v31 = vld [vmem:[%s1133_s0 + $0x30] sm:$0xff]  ;;  %v21_v32 = vld [vmem:[%s1133_s0 + $0x38] sm:$0xff] }
   0x9   :  { %625 = vmatmul.mubr.msk.f32.vlgmr.msra.gmra.mrb[0].mxu0 %vm80_vm0, %v724_v12  ;;  %v843_v36 = vld [vmem:[%s1134_s2] sm:$0xff] }
   0xa   :  { %633 = vmatmul.mubr.msk.f32.vlgmr.msra.gmra.mrb[0].mxu1 %vm80_vm0, %v724_v12  ;;  %668 = vmatpush1.bf16.msra.mxu0 %v667_v22  ;;  %v849_v40 = vrot.slane %v843_v36, %v42_v35  ;;  %v852_v41 = vrot.slane %v843_v36, %v50_v37  ;;  %v855_v42 = vrot.slane %v843_v36, %v46_v38  ;;  %v66_v38 = vsub.s32 6, %v837_v34 }
   0xb   :  { %672 = vmatpush1.bf16.msra.mxu1 %v671_v25  ;;  %175 = vmatprep.mubr.f32.mxu0 %v674_v3  ;;  %v858_v43 = vrot.slane %v843_v36, %v54_v39  ;;  %v62_v39 = vsub.s32 5, %v837_v34 }
   0xc   :  { %288 = vmatprep.mubr.f32.mxu1 %v674_v3 }
   0xd   :  { %626 = vmatmul.mubr.msk.f32.gmra.mrb[2].mxu0 %vm80_vm0, %v15_v26 }
   0xe   :  { %634 = vmatmul.mubr.msk.f32.gmra.mrb[2].mxu1 %vm80_vm0, %v15_v26  ;;  %181 = vmatprep.mubr.f32.mxu0 %v674_v3 }
   0xf   :  { %294 = vmatprep.mubr.f32.mxu1 %v674_v3 }
  0x11   :  { %627 = vmatmul.mubr.msk.f32.gmra.mrb[4].mxu0 %vm80_vm0, %v16_v27 }
  0x12   :  { %635 = vmatmul.mubr.msk.f32.gmra.mrb[4].mxu1 %vm80_vm0, %v16_v27  ;;  %187 = vmatprep.mubr.f32.mxu0 %v674_v3 }
  0x13   :  { %300 = vmatprep.mubr.f32.mxu1 %v674_v3 }
  0x15   :  { %628 = vmatmul.mubr.msk.f32.gmra.mrb[6].mxu0 %vm80_vm0, %v17_v28 }
  0x16   :  { %636 = vmatmul.mubr.msk.f32.gmra.mrb[6].mxu1 %vm80_vm0, %v17_v28  ;;  %193 = vmatprep.mubr.f32.mxu0 %v674_v3 }
  0x17   :  { %306 = vmatprep.mubr.f32.mxu1 %v674_v3 }
  0x19   :  { %629 = vmatmul.mubr.msk.f32.gmra.mrb[8].mxu0 %vm80_vm0, %v18_v29 }
  0x1a   :  { %637 = vmatmul.mubr.msk.f32.gmra.mrb[8].mxu1 %vm80_vm0, %v18_v29  ;;  %199 = vmatprep.mubr.f32.mxu0 %v674_v3 }
  0x1b   :  { %312 = vmatprep.mubr.f32.mxu1 %v674_v3 }
  0x1d   :  { %630 = vmatmul.mubr.msk.f32.gmra.mrb[10].mxu0 %vm80_vm0, %v19_v30 }
  0x1e   :  { %638 = vmatmul.mubr.msk.f32.gmra.mrb[10].mxu1 %vm80_vm0, %v19_v30  ;;  %205 = vmatprep.mubr.f32.mxu0 %v674_v3 }
  0x1f   :  { %318 = vmatprep.mubr.f32.mxu1 %v674_v3 }
  0x21   :  { %631 = vmatmul.mubr.msk.f32.gmra.mrb[12].mxu0 %vm80_vm0, %v20_v31 }
  0x22   :  { %639 = vmatmul.mubr.msk.f32.gmra.mrb[12].mxu1 %vm80_vm0, %v20_v31  ;;  %211 = vmatprep.mubr.f32.mxu0 %v674_v3 }
  0x23   :  { %324 = vmatprep.mubr.f32.mxu1 %v674_v3 }
  0x25   :  { %632 = vmatmul.mubr.msk.f32.gmra.mrb[14].mxu0 %vm80_vm0, %v21_v32 }
  0x26   :  { %640 = vmatmul.mubr.msk.f32.gmra.mrb[14].mxu1 %vm80_vm0, %v21_v32  ;;  %395 = vmatprep.mubr.f32.mxu0 %v674_v3 }
  0x27   :  { %508 = vmatprep.mubr.f32.mxu1 %v674_v3 }
  0x29   :  { %641 = vmatmul.mubr.msk.f32.vlgmr.msra.gmra.mrb[16].mxu0 %vm80_vm0, %v724_v12 }
  0x2a   :  { %649 = vmatmul.mubr.msk.f32.vlgmr.msra.gmra.mrb[16].mxu1 %vm80_vm0, %v724_v12  ;;  %401 = vmatprep.mubr.f32.mxu0 %v674_v3 }
  0x2b   :  { %514 = vmatprep.mubr.f32.mxu1 %v674_v3 }
  0x2d   :  { %642 = vmatmul.mubr.msk.f32.gmra.mrb[18].mxu0 %vm80_vm0, %v15_v26 }
  0x2e   :  { %650 = vmatmul.mubr.msk.f32.gmra.mrb[18].mxu1 %vm80_vm0, %v15_v26  ;;  %407 = vmatprep.mubr.f32.mxu0 %v674_v3 }
  0x2f   :  { %520 = vmatprep.mubr.f32.mxu1 %v674_v3 }
  0x31   :  { %643 = vmatmul.mubr.msk.f32.gmra.mrb[20].mxu0 %vm80_vm0, %v16_v27 }
  0x32   :  { %651 = vmatmul.mubr.msk.f32.gmra.mrb[20].mxu1 %vm80_vm0, %v16_v27  ;;  %413 = vmatprep.mubr.f32.mxu0 %v674_v3 }
  0x33   :  { %526 = vmatprep.mubr.f32.mxu1 %v674_v3 }
  0x35   :  { %644 = vmatmul.mubr.msk.f32.gmra.mrb[22].mxu0 %vm80_vm0, %v17_v28 }
  0x36   :  { %652 = vmatmul.mubr.msk.f32.gmra.mrb[22].mxu1 %vm80_vm0, %v17_v28  ;;  %419 = vmatprep.mubr.f32.mxu0 %v674_v3 }
  0x37   :  { %532 = vmatprep.mubr.f32.mxu1 %v674_v3 }
  0x39   :  { %645 = vmatmul.mubr.msk.f32.gmra.mrb[24].mxu0 %vm80_vm0, %v18_v29 }
  0x3a   :  { %653 = vmatmul.mubr.msk.f32.gmra.mrb[24].mxu1 %vm80_vm0, %v18_v29  ;;  %425 = vmatprep.mubr.f32.mxu0 %v674_v3 }
  0x3b   :  { %538 = vmatprep.mubr.f32.mxu1 %v674_v3 }
  0x3d   :  { %646 = vmatmul.mubr.msk.f32.gmra.mrb[26].mxu0 %vm80_vm0, %v19_v30 }
  0x3e   :  { %654 = vmatmul.mubr.msk.f32.gmra.mrb[26].mxu1 %vm80_vm0, %v19_v30  ;;  %431 = vmatprep.mubr.f32.mxu0 %v674_v3 }
  0x3f   :  { %544 = vmatprep.mubr.f32.mxu1 %v674_v3 }
  0x41   :  { %647 = vmatmul.mubr.msk.f32.gmra.mrb[28].mxu0 %vm80_vm0, %v20_v31 }
  0x42   :  { %655 = vmatmul.mubr.msk.f32.gmra.mrb[28].mxu1 %vm80_vm0, %v20_v31  ;;  %437 = vmatprep.mubr.f32.mxu0 %v674_v3 }
  0x43   :  { %550 = vmatprep.mubr.f32.mxu1 %v674_v3 }
  0x45   :  { %648 = vmatmul.mubr.msk.f32.gmra.mrb[30].mxu0 %vm80_vm0, %v21_v32 }
  0x46   :  { %656 = vmatmul.mubr.msk.f32.gmra.mrb[30].mxu1 %vm80_vm0, %v21_v32  ;;  %v58_v32 = vsub.s32 4, %v837_v34 }
  0xdc   :  { %v171_v44 = vpop.f32.mrb[0].mxu0 }
  0xdd   :  { %v172_v45 = vadd.f32 %v171_v44, %v849_v40  ;;  %v284_v46 = vpop.f32.mrb[0].mxu1  ;;  %v173_v47 = vpop.f32.mrb[1].mxu0 }
  0xde   :  { %v285_v48 = vadd.f32 %v284_v46, %v852_v41  ;;  %v174_v49 = vadd.f32 %v173_v47, %v855_v42  ;;  %v286_v50 = vpop.f32.mrb[1].mxu1 }
  0xdf   :  { %557 = vst [vmem:[%s1135_s3] sm:$0xff] %v172_v45  ;;  %v287_v51 = vadd.f32 %v286_v50, %v858_v43  ;;  %v70_v45 = vsub.s32 7, %v837_v34  ;;  %v978_v50 = vrot.slane %v843_v36, %v58_v32 }
  0xe0   :  { %559 = vst [vmem:[%s1135_s3 + $0x10] sm:$0xff] %v285_v48  ;;  %558 = vst [vmem:[%s1135_s3 + $0x8] sm:$0xff] %v174_v49  ;;  %v177_v52 = vpop.f32.mrb[2].mxu0 }
  0xe1   :  { %560 = vst [vmem:[%s1135_s3 + $0x18] sm:$0xff] %v287_v51  ;;  %v178_v53 = vadd.f32 %v177_v52, %v849_v40  ;;  %v290_v54 = vpop.f32.mrb[2].mxu1  ;;  %v179_v55 = vpop.f32.mrb[3].mxu0 }
  0xe2   :  { %v291_v56 = vadd.f32 %v290_v54, %v852_v41  ;;  %v180_v57 = vadd.f32 %v179_v55, %v855_v42  ;;  %v292_v58 = vpop.f32.mrb[3].mxu1  ;;  %v986_v54 = vrot.slane %v843_v36, %v62_v39  ;;  %v993_v55 = vrot.slane %v843_v36, %v70_v45 }
  0xe3   :  { %565 = vst [vmem:[%s1135_s3 + $0x40] sm:$0xff] %v178_v53  ;;  %v293_v59 = vadd.f32 %v292_v58, %v858_v43  ;;  %v983_v53 = vrot.slane %v843_v36, %v66_v38 }
  0xe4   :  { %567 = vst [vmem:[%s1135_s3 + $0x50] sm:$0xff] %v291_v56  ;;  %566 = vst [vmem:[%s1135_s3 + $0x48] sm:$0xff] %v180_v57  ;;  %v183_v60 = vpop.f32.mrb[4].mxu0 }
  0xe5   :  { %568 = vst [vmem:[%s1135_s3 + $0x58] sm:$0xff] %v293_v59  ;;  %v184_v61 = vadd.f32 %v183_v60, %v849_v40  ;;  %v296_v62 = vpop.f32.mrb[4].mxu1  ;;  %v185_v63 = vpop.f32.mrb[5].mxu0 }
  0xe6   :  { %v297_v0 = vadd.f32 %v296_v62, %v852_v41  ;;  %v186_v1 = vadd.f32 %v185_v63, %v855_v42  ;;  %v298_v2 = vpop.f32.mrb[5].mxu1 }
  0xe7   :  { %573 = vst [vmem:[%s1135_s3 + $0x80] sm:$0xff] %v184_v61  ;;  %v299_v3 = vadd.f32 %v298_v2, %v858_v43 }
  0xe8   :  { %575 = vst [vmem:[%s1135_s3 + $0x90] sm:$0xff] %v297_v0  ;;  %574 = vst [vmem:[%s1135_s3 + $0x88] sm:$0xff] %v186_v1  ;;  %v189_v4 = vpop.f32.mrb[6].mxu0 }
  0xe9   :  { %576 = vst [vmem:[%s1135_s3 + $0x98] sm:$0xff] %v299_v3  ;;  %v190_v5 = vadd.f32 %v189_v4, %v849_v40  ;;  %v302_v6 = vpop.f32.mrb[6].mxu1  ;;  %v191_v7 = vpop.f32.mrb[7].mxu0 }
  0xea   :  { %v303_v8 = vadd.f32 %v302_v6, %v852_v41  ;;  %v192_v9 = vadd.f32 %v191_v7, %v855_v42  ;;  %v304_v10 = vpop.f32.mrb[7].mxu1 }
  0xeb   :  { %581 = vst [vmem:[%s1135_s3 + $0xc0] sm:$0xff] %v190_v5  ;;  %v305_v11 = vadd.f32 %v304_v10, %v858_v43 }
  0xec   :  { %583 = vst [vmem:[%s1135_s3 + $0xd0] sm:$0xff] %v303_v8  ;;  %582 = vst [vmem:[%s1135_s3 + $0xc8] sm:$0xff] %v192_v9  ;;  %v195_v12 = vpop.f32.mrb[8].mxu0 }
  0xed   :  { %584 = vst [vmem:[%s1135_s3 + $0xd8] sm:$0xff] %v305_v11  ;;  %v196_v13 = vadd.f32 %v195_v12, %v849_v40  ;;  %v308_v14 = vpop.f32.mrb[8].mxu1  ;;  %v197_v15 = vpop.f32.mrb[9].mxu0 }
  0xee   :  { %v309_v16 = vadd.f32 %v308_v14, %v852_v41  ;;  %v198_v17 = vadd.f32 %v197_v15, %v855_v42  ;;  %v310_v18 = vpop.f32.mrb[9].mxu1 }
  0xef   :  { %589 = vst [vmem:[%s1135_s3 + $0x100] sm:$0xff] %v196_v13  ;;  %v311_v19 = vadd.f32 %v310_v18, %v858_v43 }
  0xf0   :  { %591 = vst [vmem:[%s1135_s3 + $0x110] sm:$0xff] %v309_v16  ;;  %590 = vst [vmem:[%s1135_s3 + $0x108] sm:$0xff] %v198_v17  ;;  %v201_v20 = vpop.f32.mrb[10].mxu0 }
  0xf1   :  { %592 = vst [vmem:[%s1135_s3 + $0x118] sm:$0xff] %v311_v19  ;;  %v202_v21 = vadd.f32 %v201_v20, %v849_v40  ;;  %v314_v22 = vpop.f32.mrb[10].mxu1  ;;  %v203_v23 = vpop.f32.mrb[11].mxu0 }
  0xf2   :  { %v315_v24 = vadd.f32 %v314_v22, %v852_v41  ;;  %v204_v25 = vadd.f32 %v203_v23, %v855_v42  ;;  %v316_v26 = vpop.f32.mrb[11].mxu1 }
  0xf3   :  { %597 = vst [vmem:[%s1135_s3 + $0x140] sm:$0xff] %v202_v21  ;;  %v317_v27 = vadd.f32 %v316_v26, %v858_v43 }
  0xf4   :  { %599 = vst [vmem:[%s1135_s3 + $0x150] sm:$0xff] %v315_v24  ;;  %598 = vst [vmem:[%s1135_s3 + $0x148] sm:$0xff] %v204_v25  ;;  %v207_v28 = vpop.f32.mrb[12].mxu0 }
  0xf5   :  { %600 = vst [vmem:[%s1135_s3 + $0x158] sm:$0xff] %v317_v27  ;;  %v208_v29 = vadd.f32 %v207_v28, %v849_v40  ;;  %v320_v30 = vpop.f32.mrb[12].mxu1  ;;  %v209_v31 = vpop.f32.mrb[13].mxu0 }
  0xf6   :  { %v321_v33 = vadd.f32 %v320_v30, %v852_v41  ;;  %v210_v35 = vadd.f32 %v209_v31, %v855_v42  ;;  %v322_v37 = vpop.f32.mrb[13].mxu1 }
  0xf7   :  { %605 = vst [vmem:[%s1135_s3 + $0x180] sm:$0xff] %v208_v29  ;;  %v323_v44 = vadd.f32 %v322_v37, %v858_v43 }
  0xf8   :  { %607 = vst [vmem:[%s1135_s3 + $0x190] sm:$0xff] %v321_v33  ;;  %606 = vst [vmem:[%s1135_s3 + $0x188] sm:$0xff] %v210_v35  ;;  %v213_v46 = vpop.f32.mrb[14].mxu0 }
  0xf9   :  { %608 = vst [vmem:[%s1135_s3 + $0x198] sm:$0xff] %v323_v44  ;;  %v214_v47 = vadd.f32 %v213_v46, %v849_v40  ;;  %v326_v48 = vpop.f32.mrb[14].mxu1  ;;  %v215_v49 = vpop.f32.mrb[15].mxu0 }
  0xfa   :  { %v327_v34 = vadd.f32 %v326_v48, %v852_v41  ;;  %v216_v51 = vadd.f32 %v215_v49, %v855_v42  ;;  %v328_v52 = vpop.f32.mrb[15].mxu1 }
  0xfb   :  { %613 = vst [vmem:[%s1135_s3 + $0x1c0] sm:$0xff] %v214_v47  ;;  %v329_v40 = vadd.f32 %v328_v52, %v858_v43 }
  0xfc   :  { %615 = vst [vmem:[%s1135_s3 + $0x1d0] sm:$0xff] %v327_v34  ;;  %614 = vst [vmem:[%s1135_s3 + $0x1c8] sm:$0xff] %v216_v51  ;;  %v397_v41 = vpop.f32.mrb[16].mxu0 }
  0xfd   :  { %616 = vst [vmem:[%s1135_s3 + $0x1d8] sm:$0xff] %v329_v40  ;;  %v398_v42 = vadd.f32 %v397_v41, %v978_v50  ;;  %v510_v56 = vpop.f32.mrb[16].mxu1  ;;  %v399_v43 = vpop.f32.mrb[17].mxu0 }
  0xfe   :  { %v511_v36 = vadd.f32 %v510_v56, %v983_v53  ;;  %v400_v57 = vadd.f32 %v399_v43, %v986_v54  ;;  %v512_v58 = vpop.f32.mrb[17].mxu1 }
  0xff   :  { %561 = vst [vmem:[%s1135_s3 + $0x20] sm:$0xff] %v398_v42  ;;  %v513_v59 = vadd.f32 %v512_v58, %v993_v55 }
 0x100   :  { %563 = vst [vmem:[%s1135_s3 + $0x30] sm:$0xff] %v511_v36  ;;  %562 = vst [vmem:[%s1135_s3 + $0x28] sm:$0xff] %v400_v57  ;;  %v403_v60 = vpop.f32.mrb[18].mxu0 }
 0x101   :  { %564 = vst [vmem:[%s1135_s3 + $0x38] sm:$0xff] %v513_v59  ;;  %v404_v61 = vadd.f32 %v403_v60, %v978_v50  ;;  %v516_v62 = vpop.f32.mrb[18].mxu1  ;;  %v405_v63 = vpop.f32.mrb[19].mxu0 }
 0x102   :  { %v517_v0 = vadd.f32 %v516_v62, %v983_v53  ;;  %v406_v1 = vadd.f32 %v405_v63, %v986_v54  ;;  %v518_v2 = vpop.f32.mrb[19].mxu1 }
 0x103   :  { %569 = vst [vmem:[%s1135_s3 + $0x60] sm:$0xff] %v404_v61  ;;  %v519_v3 = vadd.f32 %v518_v2, %v993_v55 }
 0x104   :  { %571 = vst [vmem:[%s1135_s3 + $0x70] sm:$0xff] %v517_v0  ;;  %570 = vst [vmem:[%s1135_s3 + $0x68] sm:$0xff] %v406_v1  ;;  %v409_v4 = vpop.f32.mrb[20].mxu0 }
 0x105   :  { %572 = vst [vmem:[%s1135_s3 + $0x78] sm:$0xff] %v519_v3  ;;  %v410_v5 = vadd.f32 %v409_v4, %v978_v50  ;;  %v522_v6 = vpop.f32.mrb[20].mxu1  ;;  %v411_v7 = vpop.f32.mrb[21].mxu0 }
 0x106   :  { %v523_v8 = vadd.f32 %v522_v6, %v983_v53  ;;  %v412_v9 = vadd.f32 %v411_v7, %v986_v54  ;;  %v524_v10 = vpop.f32.mrb[21].mxu1 }
 0x107   :  { %577 = vst [vmem:[%s1135_s3 + $0xa0] sm:$0xff] %v410_v5  ;;  %v525_v11 = vadd.f32 %v524_v10, %v993_v55 }
 0x108   :  { %579 = vst [vmem:[%s1135_s3 + $0xb0] sm:$0xff] %v523_v8  ;;  %578 = vst [vmem:[%s1135_s3 + $0xa8] sm:$0xff] %v412_v9  ;;  %v415_v12 = vpop.f32.mrb[22].mxu0 }
 0x109   :  { %580 = vst [vmem:[%s1135_s3 + $0xb8] sm:$0xff] %v525_v11  ;;  %v416_v13 = vadd.f32 %v415_v12, %v978_v50  ;;  %v528_v14 = vpop.f32.mrb[22].mxu1  ;;  %v417_v15 = vpop.f32.mrb[23].mxu0 }
 0x10a   :  { %v529_v16 = vadd.f32 %v528_v14, %v983_v53  ;;  %v418_v17 = vadd.f32 %v417_v15, %v986_v54  ;;  %v530_v18 = vpop.f32.mrb[23].mxu1 }
 0x10b   :  { %585 = vst [vmem:[%s1135_s3 + $0xe0] sm:$0xff] %v416_v13  ;;  %v531_v19 = vadd.f32 %v530_v18, %v993_v55 }
 0x10c   :  { %587 = vst [vmem:[%s1135_s3 + $0xf0] sm:$0xff] %v529_v16  ;;  %586 = vst [vmem:[%s1135_s3 + $0xe8] sm:$0xff] %v418_v17  ;;  %v421_v20 = vpop.f32.mrb[24].mxu0 }
 0x10d   :  { %588 = vst [vmem:[%s1135_s3 + $0xf8] sm:$0xff] %v531_v19  ;;  %v422_v21 = vadd.f32 %v421_v20, %v978_v50  ;;  %v534_v22 = vpop.f32.mrb[24].mxu1  ;;  %v423_v23 = vpop.f32.mrb[25].mxu0 }
 0x10e   :  { %v535_v24 = vadd.f32 %v534_v22, %v983_v53  ;;  %v424_v25 = vadd.f32 %v423_v23, %v986_v54  ;;  %v536_v26 = vpop.f32.mrb[25].mxu1 }
 0x10f   :  { %593 = vst [vmem:[%s1135_s3 + $0x120] sm:$0xff] %v422_v21  ;;  %v537_v27 = vadd.f32 %v536_v26, %v993_v55 }
 0x110   :  { %595 = vst [vmem:[%s1135_s3 + $0x130] sm:$0xff] %v535_v24  ;;  %594 = vst [vmem:[%s1135_s3 + $0x128] sm:$0xff] %v424_v25  ;;  %v427_v28 = vpop.f32.mrb[26].mxu0 }
 0x111   :  { %596 = vst [vmem:[%s1135_s3 + $0x138] sm:$0xff] %v537_v27  ;;  %v428_v29 = vadd.f32 %v427_v28, %v978_v50  ;;  %v540_v30 = vpop.f32.mrb[26].mxu1  ;;  %v429_v31 = vpop.f32.mrb[27].mxu0 }
 0x112   :  { %v541_v32 = vadd.f32 %v540_v30, %v983_v53  ;;  %v430_v33 = vadd.f32 %v429_v31, %v986_v54  ;;  %v542_v35 = vpop.f32.mrb[27].mxu1 }
 0x113   :  { %601 = vst [vmem:[%s1135_s3 + $0x160] sm:$0xff] %v428_v29  ;;  %v543_v37 = vadd.f32 %v542_v35, %v993_v55 }
 0x114   :  { %603 = vst [vmem:[%s1135_s3 + $0x170] sm:$0xff] %v541_v32  ;;  %602 = vst [vmem:[%s1135_s3 + $0x168] sm:$0xff] %v430_v33  ;;  %v433_v38 = vpop.f32.mrb[28].mxu0 }
 0x115   :  { %604 = vst [vmem:[%s1135_s3 + $0x178] sm:$0xff] %v543_v37  ;;  %v434_v39 = vadd.f32 %v433_v38, %v978_v50  ;;  %v546_v44 = vpop.f32.mrb[28].mxu1  ;;  %v435_v45 = vpop.f32.mrb[29].mxu0 }
 0x116   :  { %v547_v46 = vadd.f32 %v546_v44, %v983_v53  ;;  %v436_v47 = vadd.f32 %v435_v45, %v986_v54  ;;  %v548_v48 = vpop.f32.mrb[29].mxu1 }
 0x117   :  { %609 = vst [vmem:[%s1135_s3 + $0x1a0] sm:$0xff] %v434_v39  ;;  %v549_v49 = vadd.f32 %v548_v48, %v993_v55 }
 0x118   :  { %611 = vst [vmem:[%s1135_s3 + $0x1b0] sm:$0xff] %v547_v46  ;;  %610 = vst [vmem:[%s1135_s3 + $0x1a8] sm:$0xff] %v436_v47  ;;  %v439_v34 = vpop.f32.mrb[30].mxu0 }
 0x119   :  { %612 = vst [vmem:[%s1135_s3 + $0x1b8] sm:$0xff] %v549_v49  ;;  %v440_v51 = vadd.f32 %v439_v34, %v978_v50  ;;  %v552_v52 = vpop.f32.mrb[30].mxu1  ;;  %v441_v40 = vpop.f32.mrb[31].mxu0 }
 0x11a   :  { %v553_v41 = vadd.f32 %v552_v52, %v983_v53  ;;  %v442_v42 = vadd.f32 %v441_v40, %v986_v54  ;;  %v554_v56 = vpop.f32.mrb[31].mxu1 }
 0x11b   :  { %617 = vst [vmem:[%s1135_s3 + $0x1e0] sm:$0xff] %v440_v51  ;;  %v555_v43 = vadd.f32 %v554_v56, %v993_v55 }
 0x11c   :  { %619 = vst [vmem:[%s1135_s3 + $0x1f0] sm:$0xff] %v553_v41  ;;  %618 = vst [vmem:[%s1135_s3 + $0x1e8] sm:$0xff] %v442_v42 }
 0x11d   :  { %620 = vst [vmem:[%s1135_s3 + $0x1f8] sm:$0xff] %v555_v43 }

// kernel: forward.5
= control target key start
LH: loop header
LB: loop body
LE: loop exit
PB: predicated region body
PF: predicated region fallthrough
CT: control target
= control target key end

     0   :  { %7 = vsyncpa [#allocation4], 0  ;;  %s3407_s0 = inlined_call_operand.vmem [shape: f32[8,8,1024], index: 0, kind: input, shape index: {}]   ;;  %s3408_s1 = inlined_call_operand.hbm [shape: f32[2,128,512], index: 1, kind: input, shape index: {}]   ;;  %s3409_s2 = inlined_call_operand.vmem [shape: f32[2,8,8,128], index: 2, kind: output, shape index: {}]  }
   0x1   :  { %9 = vsyncpa [#allocation4 + $0x1], 0  ;;  %s2732_s9 = smov 0   ;;  %s2734_s10 = smov 0  }
   0x2   :  { %s2736_s11 = smov 0   ;;  %s2738_s12 = smov 0  }
   0x3 LB: > { %s2751_s13 = sadd.s32 4294967295, %s2711_s12   ;;  %s2754_s14 = sadd.s32 1, %s2711_s12   ;;  %s2711_s12 = sphi %s2738_s12, %s3424_s12   ;;  %s2707_s11 = sphi %s2736_s11, %s3423_s11   ;;  %s2703_s10 = sphi %s2734_s10, %s3422_s10   ;;  %s2699_s9 = sphi %s2732_s9, %s3421_s9  }
   0x4   : > { %s19_s15 = ssub.s32 %s2711_s12, %s2754_s14  ;;  %s22_s16 = sadd.s32 1, %s2707_s11 }
   0x5   : > { %p20_p0 = scmp.eq.s32.totalorder %s19_s15, 0  ;;  %p29_p1 = scmp.ne.s32.totalorder %s2707_s11, %s2703_s10 }
   0x6   : > { %p30_p2 = scmp.eq.s32.totalorder %s2711_s12, 0  ;;  %p61_p3 = scmp.ne.s32.totalorder %s2703_s10, %s2699_s9 }
   0x7   : > { %s2764_s17 = scalar_select %p20_p0, %s2707_s11, %s22_s16  }
   0x8   : > { %p2766_p4 = por %p30_p2, %p29_p1  ;;  %p3410_p5 = scmp.eq.s32.totalorder %s2751_s13, 0 }
   0x9   : > { %p1899_p7 = scmp.ge.s32.totalorder %s2711_s12, 2 }
   0xa   : > { %p2773_p6 = por %p3410_p5, %p61_p3 }
   0xb   : > { %107 = sbr.rel (%p1899_p7) target bundleno = 64 (0x40), region = 16 }
  0x12   : > { %110 = sbr.rel (!%p2766_p4) target bundleno = 38 (0x26), region = 20  ;;  %s112_s20 = sand.u32 (%p2766_p4), 1, %s2707_s11  }
  0x13   : > { %s1961_s21 = sshll.u32 (%p2766_p4), %s2711_s12, 5  ;;  %s1900_s22 = sshll.u32 (%p2766_p4), %s112_s20, 8 }
  0x14   : > { %s2785_s25 = scalar_lea.vmem (%p2766_p4), %s3407_s0, %s1961_s21  ;;  %s2790_s26 = scalar_lea.vmem (%p2766_p4), [#allocation2], %s1900_s22 }
  0x15   : > { %v130_v0 = vld [vmem:[%s2785_s25] sm:$0xff] (%p2766_p4)  ;;  %v132_v1 = vld [vmem:[%s2785_s25 + $0x8] sm:$0xff] (%p2766_p4)  ;;  %v134_v2 = vld [vmem:[%s2785_s25 + $0x10] sm:$0xff] (%p2766_p4) }
  0x16   : > { %131 = vst [vmem:[%s2790_s26] sm:$0xff] (%p2766_p4), %v130_v0  ;;  %133 = vst [vmem:[%s2790_s26 + $0x8] sm:$0xff] (%p2766_p4), %v132_v1  ;;  %v136_v3 = vld [vmem:[%s2785_s25 + $0x18] sm:$0xff] (%p2766_p4)  ;;  %v138_v4 = vld [vmem:[%s2785_s25 + $0x40] sm:$0xff] (%p2766_p4) }
  0x17   : > { %135 = vst [vmem:[%s2790_s26 + $0x10] sm:$0xff] (%p2766_p4), %v134_v2  ;;  %v140_v5 = vld [vmem:[%s2785_s25 + $0x48] sm:$0xff] (%p2766_p4)  ;;  %137 = vst [vmem:[%s2790_s26 + $0x18] sm:$0xff] (%p2766_p4), %v136_v3  ;;  %v142_v6 = vld [vmem:[%s2785_s25 + $0x50] sm:$0xff] (%p2766_p4) }
  0x18   : > { %139 = vst [vmem:[%s2790_s26 + $0x20] sm:$0xff] (%p2766_p4), %v138_v4  ;;  %141 = vst [vmem:[%s2790_s26 + $0x28] sm:$0xff] (%p2766_p4), %v140_v5  ;;  %v144_v7 = vld [vmem:[%s2785_s25 + $0x58] sm:$0xff] (%p2766_p4)  ;;  %v146_v8 = vld [vmem:[%s2785_s25 + $0x80] sm:$0xff] (%p2766_p4) }
  0x19   : > { %143 = vst [vmem:[%s2790_s26 + $0x30] sm:$0xff] %v142_v6  ;;  %145 = vst [vmem:[%s2790_s26 + $0x38] sm:$0xff] %v144_v7  ;;  %v148_v9 = vld [vmem:[%s2785_s25 + $0x88] sm:$0xff]  ;;  %v150_v10 = vld [vmem:[%s2785_s25 + $0x90] sm:$0xff] }
  0x1a   : > { %147 = vst [vmem:[%s2790_s26 + $0x40] sm:$0xff] %v146_v8  ;;  %v152_v11 = vld [vmem:[%s2785_s25 + $0x98] sm:$0xff]  ;;  %149 = vst [vmem:[%s2790_s26 + $0x48] sm:$0xff] %v148_v9  ;;  %v154_v12 = vld [vmem:[%s2785_s25 + $0xc0] sm:$0xff] }
  0x1b   : > { %151 = vst [vmem:[%s2790_s26 + $0x50] sm:$0xff] %v150_v10  ;;  %153 = vst [vmem:[%s2790_s26 + $0x58] sm:$0xff] %v152_v11  ;;  %v156_v13 = vld [vmem:[%s2785_s25 + $0xc8] sm:$0xff]  ;;  %v158_v14 = vld [vmem:[%s2785_s25 + $0xd0] sm:$0xff] }
  0x1c   : > { %155 = vst [vmem:[%s2790_s26 + $0x60] sm:$0xff] %v154_v12  ;;  %157 = vst [vmem:[%s2790_s26 + $0x68] sm:$0xff] %v156_v13  ;;  %v160_v15 = vld [vmem:[%s2785_s25 + $0xd8] sm:$0xff]  ;;  %v162_v16 = vld [vmem:[%s2785_s25 + $0x100] sm:$0xff] }
  0x1d   : > { %159 = vst [vmem:[%s2790_s26 + $0x70] sm:$0xff] %v158_v14  ;;  %v164_v17 = vld [vmem:[%s2785_s25 + $0x108] sm:$0xff]  ;;  %161 = vst [vmem:[%s2790_s26 + $0x78] sm:$0xff] %v160_v15  ;;  %v166_v18 = vld [vmem:[%s2785_s25 + $0x110] sm:$0xff] }
  0x1e   : > { %163 = vst [vmem:[%s2790_s26 + $0x80] sm:$0xff] %v162_v16  ;;  %165 = vst [vmem:[%s2790_s26 + $0x88] sm:$0xff] %v164_v17  ;;  %v168_v19 = vld [vmem:[%s2785_s25 + $0x118] sm:$0xff]  ;;  %v170_v20 = vld [vmem:[%s2785_s25 + $0x140] sm:$0xff] }
  0x1f   : > { %167 = vst [vmem:[%s2790_s26 + $0x90] sm:$0xff] %v166_v18  ;;  %169 = vst [vmem:[%s2790_s26 + $0x98] sm:$0xff] %v168_v19  ;;  %v172_v21 = vld [vmem:[%s2785_s25 + $0x148] sm:$0xff]  ;;  %v174_v22 = vld [vmem:[%s2785_s25 + $0x150] sm:$0xff] }
  0x20   : > { %171 = vst [vmem:[%s2790_s26 + $0xa0] sm:$0xff] %v170_v20  ;;  %v176_v23 = vld [vmem:[%s2785_s25 + $0x158] sm:$0xff]  ;;  %173 = vst [vmem:[%s2790_s26 + $0xa8] sm:$0xff] %v172_v21  ;;  %v178_v24 = vld [vmem:[%s2785_s25 + $0x180] sm:$0xff] }
  0x21   : > { %175 = vst [vmem:[%s2790_s26 + $0xb0] sm:$0xff] %v174_v22  ;;  %177 = vst [vmem:[%s2790_s26 + $0xb8] sm:$0xff] %v176_v23  ;;  %v180_v25 = vld [vmem:[%s2785_s25 + $0x188] sm:$0xff]  ;;  %v182_v26 = vld [vmem:[%s2785_s25 + $0x190] sm:$0xff] }
  0x22   : > { %179 = vst [vmem:[%s2790_s26 + $0xc0] sm:$0xff] %v178_v24  ;;  %181 = vst [vmem:[%s2790_s26 + $0xc8] sm:$0xff] %v180_v25  ;;  %v184_v27 = vld [vmem:[%s2785_s25 + $0x198] sm:$0xff]  ;;  %v186_v28 = vld [vmem:[%s2785_s25 + $0x1c0] sm:$0xff] }
  0x23   : > { %183 = vst [vmem:[%s2790_s26 + $0xd0] sm:$0xff] %v182_v26  ;;  %v188_v29 = vld [vmem:[%s2785_s25 + $0x1c8] sm:$0xff]  ;;  %185 = vst [vmem:[%s2790_s26 + $0xd8] sm:$0xff] %v184_v27  ;;  %v190_v30 = vld [vmem:[%s2785_s25 + $0x1d0] sm:$0xff] }
  0x24   : > { %187 = vst [vmem:[%s2790_s26 + $0xe0] sm:$0xff] %v186_v28  ;;  %189 = vst [vmem:[%s2790_s26 + $0xe8] sm:$0xff] %v188_v29  ;;  %v192_v31 = vld [vmem:[%s2785_s25 + $0x1d8] sm:$0xff] }
  0x25   : > { %191 = vst [vmem:[%s2790_s26 + $0xf0] sm:$0xff] %v190_v30  ;;  %193 = vst [vmem:[%s2790_s26 + $0xf8] sm:$0xff] %v192_v31 }
  0x26 PF: > { %s200_s27 = sand.u32 1, %s2707_s11   ;;  %s1962_s28 = sshll.u32 %s2711_s12, 13 }
  0x27   : > { %s1903_s29 = sshll.u32 %s200_s27, 9  ;;  %s2858_s4 = scalar_lea.hbm %s3408_s1, %s1962_s28 }
  0x28   : > { %s204_s5 = scalar_lea.vmem [#allocation3], %s1903_s29  ;;  %s2862_s7 = scalar_lea.sflag [#allocation4], %s200_s27 }
  0x29   : > { %s211_s6 = sshll.u32 %s204_s5, 4  ;;  %s2649_s8 = scalar_lea.hbm %s2858_s4, 8192  ;;  %s2860_s6 = int_to_ptr.vmem [resolvable:$true] %s211_s6 }
  0x2a   : > { %p2650_p8 = scmp.ne.s32.totalorder %s2858_s4, %s2649_s8  ;;  %s2653_s16 = scalar_lea.hbm %s3408_s1, 16384 }
  0x2b   : > { %p2654_p11 = scmp.lt.u32.totalorder %s2858_s4, %s3408_s1  ;;  %p2655_p12 = scmp.lt.u32.totalorder %s2653_s16, %s2649_s8 }
  0x2c   : > { %p2651_p9 = pnand %p2650_p8, %p2766_p4  ;;  %p2657_p0 = scmp.lt.u32.totalorder %s2649_s8, %s2858_s4 }
  0x2d   : > { %p2656_p13 = por %p2655_p12, %p2654_p11 }
  0x2e   : > { %p2652_p10 = pneg %p2651_p9 }
  0x2f   : > { %p2658_p1 = por %p2657_p0, %p2656_p13 }
  0x31   : > { %p2659_p2 = pnand %p2658_p1, %p2652_p10 }
  0x33   : > { %2662 = shalt.err (!%p2659_p2)
}
  0x34   : > { %s2663_s22 = scalar_lea.vmem %s2860_s6, 8192  ;;  %s2713_s23 = smov [#allocation3]  }
  0x35   : > { %p2664_p3 = scmp.ne.s32.totalorder %s2860_s6, %s2663_s22  ;;  %s2667_s24 = sshll.u32 %s2713_s23, 4  ;;  %s2668_s24 = int_to_ptr.vmem [resolvable:$false] %s2667_s24 }
  0x36   : > { %s2669_s25 = scalar_lea.vmem %s2668_s24, 16384  ;;  %p2670_p9 = scmp.lt.s32.totalorder %s2860_s6, %s2668_s24 }
  0x37   : > { %p2665_p7 = pnand %p2664_p3, %p2766_p4  ;;  %p2671_p5 = scmp.lt.s32.totalorder %s2669_s25, %s2663_s22 }
  0x39   : > { %p2666_p8 = pneg %p2665_p7  ;;  %p2672_p11 = por %p2671_p5, %p2670_p9 }
  0x3b   : > { %p2673_p12 = pnand %p2672_p11, %p2666_p8 }
  0x3d   : > { %2676 = shalt.err (!%p2673_p12)
}
  0x3e   : > { %s2714_s26 = smov 512   ;;  %s2715_s27 = smov 32  }
  0x3f   : > { %2484 = dma.hbm_to_vmem [thread:$0]  (%p2766_p4), %s2858_s4, 8192, %s2860_s6, %s2862_s7, %s2714_s26, %s2714_s26, %s2715_s27  }
  0x40 PF: > { %p1906_p10 = scmp.ge.s32.totalorder %s2711_s12, 1  ;;  %p219_p13 = scmp.lt.s32.totalorder %s2711_s12, 3 }
  0x42   : > { %p220_p0 = pnand %p1906_p10, %p219_p13 }
  0x43   : > { %s226_s28 = sand.u32 (!%p220_p0), 1, %s2703_s10  }
  0x44   : > { %223 = sbr.rel (%p220_p0) target bundleno = 2177 (0x881), region = 47  ;;  %s1907_s29 = sshll.u32 (!%p220_p0), %s226_s28, 8 }
  0x45   : > { %s1908_s30 = sshll.u32 (!%p220_p0), %s226_s28, 9  ;;  %s2889_s3 = scalar_lea.vmem (!%p220_p0), [#allocation2], %s1907_s29 }
  0x46   : > { %s233_s5 = scalar_lea.sflag (!%p220_p0), [#allocation4], %s226_s28  ;;  %s2891_s8 = scalar_lea.vmem (!%p220_p0), [#allocation3], %s1908_s30 }
  0x4b   : > { %2694 = dma.done.wait (%p2773_p6), %s233_s5, 8192  }
  0x4c   : > { %2696 = vsyncadd (%p2773_p6), %s233_s5, 4294959104  ;;  %v2716_v32 = vmov 0.0   ;;  %v268_v33 = vld [vmem:[%s2891_s8 + $0x8] sm:$0xff]  ;;  %v267_v35 = vld [vmem:[%s2891_s8] sm:$0xff]  ;;  %p3413_p4 = scmp.eq.s32.totalorder %s2751_s13, 0  ;;  %p262_p5 = scmp.lt.s32.totalorder %s2751_s13, 1 }
  0x4d   : > { %404 = vmatprep.mubr.f32.mxu0 %v2716_v32  ;;  %475 = vmatprep.mubr.f32.mxu1 %v2716_v32  ;;  %v272_v34 = vld [vmem:[%s2891_s8 + $0x28] sm:$0xff]  ;;  %v271_v37 = vld [vmem:[%s2891_s8 + $0x20] sm:$0xff]  ;;  %v270_v51 = vld [vmem:[%s2891_s8 + $0x18] sm:$0xff] }
  0x4e   : > { %v2902_v36 = vpack.c.bf16 %v272_v34, %v268_v33  ;;  %v276_v38 = vld [vmem:[%s2891_s8 + $0x48] sm:$0xff]  ;;  %v2907_v40 = vpack.c.bf16 %v271_v37, %v267_v35  ;;  %v275_v42 = vld [vmem:[%s2891_s8 + $0x40] sm:$0xff]  ;;  %v274_v52 = vld [vmem:[%s2891_s8 + $0x38] sm:$0xff]  ;;  %s3099_s12 = scalar_select %p3413_p4, 0, 7 }
  0x4f   : > { %v280_v39 = vld [vmem:[%s2891_s8 + $0x68] sm:$0xff]  ;;  %v279_v43 = vld [vmem:[%s2891_s8 + $0x60] sm:$0xff]  ;;  %v2928_v54 = vpack.c.bf16 %v274_v52, %v270_v51  ;;  %v269_v55 = vld [vmem:[%s2891_s8 + $0x10] sm:$0xff]  ;;  %s263_s4 = scalar_select %p262_p5, %s2751_s13, 1 }
  0x50   : > { %v2909_v41 = vpack.c.bf16 %v280_v39, %v276_v38  ;;  %v284_v44 = vld [vmem:[%s2891_s8 + $0x88] sm:$0xff]  ;;  %1973 = vmatprep.subr.bf16.mxu0 %v2902_v36  ;;  %v2917_v46 = vpack.c.bf16 %v279_v43, %v275_v42  ;;  %v283_v47 = vld [vmem:[%s2891_s8 + $0x80] sm:$0xff]  ;;  %v273_v56 = vld [vmem:[%s2891_s8 + $0x30] sm:$0xff]  ;;  %s1964_s18 = sshll.u32 %s3099_s12, 5  ;;  %s1916_s16 = sshll.u32 %s3099_s12, 3 }
  0x51   : > { %v288_v45 = vld [vmem:[%s2891_s8 + $0xa8] sm:$0xff]  ;;  %1975 = vmatpush1.bf16.msra.mxu0 %v2907_v40  ;;  %v287_v48 = vld [vmem:[%s2891_s8 + $0xa0] sm:$0xff]  ;;  %v2932_v57 = vpack.c.bf16 %v273_v56, %v269_v55  ;;  %2005 = vmatprep.subr.bf16.mxu1 %v2928_v54  ;;  %v278_v59 = vld [vmem:[%s2891_s8 + $0x58] sm:$0xff]  ;;  %s335_s19 = scalar_lea.vmem %s2889_s3, %s1964_s18 [#allocation2]  ;;  %s1963_s6 = sshll.u32 %s263_s4, 6 }
  0x52   : > { %1977 = vmatprep.subr.bf16.mxu0 %v2909_v41  ;;  %v2922_v49 = vpack.c.bf16 %v288_v45, %v284_v44  ;;  %v292_v50 = vld [vmem:[%s2891_s8 + $0xc8] sm:$0xff]  ;;  %v2935_v58 = vpack.c.bf16 %v287_v48, %v283_v47  ;;  %v282_v60 = vld [vmem:[%s2891_s8 + $0x78] sm:$0xff]  ;;  %v277_v61 = vld [vmem:[%s2891_s8 + $0x50] sm:$0xff]  ;;  %s3111_s15 = scalar_lea.vmem %s3409_s2, %s1963_s6  ;;  %p3414_p6 = pmov %p3413_p4 }
  0x53   : > { %v296_v53 = vld [vmem:[%s2891_s8 + $0xe8] sm:$0xff]  ;;  %v291_v63 = vld [vmem:[%s2891_s8 + $0xc0] sm:$0xff]  ;;  %2007 = vmatpush1.bf16.msra.mxu1 %v2932_v57  ;;  %v2947_v1 = vpack.c.bf16 %v282_v60, %v278_v59  ;;  %v281_v2 = vld [vmem:[%s2891_s8 + $0x70] sm:$0xff]  ;;  %s511_s20 = scalar_lea.vmem %s3111_s15, %s1916_s16  ;;  %p3415_p1 = pmov %p3413_p4 }
  0x54   : > { %v2942_v62 = vpack.c.bf16 %v296_v53, %v292_v50  ;;  %v295_v0 = vld [vmem:[%s2891_s8 + $0xe0] sm:$0xff]  ;;  %v300_v3 = vld [vmem:[%s2891_s8 + $0x108] sm:$0xff]  ;;  %v2952_v5 = vpack.c.bf16 %v281_v2, %v277_v61  ;;  %v286_v6 = vld [vmem:[%s2891_s8 + $0x98] sm:$0xff]  ;;  %s3151_s21 = scalar_select %p3414_p6, 1, 6 }
  0x55   : > { %1979 = vmatpush1.bf16.msra.mxu0 %v2917_v46  ;;  %v304_v4 = vld [vmem:[%s2891_s8 + $0x128] sm:$0xff]  ;;  %2009 = vmatprep.subr.bf16.mxu1 %v2947_v1  ;;  %v290_v7 = vld [vmem:[%s2891_s8 + $0xb8] sm:$0xff]  ;;  %v285_v8 = vld [vmem:[%s2891_s8 + $0x90] sm:$0xff]  ;;  %v2960_v10 = vpack.c.bf16 %v295_v0, %v291_v63  ;;  %s3197_s26 = scalar_select %p3415_p1, 2, 5 }
  0x56   : > { %1981 = vmatprep.subr.bf16.mxu0 %v2922_v49  ;;  %v289_v9 = vld [vmem:[%s2891_s8 + $0xb0] sm:$0xff]  ;;  %v299_v11 = vld [vmem:[%s2891_s8 + $0x100] sm:$0xff]  ;;  %v2964_v13 = vpack.c.bf16 %v290_v7, %v286_v6  ;;  %v2967_v14 = vpack.c.bf16 %v304_v4, %v300_v3  ;;  %v308_v15 = vld [vmem:[%s2891_s8 + $0x148] sm:$0xff]  ;;  %s1965_s22 = sshll.u32 %s3151_s21, 5  ;;  %s1922_s24 = sshll.u32 %s3151_s21, 3 }
  0x57   : > { %v303_v12 = vld [vmem:[%s2891_s8 + $0x120] sm:$0xff]  ;;  %2011 = vmatpush1.bf16.msra.mxu1 %v2952_v5  ;;  %v2971_v16 = vpack.c.bf16 %v289_v9, %v285_v8  ;;  %v294_v17 = vld [vmem:[%s2891_s8 + $0xd8] sm:$0xff]  ;;  %v312_v19 = vld [vmem:[%s2891_s8 + $0x168] sm:$0xff]  ;;  %s516_s23 = scalar_lea.vmem %s2889_s3, %s1965_s22 [#allocation2]  ;;  %s692_s25 = scalar_lea.vmem %s3111_s15, %s1922_s24 }
  0x58   : > { %v298_v18 = vld [vmem:[%s2891_s8 + $0xf8] sm:$0xff]  ;;  %2013 = vmatprep.subr.bf16.mxu1 %v2964_v13  ;;  %v293_v21 = vld [vmem:[%s2891_s8 + $0xd0] sm:$0xff]  ;;  %v2982_v23 = vpack.c.bf16 %v303_v12, %v299_v11  ;;  %v2987_v26 = vpack.c.bf16 %v312_v19, %v308_v15  ;;  %v307_v27 = vld [vmem:[%s2891_s8 + $0x140] sm:$0xff]  ;;  %s1966_s27 = sshll.u32 %s3197_s26, 5  ;;  %s1928_s29 = sshll.u32 %s3197_s26, 3 }
  0x59   : > { %1983 = vmatpush1.bf16.msra.mxu0 %v2935_v58  ;;  %v2977_v20 = vpack.c.bf16 %v298_v18, %v294_v17  ;;  %v297_v22 = vld [vmem:[%s2891_s8 + $0xf0] sm:$0xff]  ;;  %v302_v24 = vld [vmem:[%s2891_s8 + $0x118] sm:$0xff]  ;;  %v311_v28 = vld [vmem:[%s2891_s8 + $0x160] sm:$0xff]  ;;  %s697_s28 = scalar_lea.vmem %s2889_s3, %s1966_s27 [#allocation2]  ;;  %s873_s30 = scalar_lea.vmem %s3111_s15, %s1928_s29 }
  0x5a   : > { %1985 = vmatprep.subr.bf16.mxu0 %v2942_v62  ;;  %v306_v25 = vld [vmem:[%s2891_s8 + $0x138] sm:$0xff]  ;;  %v316_v29 = vld [vmem:[%s2891_s8 + $0x188] sm:$0xff]  ;;  %v2993_v30 = vpack.c.bf16 %v297_v22, %v293_v21  ;;  %v301_v34 = vld [vmem:[%s2891_s8 + $0x110] sm:$0xff]  ;;  %v3004_v39 = vpack.c.bf16 %v311_v28, %v307_v27  ;;  %p3416_p2 = pmov %p3415_p1  ;;  %p3417_p3 = pmov %p3415_p1 }
  0x5b   : > { %2015 = vmatpush1.bf16.msra.mxu1 %v2971_v16  ;;  %v320_v31 = vld [vmem:[%s2891_s8 + $0x1a8] sm:$0xff]  ;;  %v2997_v33 = vpack.c.bf16 %v306_v25, %v302_v24  ;;  %v305_v35 = vld [vmem:[%s2891_s8 + $0x130] sm:$0xff]  ;;  %v310_v37 = vld [vmem:[%s2891_s8 + $0x158] sm:$0xff]  ;;  %p3418_p7 = pmov %p3415_p1  ;;  %p3419_p8 = pmov %p3415_p1 }
  0x5c   : > { %2017 = vmatprep.subr.bf16.mxu1 %v2977_v20  ;;  %v314_v38 = vld [vmem:[%s2891_s8 + $0x178] sm:$0xff]  ;;  %v3007_v42 = vpack.c.bf16 %v320_v31, %v316_v29  ;;  %v315_v43 = vld [vmem:[%s2891_s8 + $0x180] sm:$0xff]  ;;  %v324_v45 = vld [vmem:[%s2891_s8 + $0x1c8] sm:$0xff]  ;;  %v3013_v47 = vpack.c.bf16 %v305_v35, %v301_v34  ;;  %s3243_s5 = scalar_select %p3416_p2, 3, 4 }
  0x5d   : > { %1987 = vmatpush1.bf16.msra.mxu0 %v2960_v10  ;;  %v319_v44 = vld [vmem:[%s2891_s8 + $0x1a0] sm:$0xff]  ;;  %v328_v48 = vld [vmem:[%s2891_s8 + $0x1e8] sm:$0xff]  ;;  %v3017_v50 = vpack.c.bf16 %v314_v38, %v310_v37  ;;  %v309_v51 = vld [vmem:[%s2891_s8 + $0x150] sm:$0xff]  ;;  %s3289_s4 = scalar_select %p3417_p3, 4, 3 }
  0x5e   : > { %1989 = vmatprep.subr.bf16.mxu0 %v2967_v14  ;;  %v313_v52 = vld [vmem:[%s2891_s8 + $0x170] sm:$0xff]  ;;  %v318_v53 = vld [vmem:[%s2891_s8 + $0x198] sm:$0xff]  ;;  %v3024_v56 = vpack.c.bf16 %v319_v44, %v315_v43  ;;  %v3027_v59 = vpack.c.bf16 %v328_v48, %v324_v45  ;;  %v323_v60 = vld [vmem:[%s2891_s8 + $0x1c0] sm:$0xff]  ;;  %s1934_s18 = sshll.u32 %s3243_s5, 3  ;;  %p3420_p9 = pmov %p3415_p1 }
  0x5f   : > { %2019 = vmatpush1.bf16.msra.mxu1 %v2993_v30  ;;  %v322_v55 = vld [vmem:[%s2891_s8 + $0x1b8] sm:$0xff]  ;;  %v327_v61 = vld [vmem:[%s2891_s8 + $0x1e0] sm:$0xff]  ;;  %v3032_v63 = vpack.c.bf16 %v313_v52, %v309_v51  ;;  %v317_v2 = vld [vmem:[%s2891_s8 + $0x190] sm:$0xff]  ;;  %s1968_s6 = sshll.u32 %s3289_s4, 5  ;;  %s1940_s9 = sshll.u32 %s3289_s4, 3 }
  0x60   : > { %2021 = vmatprep.subr.bf16.mxu1 %v2997_v33  ;;  %v3035_v0 = vpack.c.bf16 %v322_v55, %v318_v53  ;;  %v321_v3 = vld [vmem:[%s2891_s8 + $0x1b0] sm:$0xff]  ;;  %v326_v4 = vld [vmem:[%s2891_s8 + $0x1d8] sm:$0xff]  ;;  %v3042_v7 = vpack.c.bf16 %v327_v61, %v323_v60  ;;  %v336_v17 = vld [vmem:[%s335_s19] sm:$0xff]  ;;  %s1059_s7 = scalar_lea.vmem %s2889_s3, %s1968_s6 [#allocation2]  ;;  %s1235_s16 = scalar_lea.vmem %s3111_s15, %s1940_s9 }
  0x61   : > { %1991 = vmatpush1.bf16.msra.mxu0 %v2982_v23  ;;  %v330_v6 = vld [vmem:[%s2891_s8 + $0x1f8] sm:$0xff]  ;;  %v3046_v8 = vpack.c.bf16 %v321_v3, %v317_v2  ;;  %v325_v11 = vld [vmem:[%s2891_s8 + $0x1d0] sm:$0xff]  ;;  %v337_v18 = vld [vmem:[%s335_s19 + $0x8] sm:$0xff] }
  0x62   : > { %1993 = vmatprep.subr.bf16.mxu0 %v2987_v26  ;;  %v3049_v9 = vpack.c.bf16 %v330_v6, %v326_v4  ;;  %v329_v12 = vld [vmem:[%s2891_s8 + $0x1f0] sm:$0xff]  ;;  %v339_v28 = vld [vmem:[%s335_s19 + $0x18] sm:$0xff]  ;;  %s1967_s8 = sshll.u32 %s3243_s5, 5 }
  0x63   : > { %2023 = vmatpush1.bf16.msra.mxu1 %v3013_v47  ;;  %v3055_v15 = vpack.c.bf16 %v329_v12, %v325_v11  ;;  %v338_v35 = vld [vmem:[%s335_s19 + $0x10] sm:$0xff]  ;;  %v517_v12 = vld [vmem:[%s516_s23] sm:$0xff]  ;;  %s878_s12 = scalar_lea.vmem %s2889_s3, %s1967_s8 [#allocation2]  ;;  %s1054_s19 = scalar_lea.vmem %s3111_s15, %s1934_s18 }
  0x64   : > { %2025 = vmatprep.subr.bf16.mxu1 %v3017_v50 }
  0x65   : > { %1995 = vmatpush1.bf16.msra.mxu0 %v3004_v39 }
  0x66   : > { %1997 = vmatprep.subr.bf16.mxu0 %v3007_v42 }
  0x67   : > { %2027 = vmatpush1.bf16.msra.mxu1 %v3032_v63 }
  0x68   : > { %2029 = vmatprep.subr.bf16.mxu1 %v3035_v0 }
  0x69   : > { %1999 = vmatpush1.bf16.msra.mxu0 %v3024_v56 }
  0x6a   : > { %2001 = vmatprep.subr.bf16.mxu0 %v3027_v59 }
  0x6b   : > { %2031 = vmatpush1.bf16.msra.mxu1 %v3046_v8 }
  0x6c   : > { %2033 = vmatprep.subr.bf16.mxu1 %v3049_v9 }
  0x6d   : > { %2003 = vmatpush1.bf16.msra.mxu0 %v3042_v7 }
  0x6e   : > { %2037 = vmatprep.subr.bf16.mxu0 %v2902_v36 }
  0x6f   : > { %2035 = vmatpush1.bf16.msra.mxu1 %v3055_v15 }
  0x70   : > { %405 = vmatmul.mubr.f32.vlgmr.msra.gmra.mrb[0].mxu0 %v2716_v32  ;;  %2069 = vmatprep.subr.bf16.mxu1 %v2928_v54 }
  0x71   : > { %2039 = vmatpush1.bf16.msra.mxu0 %v2907_v40  ;;  %585 = vmatprep.mubr.f32.mxu0 %v2716_v32 }
  0x72   : > { %2041 = vmatprep.subr.bf16.mxu0 %v2909_v41  ;;  %476 = vmatmul.mubr.f32.vlgmr.msra.gmra.mrb[0].mxu1 %v2716_v32 }
  0x73   : > { %2071 = vmatpush1.bf16.msra.mxu1 %v2932_v57  ;;  %656 = vmatprep.mubr.f32.mxu1 %v2716_v32 }
  0x74   : > { %2073 = vmatprep.subr.bf16.mxu1 %v2947_v1 }
  0x75   : > { %2043 = vmatpush1.bf16.msra.mxu0 %v2917_v46 }
  0x76   : > { %2045 = vmatprep.subr.bf16.mxu0 %v2922_v49 }
  0x77   : > { %2075 = vmatpush1.bf16.msra.mxu1 %v2952_v5 }
  0x78   : > { %2077 = vmatprep.subr.bf16.mxu1 %v2964_v13 }
  0x79   : > { %2047 = vmatpush1.bf16.msra.mxu0 %v2935_v58 }
  0x7a   : > { %2049 = vmatprep.subr.bf16.mxu0 %v2942_v62 }
  0x7b   : > { %2079 = vmatpush1.bf16.msra.mxu1 %v2971_v16 }
  0x7c   : > { %2081 = vmatprep.subr.bf16.mxu1 %v2977_v20 }
  0x7d   : > { %2051 = vmatpush1.bf16.msra.mxu0 %v2960_v10 }
  0x7e   : > { %2053 = vmatprep.subr.bf16.mxu0 %v2967_v14 }
  0x7f   : > { %2083 = vmatpush1.bf16.msra.mxu1 %v2993_v30 }
  0x80   : > { %2085 = vmatprep.subr.bf16.mxu1 %v2997_v33 }
  0x81   : > { %2055 = vmatpush1.bf16.msra.mxu0 %v2982_v23 }
  0x82   : > { %2057 = vmatprep.subr.bf16.mxu0 %v2987_v26 }
  0x83   : > { %2087 = vmatpush1.bf16.msra.mxu1 %v3013_v47 }
  0x84   : > { %2089 = vmatprep.subr.bf16.mxu1 %v3017_v50 }
  0x85   : > { %2059 = vmatpush1.bf16.msra.mxu0 %v3004_v39 }
  0x86   : > { %2061 = vmatprep.subr.bf16.mxu0 %v3007_v42 }
  0x87   : > { %2091 = vmatpush1.bf16.msra.mxu1 %v3032_v63 }
  0x88   : > { %2093 = vmatprep.subr.bf16.mxu1 %v3035_v0 }
  0x89   : > { %2063 = vmatpush1.bf16.msra.mxu0 %v3024_v56 }
  0x8a   : > { %2065 = vmatprep.subr.bf16.mxu0 %v3027_v59 }
  0x8b   : > { %2095 = vmatpush1.bf16.msra.mxu1 %v3046_v8 }
  0x8c   : > { %2097 = vmatprep.subr.bf16.mxu1 %v3049_v9 }
  0x8d   : > { %2067 = vmatpush1.bf16.msra.mxu0 %v3042_v7 }
  0x8e   : > { %2101 = vmatprep.subr.bf16.mxu0 %v2902_v36 }
  0x8f   : > { %2099 = vmatpush1.bf16.msra.mxu1 %v3055_v15 }
  0x90   : > { %2133 = vmatprep.subr.bf16.mxu1 %v2928_v54 }
 0x143   : > { %v406_v19 = vpop.f32.mrb[0].mxu0 }
 0x144   : > { %v482_v21 = vadd.f32 %v406_v19, %v336_v17  ;;  %v408_v22 = vpop.f32.mrb[1].mxu0  ;;  %v518_v17 = vld [vmem:[%s516_s23 + $0x8] sm:$0xff] }
 0x145   : > { %v483_v24 = vadd.f32 %v408_v22, %v337_v18  ;;  %v477_v29 = vpop.f32.mrb[0].mxu1 }
 0x146   : > { %v1913_v25 = vmul.f32 -1.442695, %v482_v21  ;;  %v479_v31 = vpop.f32.mrb[1].mxu1  ;;  %v484_v38 = vadd.f32 %v477_v29, %v338_v35  ;;  %v520_v29 = vld [vmem:[%s516_s23 + $0x18] sm:$0xff] }
 0x147   : > { %v1914_v27 = vmul.f32 -1.442695, %v483_v24  ;;  %v485_v34 = vadd.f32 %v479_v31, %v339_v28 }
 0x148   : > { %2521 = vpow2.f32 %v1913_v25 }
 0x149   : > { %2523 = vpow2.f32 %v1914_v27  ;;  %v1915_v37 = vmul.f32 -1.442695, %v485_v34  ;;  %v519_v34 = vld [vmem:[%s516_s23 + $0x10] sm:$0xff] }
 0x14b   : > { %2525 = vpow2.f32 %v1915_v37 }
 0x14c   : > { %2527 = vtanh.f32 %v484_v38 }
 0x152   : > { %v2522_v43 = vpop.eup %2521 }
 0x153   : > { %v2524_v44 = vpop.eup %2523  ;;  %v489_v45 = vadd.f32 1.0, %v2522_v43 }
 0x154   : > { %v495_v48 = vadd.f32 1.0, %v2524_v44 }
 0x155   : > { %2529 = vrcp.f32 %v489_v45  ;;  %v2526_v51 = vpop.eup %2525 }
 0x156   : > { %2531 = vrcp.f32 %v495_v48  ;;  %v2528_v52 = vpop.eup %2527  ;;  %v502_v55 = vadd.f32 1.0, %v2526_v51 }
 0x158   : > { %2533 = vrcp.f32 %v502_v55 }
 0x15f   : > { %v2530_v53 = vpop.eup %2529 }
 0x160   : > { %v2532_v60 = vpop.eup %2531  ;;  %v506_v61 = vmul.f32 %v2530_v53, %v2528_v52 }
 0x161   : > { %v505_v2 = vmul.f32 0.0, %v2532_v60 }
 0x162   : > { %v2534_v4 = vpop.eup %2533 }
 0x163   : > { %v3104_v3 = vadd.f32 %v506_v61, %v505_v2 }
 0x165   : > { %2535 = vtanh.f32 %v3104_v3 }
 0x16f   : > { %v2536_v6 = vpop.eup %2535 }
 0x170   : > { %v509_v11 = vmul.f32 %v2536_v6, %v2534_v4 }
 0x172   : > { %512 = vst [vmem:[%s511_s20] sm:$0xff] %v509_v11  ;;  %586 = vmatmul.mubr.f32.vlgmr.msra.gmra.mrb[2].mxu0 %v509_v11  ;;  %657 = vmatmul.mubr.f32.vlgmr.msra.gmra.mrb[2].mxu1 %v509_v11  ;;  %s3335_s20 = scalar_select %p3418_p7, 5, 2 }
 0x173   : > { %2103 = vmatpush1.bf16.msra.mxu0 %v2907_v40  ;;  %2135 = vmatpush1.bf16.msra.mxu1 %v2932_v57 }
 0x174   : > { %2105 = vmatprep.subr.bf16.mxu0 %v2909_v41  ;;  %2137 = vmatprep.subr.bf16.mxu1 %v2947_v1  ;;  %s1969_s21 = sshll.u32 %s3335_s20, 5  ;;  %s1946_s23 = sshll.u32 %s3335_s20, 3 }
 0x175   : > { %766 = vmatprep.mubr.f32.mxu0 %v2716_v32  ;;  %837 = vmatprep.mubr.f32.mxu1 %v2716_v32  ;;  %s1240_s22 = scalar_lea.vmem %s2889_s3, %s1969_s21 [#allocation2]  ;;  %s1416_s24 = scalar_lea.vmem %s3111_s15, %s1946_s23 }
 0x177   : > { %2107 = vmatpush1.bf16.msra.mxu0 %v2917_v46  ;;  %2139 = vmatpush1.bf16.msra.mxu1 %v2952_v5 }
 0x178   : > { %2109 = vmatprep.subr.bf16.mxu0 %v2922_v49  ;;  %2141 = vmatprep.subr.bf16.mxu1 %v2964_v13 }
 0x17b   : > { %2111 = vmatpush1.bf16.msra.mxu0 %v2935_v58  ;;  %2143 = vmatpush1.bf16.msra.mxu1 %v2971_v16 }
 0x17c   : > { %2113 = vmatprep.subr.bf16.mxu0 %v2942_v62  ;;  %2145 = vmatprep.subr.bf16.mxu1 %v2977_v20 }
 0x17f   : > { %2115 = vmatpush1.bf16.msra.mxu0 %v2960_v10  ;;  %2147 = vmatpush1.bf16.msra.mxu1 %v2993_v30 }
 0x180   : > { %2117 = vmatprep.subr.bf16.mxu0 %v2967_v14  ;;  %2149 = vmatprep.subr.bf16.mxu1 %v2997_v33 }
 0x183   : > { %2119 = vmatpush1.bf16.msra.mxu0 %v2982_v23  ;;  %2151 = vmatpush1.bf16.msra.mxu1 %v3013_v47 }
 0x184   : > { %2121 = vmatprep.subr.bf16.mxu0 %v2987_v26  ;;  %2153 = vmatprep.subr.bf16.mxu1 %v3017_v50 }
 0x187   : > { %2123 = vmatpush1.bf16.msra.mxu0 %v3004_v39  ;;  %2155 = vmatpush1.bf16.msra.mxu1 %v3032_v63 }
 0x188   : > { %2125 = vmatprep.subr.bf16.mxu0 %v3007_v42  ;;  %2157 = vmatprep.subr.bf16.mxu1 %v3035_v0 }
 0x18b   : > { %2127 = vmatpush1.bf16.msra.mxu0 %v3024_v56  ;;  %2159 = vmatpush1.bf16.msra.mxu1 %v3046_v8 }
 0x18c   : > { %2129 = vmatprep.subr.bf16.mxu0 %v3027_v59  ;;  %2161 = vmatprep.subr.bf16.mxu1 %v3049_v9 }
 0x18f   : > { %2131 = vmatpush1.bf16.msra.mxu0 %v3042_v7  ;;  %2163 = vmatpush1.bf16.msra.mxu1 %v3055_v15 }
 0x190   : > { %2165 = vmatprep.subr.bf16.mxu0 %v2902_v36  ;;  %2197 = vmatprep.subr.bf16.mxu1 %v2928_v54 }
 0x245   : > { %v587_v18 = vpop.f32.mrb[2].mxu0  ;;  %v658_v19 = vpop.f32.mrb[2].mxu1 }
 0x246   : > { %v663_v21 = vadd.f32 %v587_v18, %v517_v12  ;;  %v589_v22 = vpop.f32.mrb[3].mxu0  ;;  %v660_v24 = vpop.f32.mrb[3].mxu1  ;;  %v665_v37 = vadd.f32 %v658_v19, %v519_v34  ;;  %v699_v12 = vld [vmem:[%s697_s28 + $0x8] sm:$0xff] }
 0x247   : > { %v664_v25 = vadd.f32 %v589_v22, %v518_v17  ;;  %v666_v31 = vadd.f32 %v660_v24, %v520_v29 }
 0x248   : > { %v1919_v27 = vmul.f32 -1.442695, %v663_v21 }
 0x249   : > { %v1920_v28 = vmul.f32 -1.442695, %v664_v25  ;;  %v1921_v35 = vmul.f32 -1.442695, %v666_v31  ;;  %v700_v31 = vld [vmem:[%s697_s28 + $0x10] sm:$0xff] }
 0x24a   : > { %2537 = vpow2.f32 %v1919_v27 }
 0x24b   : > { %2539 = vpow2.f32 %v1920_v28  ;;  %v701_v28 = vld [vmem:[%s697_s28 + $0x18] sm:$0xff] }
 0x24c   : > { %2541 = vpow2.f32 %v1921_v35 }
 0x24d   : > { %2543 = vtanh.f32 %v665_v37 }
 0x254   : > { %v2538_v38 = vpop.eup %2537 }
 0x255   : > { %v2540_v43 = vpop.eup %2539  ;;  %v670_v44 = vadd.f32 1.0, %v2538_v38 }
 0x256   : > { %v676_v45 = vadd.f32 1.0, %v2540_v43  ;;  %v2542_v48 = vpop.eup %2541 }
 0x257   : > { %2545 = vrcp.f32 %v670_v44  ;;  %v2544_v51 = vpop.eup %2543  ;;  %v683_v60 = vadd.f32 1.0, %v2542_v48 }
 0x258   : > { %2547 = vrcp.f32 %v676_v45 }
 0x259   : > { %2549 = vrcp.f32 %v683_v60 }
 0x261   : > { %v2546_v52 = vpop.eup %2545 }
 0x262   : > { %v2548_v53 = vpop.eup %2547  ;;  %v687_v55 = vmul.f32 %v2546_v52, %v2544_v51 }
 0x263   : > { %v686_v61 = vmul.f32 %v2548_v53, %v3104_v3  ;;  %v2550_v4 = vpop.eup %2549  ;;  %v698_v3 = vld [vmem:[%s697_s28] sm:$0xff] }
 0x265   : > { %v3156_v2 = vadd.f32 %v687_v55, %v686_v61 }
 0x267   : > { %2551 = vtanh.f32 %v3156_v2 }
 0x271   : > { %v2552_v6 = vpop.eup %2551 }
 0x272   : > { %v690_v11 = vmul.f32 %v2552_v6, %v2550_v4 }
 0x274   : > { %693 = vst [vmem:[%s692_s25] sm:$0xff] %v690_v11  ;;  %767 = vmatmul.mubr.f32.vlgmr.msra.gmra.mrb[4].mxu0 %v690_v11  ;;  %838 = vmatmul.mubr.f32.vlgmr.msra.gmra.mrb[4].mxu1 %v690_v11  ;;  %s3379_s25 = scalar_select %p3419_p8, 6, 1 }
 0x275   : > { %2167 = vmatpush1.bf16.msra.mxu0 %v2907_v40  ;;  %2199 = vmatpush1.bf16.msra.mxu1 %v2932_v57 }
 0x276   : > { %2169 = vmatprep.subr.bf16.mxu0 %v2909_v41  ;;  %2201 = vmatprep.subr.bf16.mxu1 %v2947_v1  ;;  %s1970_s26 = sshll.u32 %s3379_s25, 5  ;;  %s1952_s28 = sshll.u32 %s3379_s25, 3 }
 0x277   : > { %947 = vmatprep.mubr.f32.mxu0 %v2716_v32  ;;  %1018 = vmatprep.mubr.f32.mxu1 %v2716_v32  ;;  %s1421_s27 = scalar_lea.vmem %s2889_s3, %s1970_s26 [#allocation2]  ;;  %s1597_s29 = scalar_lea.vmem %s3111_s15, %s1952_s28 }
 0x279   : > { %2171 = vmatpush1.bf16.msra.mxu0 %v2917_v46  ;;  %2203 = vmatpush1.bf16.msra.mxu1 %v2952_v5 }
 0x27a   : > { %2173 = vmatprep.subr.bf16.mxu0 %v2922_v49  ;;  %2205 = vmatprep.subr.bf16.mxu1 %v2964_v13 }
 0x27d   : > { %2175 = vmatpush1.bf16.msra.mxu0 %v2935_v58  ;;  %2207 = vmatpush1.bf16.msra.mxu1 %v2971_v16 }
 0x27e   : > { %2177 = vmatprep.subr.bf16.mxu0 %v2942_v62  ;;  %2209 = vmatprep.subr.bf16.mxu1 %v2977_v20 }
 0x281   : > { %2179 = vmatpush1.bf16.msra.mxu0 %v2960_v10  ;;  %2211 = vmatpush1.bf16.msra.mxu1 %v2993_v30 }
 0x282   : > { %2181 = vmatprep.subr.bf16.mxu0 %v2967_v14  ;;  %2213 = vmatprep.subr.bf16.mxu1 %v2997_v33 }
 0x285   : > { %2183 = vmatpush1.bf16.msra.mxu0 %v2982_v23  ;;  %2215 = vmatpush1.bf16.msra.mxu1 %v3013_v47 }
 0x286   : > { %2185 = vmatprep.subr.bf16.mxu0 %v2987_v26  ;;  %2217 = vmatprep.subr.bf16.mxu1 %v3017_v50 }
 0x289   : > { %2187 = vmatpush1.bf16.msra.mxu0 %v3004_v39  ;;  %2219 = vmatpush1.bf16.msra.mxu1 %v3032_v63 }
 0x28a   : > { %2189 = vmatprep.subr.bf16.mxu0 %v3007_v42  ;;  %2221 = vmatprep.subr.bf16.mxu1 %v3035_v0 }
 0x28d   : > { %2191 = vmatpush1.bf16.msra.mxu0 %v3024_v56  ;;  %2223 = vmatpush1.bf16.msra.mxu1 %v3046_v8 }
 0x28e   : > { %2193 = vmatprep.subr.bf16.mxu0 %v3027_v59  ;;  %2225 = vmatprep.subr.bf16.mxu1 %v3049_v9 }
 0x291   : > { %2195 = vmatpush1.bf16.msra.mxu0 %v3042_v7  ;;  %2227 = vmatpush1.bf16.msra.mxu1 %v3055_v15 }
 0x292   : > { %2229 = vmatprep.subr.bf16.mxu0 %v2902_v36  ;;  %2261 = vmatprep.subr.bf16.mxu1 %v2928_v54 }
 0x347   : > { %v768_v17 = vpop.f32.mrb[4].mxu0  ;;  %v839_v18 = vpop.f32.mrb[4].mxu1 }
 0x348   : > { %v844_v19 = vadd.f32 %v768_v17, %v698_v3  ;;  %v770_v21 = vpop.f32.mrb[5].mxu0  ;;  %v841_v22 = vpop.f32.mrb[5].mxu1  ;;  %v846_v35 = vadd.f32 %v839_v18, %v700_v31  ;;  %v880_v3 = vld [vmem:[%s878_s12 + $0x8] sm:$0xff] }
 0x349   : > { %v845_v24 = vadd.f32 %v770_v21, %v699_v12  ;;  %v847_v29 = vadd.f32 %v841_v22, %v701_v28 }
 0x34a   : > { %v1925_v25 = vmul.f32 -1.442695, %v844_v19 }
 0x34b   : > { %v1926_v27 = vmul.f32 -1.442695, %v845_v24  ;;  %v1927_v34 = vmul.f32 -1.442695, %v847_v29  ;;  %v881_v29 = vld [vmem:[%s878_s12 + $0x10] sm:$0xff] }
 0x34c   : > { %2553 = vpow2.f32 %v1925_v25 }
 0x34d   : > { %2555 = vpow2.f32 %v1926_v27  ;;  %v882_v27 = vld [vmem:[%s878_s12 + $0x18] sm:$0xff] }
 0x34e   : > { %2557 = vpow2.f32 %v1927_v34 }
 0x34f   : > { %2559 = vtanh.f32 %v846_v35 }
 0x356   : > { %v2554_v37 = vpop.eup %2553 }
 0x357   : > { %v2556_v38 = vpop.eup %2555  ;;  %v851_v43 = vadd.f32 1.0, %v2554_v37 }
 0x358   : > { %v857_v44 = vadd.f32 1.0, %v2556_v38  ;;  %v2558_v45 = vpop.eup %2557 }
 0x359   : > { %2561 = vrcp.f32 %v851_v43  ;;  %v2560_v48 = vpop.eup %2559  ;;  %v864_v55 = vadd.f32 1.0, %v2558_v45 }
 0x35a   : > { %2563 = vrcp.f32 %v857_v44 }
 0x35b   : > { %2565 = vrcp.f32 %v864_v55 }
 0x363   : > { %v2562_v51 = vpop.eup %2561 }
 0x364   : > { %v2564_v52 = vpop.eup %2563  ;;  %v868_v53 = vmul.f32 %v2562_v51, %v2560_v48 }
 0x365   : > { %v867_v60 = vmul.f32 %v2564_v52, %v3156_v2  ;;  %v2566_v4 = vpop.eup %2565  ;;  %v879_v2 = vld [vmem:[%s878_s12] sm:$0xff] }
 0x367   : > { %v3202_v61 = vadd.f32 %v868_v53, %v867_v60 }
 0x369   : > { %2567 = vtanh.f32 %v3202_v61 }
 0x373   : > { %v2568_v6 = vpop.eup %2567 }
 0x374   : > { %v871_v11 = vmul.f32 %v2568_v6, %v2566_v4 }
 0x376   : > { %874 = vst [vmem:[%s873_s30] sm:$0xff] %v871_v11  ;;  %948 = vmatmul.mubr.f32.vlgmr.msra.gmra.mrb[6].mxu0 %v871_v11  ;;  %1019 = vmatmul.mubr.f32.vlgmr.msra.gmra.mrb[6].mxu1 %v871_v11  ;;  %s3388_s30 = scalar_select %p3420_p9, 7, 0 }
 0x377   : > { %2231 = vmatpush1.bf16.msra.mxu0 %v2907_v40  ;;  %2263 = vmatpush1.bf16.msra.mxu1 %v2932_v57 }
 0x378   : > { %2233 = vmatprep.subr.bf16.mxu0 %v2909_v41  ;;  %2265 = vmatprep.subr.bf16.mxu1 %v2947_v1  ;;  %s1971_s5 = sshll.u32 %s3388_s30, 5  ;;  %s1958_s13 = sshll.u32 %s3388_s30, 3 }
 0x379   : > { %1128 = vmatprep.mubr.f32.mxu0 %v2716_v32  ;;  %1199 = vmatprep.mubr.f32.mxu1 %v2716_v32  ;;  %s1602_s8 = scalar_lea.vmem %s2889_s3, %s1971_s5 [#allocation2]  ;;  %s1778_s3 = scalar_lea.vmem %s3111_s15, %s1958_s13 }
 0x37b   : > { %2235 = vmatpush1.bf16.msra.mxu0 %v2917_v46  ;;  %2267 = vmatpush1.bf16.msra.mxu1 %v2952_v5 }
 0x37c   : > { %2237 = vmatprep.subr.bf16.mxu0 %v2922_v49  ;;  %2269 = vmatprep.subr.bf16.mxu1 %v2964_v13 }
 0x37f   : > { %2239 = vmatpush1.bf16.msra.mxu0 %v2935_v58  ;;  %2271 = vmatpush1.bf16.msra.mxu1 %v2971_v16 }
 0x380   : > { %2241 = vmatprep.subr.bf16.mxu0 %v2942_v62  ;;  %2273 = vmatprep.subr.bf16.mxu1 %v2977_v20 }
 0x383   : > { %2243 = vmatpush1.bf16.msra.mxu0 %v2960_v10  ;;  %2275 = vmatpush1.bf16.msra.mxu1 %v2993_v30 }
 0x384   : > { %2245 = vmatprep.subr.bf16.mxu0 %v2967_v14  ;;  %2277 = vmatprep.subr.bf16.mxu1 %v2997_v33 }
 0x387   : > { %2247 = vmatpush1.bf16.msra.mxu0 %v2982_v23  ;;  %2279 = vmatpush1.bf16.msra.mxu1 %v3013_v47 }
 0x388   : > { %2249 = vmatprep.subr.bf16.mxu0 %v2987_v26  ;;  %2281 = vmatprep.subr.bf16.mxu1 %v3017_v50 }
 0x38b   : > { %2251 = vmatpush1.bf16.msra.mxu0 %v3004_v39  ;;  %2283 = vmatpush1.bf16.msra.mxu1 %v3032_v63 }
 0x38c   : > { %2253 = vmatprep.subr.bf16.mxu0 %v3007_v42  ;;  %2285 = vmatprep.subr.bf16.mxu1 %v3035_v0 }
 0x38f   : > { %2255 = vmatpush1.bf16.msra.mxu0 %v3024_v56  ;;  %2287 = vmatpush1.bf16.msra.mxu1 %v3046_v8 }
 0x390   : > { %2257 = vmatprep.subr.bf16.mxu0 %v3027_v59  ;;  %2289 = vmatprep.subr.bf16.mxu1 %v3049_v9 }
 0x393   : > { %2259 = vmatpush1.bf16.msra.mxu0 %v3042_v7  ;;  %2291 = vmatpush1.bf16.msra.mxu1 %v3055_v15 }
 0x394   : > { %2293 = vmatprep.subr.bf16.mxu0 %v2902_v36  ;;  %2325 = vmatprep.subr.bf16.mxu1 %v2928_v54 }
 0x449   : > { %v949_v12 = vpop.f32.mrb[6].mxu0  ;;  %v1020_v17 = vpop.f32.mrb[6].mxu1 }
 0x44a   : > { %v1025_v18 = vadd.f32 %v949_v12, %v879_v2  ;;  %v951_v19 = vpop.f32.mrb[7].mxu0  ;;  %v1022_v21 = vpop.f32.mrb[7].mxu1  ;;  %v1027_v34 = vadd.f32 %v1020_v17, %v881_v29  ;;  %v1061_v2 = vld [vmem:[%s1059_s7 + $0x8] sm:$0xff] }
 0x44b   : > { %v1026_v22 = vadd.f32 %v951_v19, %v880_v3  ;;  %v1028_v28 = vadd.f32 %v1022_v21, %v882_v27 }
 0x44c   : > { %v1931_v24 = vmul.f32 -1.442695, %v1025_v18 }
 0x44d   : > { %v1932_v25 = vmul.f32 -1.442695, %v1026_v22  ;;  %v1933_v31 = vmul.f32 -1.442695, %v1028_v28  ;;  %v1062_v28 = vld [vmem:[%s1059_s7 + $0x10] sm:$0xff] }
 0x44e   : > { %2569 = vpow2.f32 %v1931_v24 }
 0x44f   : > { %2571 = vpow2.f32 %v1932_v25  ;;  %v1063_v25 = vld [vmem:[%s1059_s7 + $0x18] sm:$0xff] }
 0x450   : > { %2573 = vpow2.f32 %v1933_v31 }
 0x451   : > { %2575 = vtanh.f32 %v1027_v34 }
 0x458   : > { %v2570_v35 = vpop.eup %2569 }
 0x459   : > { %v2572_v37 = vpop.eup %2571  ;;  %v1032_v38 = vadd.f32 1.0, %v2570_v35 }
 0x45a   : > { %v1038_v43 = vadd.f32 1.0, %v2572_v37  ;;  %v2574_v44 = vpop.eup %2573 }
 0x45b   : > { %2577 = vrcp.f32 %v1032_v38  ;;  %v2576_v45 = vpop.eup %2575  ;;  %v1045_v53 = vadd.f32 1.0, %v2574_v44 }
 0x45c   : > { %2579 = vrcp.f32 %v1038_v43 }
 0x45d   : > { %2581 = vrcp.f32 %v1045_v53 }
 0x465   : > { %v2578_v48 = vpop.eup %2577 }
 0x466   : > { %v2580_v51 = vpop.eup %2579  ;;  %v1049_v52 = vmul.f32 %v2578_v48, %v2576_v45 }
 0x467   : > { %v1048_v55 = vmul.f32 %v2580_v51, %v3202_v61  ;;  %v2582_v4 = vpop.eup %2581  ;;  %v1060_v61 = vld [vmem:[%s1059_s7] sm:$0xff] }
 0x469   : > { %v3248_v60 = vadd.f32 %v1049_v52, %v1048_v55 }
 0x46b   : > { %2583 = vtanh.f32 %v3248_v60 }
 0x475   : > { %v2584_v6 = vpop.eup %2583 }
 0x476   : > { %v1052_v11 = vmul.f32 %v2584_v6, %v2582_v4 }
 0x478   : > { %1055 = vst [vmem:[%s1054_s19] sm:$0xff] %v1052_v11  ;;  %1129 = vmatmul.mubr.f32.vlgmr.msra.gmra.mrb[8].mxu0 %v1052_v11  ;;  %1200 = vmatmul.mubr.f32.vlgmr.msra.gmra.mrb[8].mxu1 %v1052_v11 }
 0x479   : > { %2295 = vmatpush1.bf16.msra.mxu0 %v2907_v40  ;;  %2327 = vmatpush1.bf16.msra.mxu1 %v2932_v57 }
 0x47a   : > { %2297 = vmatprep.subr.bf16.mxu0 %v2909_v41  ;;  %2329 = vmatprep.subr.bf16.mxu1 %v2947_v1 }
 0x47b   : > { %1309 = vmatprep.mubr.f32.mxu0 %v2716_v32  ;;  %1380 = vmatprep.mubr.f32.mxu1 %v2716_v32 }
 0x47d   : > { %2299 = vmatpush1.bf16.msra.mxu0 %v2917_v46  ;;  %2331 = vmatpush1.bf16.msra.mxu1 %v2952_v5 }
 0x47e   : > { %2301 = vmatprep.subr.bf16.mxu0 %v2922_v49  ;;  %2333 = vmatprep.subr.bf16.mxu1 %v2964_v13 }
 0x481   : > { %2303 = vmatpush1.bf16.msra.mxu0 %v2935_v58  ;;  %2335 = vmatpush1.bf16.msra.mxu1 %v2971_v16 }
 0x482   : > { %2305 = vmatprep.subr.bf16.mxu0 %v2942_v62  ;;  %2337 = vmatprep.subr.bf16.mxu1 %v2977_v20 }
 0x485   : > { %2307 = vmatpush1.bf16.msra.mxu0 %v2960_v10  ;;  %2339 = vmatpush1.bf16.msra.mxu1 %v2993_v30 }
 0x486   : > { %2309 = vmatprep.subr.bf16.mxu0 %v2967_v14  ;;  %2341 = vmatprep.subr.bf16.mxu1 %v2997_v33 }
 0x489   : > { %2311 = vmatpush1.bf16.msra.mxu0 %v2982_v23  ;;  %2343 = vmatpush1.bf16.msra.mxu1 %v3013_v47 }
 0x48a   : > { %2313 = vmatprep.subr.bf16.mxu0 %v2987_v26  ;;  %2345 = vmatprep.subr.bf16.mxu1 %v3017_v50 }
 0x48d   : > { %2315 = vmatpush1.bf16.msra.mxu0 %v3004_v39  ;;  %2347 = vmatpush1.bf16.msra.mxu1 %v3032_v63 }
 0x48e   : > { %2317 = vmatprep.subr.bf16.mxu0 %v3007_v42  ;;  %2349 = vmatprep.subr.bf16.mxu1 %v3035_v0 }
 0x491   : > { %2319 = vmatpush1.bf16.msra.mxu0 %v3024_v56  ;;  %2351 = vmatpush1.bf16.msra.mxu1 %v3046_v8 }
 0x492   : > { %2321 = vmatprep.subr.bf16.mxu0 %v3027_v59  ;;  %2353 = vmatprep.subr.bf16.mxu1 %v3049_v9 }
 0x495   : > { %2323 = vmatpush1.bf16.msra.mxu0 %v3042_v7  ;;  %2355 = vmatpush1.bf16.msra.mxu1 %v3055_v15 }
 0x496   : > { %2357 = vmatprep.subr.bf16.mxu0 %v2902_v36  ;;  %2389 = vmatprep.subr.bf16.mxu1 %v2928_v54 }
 0x54b   : > { %v1130_v3 = vpop.f32.mrb[8].mxu0  ;;  %v1201_v12 = vpop.f32.mrb[8].mxu1 }
 0x54c   : > { %v1206_v17 = vadd.f32 %v1130_v3, %v1060_v61  ;;  %v1132_v18 = vpop.f32.mrb[9].mxu0  ;;  %v1203_v19 = vpop.f32.mrb[9].mxu1  ;;  %v1208_v31 = vadd.f32 %v1201_v12, %v1062_v28  ;;  %v1242_v61 = vld [vmem:[%s1240_s22 + $0x8] sm:$0xff] }
 0x54d   : > { %v1207_v21 = vadd.f32 %v1132_v18, %v1061_v2  ;;  %v1209_v27 = vadd.f32 %v1203_v19, %v1063_v25 }
 0x54e   : > { %v1937_v22 = vmul.f32 -1.442695, %v1206_v17 }
 0x54f   : > { %v1938_v24 = vmul.f32 -1.442695, %v1207_v21  ;;  %v1939_v29 = vmul.f32 -1.442695, %v1209_v27 }
 0x550   : > { %2585 = vpow2.f32 %v1937_v22 }
 0x551   : > { %2587 = vpow2.f32 %v1938_v24  ;;  %v1243_v24 = vld [vmem:[%s1240_s22 + $0x10] sm:$0xff] }
 0x552   : > { %2589 = vpow2.f32 %v1939_v29 }
 0x553   : > { %2591 = vtanh.f32 %v1208_v31 }
 0x55a   : > { %v2586_v34 = vpop.eup %2585 }
 0x55b   : > { %v2588_v35 = vpop.eup %2587  ;;  %v1213_v37 = vadd.f32 1.0, %v2586_v34 }
 0x55c   : > { %v1219_v38 = vadd.f32 1.0, %v2588_v35  ;;  %v2590_v43 = vpop.eup %2589 }
 0x55d   : > { %2593 = vrcp.f32 %v1213_v37  ;;  %v2592_v44 = vpop.eup %2591  ;;  %v1226_v52 = vadd.f32 1.0, %v2590_v43 }
 0x55e   : > { %2595 = vrcp.f32 %v1219_v38 }
 0x55f   : > { %2597 = vrcp.f32 %v1226_v52 }
 0x567   : > { %v2594_v45 = vpop.eup %2593 }
 0x568   : > { %v2596_v48 = vpop.eup %2595  ;;  %v1230_v51 = vmul.f32 %v2594_v45, %v2592_v44 }
 0x569   : > { %v1229_v53 = vmul.f32 %v2596_v48, %v3248_v60  ;;  %v2598_v4 = vpop.eup %2597  ;;  %v1241_v60 = vld [vmem:[%s1240_s22] sm:$0xff] }
 0x56b   : > { %v3294_v55 = vadd.f32 %v1230_v51, %v1229_v53 }
 0x56d   : > { %2599 = vtanh.f32 %v3294_v55 }
 0x577   : > { %v2600_v6 = vpop.eup %2599 }
 0x578   : > { %v1233_v11 = vmul.f32 %v2600_v6, %v2598_v4 }
 0x57a   : > { %1236 = vst [vmem:[%s1235_s16] sm:$0xff] %v1233_v11  ;;  %1310 = vmatmul.mubr.f32.vlgmr.msra.gmra.mrb[10].mxu0 %v1233_v11  ;;  %1381 = vmatmul.mubr.f32.vlgmr.msra.gmra.mrb[10].mxu1 %v1233_v11 }
 0x57b   : > { %2359 = vmatpush1.bf16.msra.mxu0 %v2907_v40  ;;  %2391 = vmatpush1.bf16.msra.mxu1 %v2932_v57 }
 0x57c   : > { %2361 = vmatprep.subr.bf16.mxu0 %v2909_v41  ;;  %2393 = vmatprep.subr.bf16.mxu1 %v2947_v1 }
 0x57d   : > { %1490 = vmatprep.mubr.f32.mxu0 %v2716_v32  ;;  %1561 = vmatprep.mubr.f32.mxu1 %v2716_v32 }
 0x57f   : > { %2363 = vmatpush1.bf16.msra.mxu0 %v2917_v46  ;;  %2395 = vmatpush1.bf16.msra.mxu1 %v2952_v5 }
 0x580   : > { %2365 = vmatprep.subr.bf16.mxu0 %v2922_v49  ;;  %2397 = vmatprep.subr.bf16.mxu1 %v2964_v13 }
 0x583   : > { %2367 = vmatpush1.bf16.msra.mxu0 %v2935_v58  ;;  %2399 = vmatpush1.bf16.msra.mxu1 %v2971_v16 }
 0x584   : > { %2369 = vmatprep.subr.bf16.mxu0 %v2942_v62  ;;  %2401 = vmatprep.subr.bf16.mxu1 %v2977_v20 }
 0x587   : > { %2371 = vmatpush1.bf16.msra.mxu0 %v2960_v10  ;;  %2403 = vmatpush1.bf16.msra.mxu1 %v2993_v30 }
 0x588   : > { %2373 = vmatprep.subr.bf16.mxu0 %v2967_v14  ;;  %2405 = vmatprep.subr.bf16.mxu1 %v2997_v33 }
 0x58b   : > { %2375 = vmatpush1.bf16.msra.mxu0 %v2982_v23  ;;  %2407 = vmatpush1.bf16.msra.mxu1 %v3013_v47 }
 0x58c   : > { %2377 = vmatprep.subr.bf16.mxu0 %v2987_v26  ;;  %2409 = vmatprep.subr.bf16.mxu1 %v3017_v50 }
 0x58f   : > { %2379 = vmatpush1.bf16.msra.mxu0 %v3004_v39  ;;  %2411 = vmatpush1.bf16.msra.mxu1 %v3032_v63 }
 0x590   : > { %2381 = vmatprep.subr.bf16.mxu0 %v3007_v42  ;;  %2413 = vmatprep.subr.bf16.mxu1 %v3035_v0 }
 0x593   : > { %2383 = vmatpush1.bf16.msra.mxu0 %v3024_v56  ;;  %2415 = vmatpush1.bf16.msra.mxu1 %v3046_v8 }
 0x594   : > { %2385 = vmatprep.subr.bf16.mxu0 %v3027_v59  ;;  %2417 = vmatprep.subr.bf16.mxu1 %v3049_v9 }
 0x597   : > { %2387 = vmatpush1.bf16.msra.mxu0 %v3042_v7  ;;  %2419 = vmatpush1.bf16.msra.mxu1 %v3055_v15 }
 0x598   : > { %2421 = vmatprep.subr.bf16.mxu0 %v2902_v36  ;;  %2453 = vmatprep.subr.bf16.mxu1 %v2928_v54  ;;  %v1244_v36 = vld [vmem:[%s1240_s22 + $0x18] sm:$0xff] }
 0x64d   : > { %v1311_v2 = vpop.f32.mrb[10].mxu0  ;;  %v1382_v3 = vpop.f32.mrb[10].mxu1 }
 0x64e   : > { %v1387_v12 = vadd.f32 %v1311_v2, %v1241_v60  ;;  %v1313_v17 = vpop.f32.mrb[11].mxu0  ;;  %v1384_v18 = vpop.f32.mrb[11].mxu1  ;;  %v1389_v27 = vadd.f32 %v1382_v3, %v1243_v24 }
 0x64f   : > { %v1388_v19 = vadd.f32 %v1313_v17, %v1242_v61  ;;  %v1390_v54 = vadd.f32 %v1384_v18, %v1244_v36  ;;  %v1606_v18 = vld [vmem:[%s1602_s8 + $0x18] sm:$0xff] }
 0x650   : > { %v1943_v21 = vmul.f32 -1.442695, %v1387_v12 }
 0x651   : > { %v1944_v22 = vmul.f32 -1.442695, %v1388_v19  ;;  %v1945_v25 = vmul.f32 -1.442695, %v1390_v54 }
 0x652   : > { %2601 = vpow2.f32 %v1943_v21  ;;  %v1605_v21 = vld [vmem:[%s1602_s8 + $0x10] sm:$0xff] }
 0x653   : > { %2603 = vpow2.f32 %v1944_v22 }
 0x654   : > { %2605 = vpow2.f32 %v1945_v25 }
 0x655   : > { %2607 = vtanh.f32 %v1389_v27 }
 0x65c   : > { %v2602_v28 = vpop.eup %2601 }
 0x65d   : > { %v2604_v29 = vpop.eup %2603  ;;  %v1394_v31 = vadd.f32 1.0, %v2602_v28 }
 0x65e   : > { %v1400_v34 = vadd.f32 1.0, %v2604_v29  ;;  %v2606_v35 = vpop.eup %2605 }
 0x65f   : > { %2609 = vrcp.f32 %v1394_v31  ;;  %v2608_v37 = vpop.eup %2607  ;;  %v1407_v45 = vadd.f32 1.0, %v2606_v35 }
 0x660   : > { %2611 = vrcp.f32 %v1400_v34 }
 0x661   : > { %2613 = vrcp.f32 %v1407_v45 }
 0x669   : > { %v2610_v38 = vpop.eup %2609 }
 0x66a   : > { %v2612_v43 = vpop.eup %2611  ;;  %v1411_v44 = vmul.f32 %v2610_v38, %v2608_v37 }
 0x66b   : > { %v1410_v48 = vmul.f32 %v2612_v43, %v3294_v55  ;;  %v2614_v52 = vpop.eup %2613  ;;  %v1604_v55 = vld [vmem:[%s1602_s8 + $0x8] sm:$0xff] }
 0x66d   : > { %v3340_v51 = vadd.f32 %v1411_v44, %v1410_v48 }
 0x66f   : > { %2615 = vtanh.f32 %v3340_v51 }
 0x679   : > { %v2616_v53 = vpop.eup %2615 }
 0x67a   : > { %v1414_v4 = vmul.f32 %v2616_v53, %v2614_v52 }
 0x67c   : > { %1417 = vst [vmem:[%s1416_s24] sm:$0xff] %v1414_v4  ;;  %1491 = vmatmul.mubr.f32.vlgmr.msra.gmra.mrb[12].mxu0 %v1414_v4  ;;  %1562 = vmatmul.mubr.f32.vlgmr.msra.gmra.mrb[12].mxu1 %v1414_v4 }
 0x67d   : > { %2423 = vmatpush1.bf16.msra.mxu0 %v2907_v40  ;;  %2455 = vmatpush1.bf16.msra.mxu1 %v2932_v57  ;;  %v1423_v40 = vld [vmem:[%s1421_s27 + $0x8] sm:$0xff] }
 0x67e   : > { %2425 = vmatprep.subr.bf16.mxu0 %v2909_v41  ;;  %2457 = vmatprep.subr.bf16.mxu1 %v2947_v1 }
 0x67f   : > { %1671 = vmatprep.mubr.f32.mxu0 %v2716_v32  ;;  %1742 = vmatprep.mubr.f32.mxu1 %v2716_v32  ;;  %v1422_v32 = vld [vmem:[%s1421_s27] sm:$0xff] }
 0x681   : > { %2427 = vmatpush1.bf16.msra.mxu0 %v2917_v46  ;;  %2459 = vmatpush1.bf16.msra.mxu1 %v2952_v5 }
 0x682   : > { %2429 = vmatprep.subr.bf16.mxu0 %v2922_v49  ;;  %2461 = vmatprep.subr.bf16.mxu1 %v2964_v13 }
 0x685   : > { %2431 = vmatpush1.bf16.msra.mxu0 %v2935_v58  ;;  %2463 = vmatpush1.bf16.msra.mxu1 %v2971_v16 }
 0x686   : > { %2433 = vmatprep.subr.bf16.mxu0 %v2942_v62  ;;  %2465 = vmatprep.subr.bf16.mxu1 %v2977_v20 }
 0x689   : > { %2435 = vmatpush1.bf16.msra.mxu0 %v2960_v10  ;;  %2467 = vmatpush1.bf16.msra.mxu1 %v2993_v30  ;;  %v1425_v10 = vld [vmem:[%s1421_s27 + $0x18] sm:$0xff] }
 0x68a   : > { %2437 = vmatprep.subr.bf16.mxu0 %v2967_v14  ;;  %2469 = vmatprep.subr.bf16.mxu1 %v2997_v33  ;;  %v1424_v14 = vld [vmem:[%s1421_s27 + $0x10] sm:$0xff] }
 0x68d   : > { %2439 = vmatpush1.bf16.msra.mxu0 %v2982_v23  ;;  %2471 = vmatpush1.bf16.msra.mxu1 %v3013_v47 }
 0x68e   : > { %2441 = vmatprep.subr.bf16.mxu0 %v2987_v26  ;;  %2473 = vmatprep.subr.bf16.mxu1 %v3017_v50 }
 0x691   : > { %2443 = vmatpush1.bf16.msra.mxu0 %v3004_v39  ;;  %2475 = vmatpush1.bf16.msra.mxu1 %v3032_v63 }
 0x692   : > { %2445 = vmatprep.subr.bf16.mxu0 %v3007_v42  ;;  %2477 = vmatprep.subr.bf16.mxu1 %v3035_v0 }
 0x695   : > { %2447 = vmatpush1.bf16.msra.mxu0 %v3024_v56  ;;  %2479 = vmatpush1.bf16.msra.mxu1 %v3046_v8 }
 0x696   : > { %2449 = vmatprep.subr.bf16.mxu0 %v3027_v59  ;;  %2481 = vmatprep.subr.bf16.mxu1 %v3049_v9 }
 0x699   : > { %2451 = vmatpush1.bf16.msra.mxu0 %v3042_v7  ;;  %2483 = vmatpush1.bf16.msra.mxu1 %v3055_v15  ;;  %v1603_v15 = vld [vmem:[%s1602_s8] sm:$0xff] }
 0x74f   : > { %v1492_v41 = vpop.f32.mrb[12].mxu0  ;;  %v1563_v46 = vpop.f32.mrb[12].mxu1 }
 0x750   : > { %v1568_v49 = vadd.f32 %v1492_v41, %v1422_v32  ;;  %v1494_v57 = vpop.f32.mrb[13].mxu0  ;;  %v1565_v58 = vpop.f32.mrb[13].mxu1  ;;  %v1570_v20 = vadd.f32 %v1563_v46, %v1424_v14 }
 0x751   : > { %v1569_v62 = vadd.f32 %v1494_v57, %v1423_v40  ;;  %v1571_v13 = vadd.f32 %v1565_v58, %v1425_v10 }
 0x752   : > { %v1949_v1 = vmul.f32 -1.442695, %v1568_v49 }
 0x753   : > { %v1950_v5 = vmul.f32 -1.442695, %v1569_v62  ;;  %v1951_v16 = vmul.f32 -1.442695, %v1571_v13 }
 0x754   : > { %2617 = vpow2.f32 %v1949_v1 }
 0x755   : > { %2619 = vpow2.f32 %v1950_v5 }
 0x756   : > { %2621 = vpow2.f32 %v1951_v16 }
 0x757   : > { %2623 = vtanh.f32 %v1570_v20 }
 0x75e   : > { %v2618_v23 = vpop.eup %2617 }
 0x75f   : > { %v2620_v26 = vpop.eup %2619  ;;  %v1575_v30 = vadd.f32 1.0, %v2618_v23 }
 0x760   : > { %v1581_v33 = vadd.f32 1.0, %v2620_v26  ;;  %v2622_v39 = vpop.eup %2621 }
 0x761   : > { %2625 = vrcp.f32 %v1575_v30  ;;  %v2624_v42 = vpop.eup %2623  ;;  %v1588_v59 = vadd.f32 1.0, %v2622_v39 }
 0x762   : > { %2627 = vrcp.f32 %v1581_v33 }
 0x763   : > { %2629 = vrcp.f32 %v1588_v59 }
 0x76b   : > { %v2626_v47 = vpop.eup %2625 }
 0x76c   : > { %v2628_v50 = vpop.eup %2627  ;;  %v1592_v56 = vmul.f32 %v2626_v47, %v2624_v42 }
 0x76d   : > { %v1591_v63 = vmul.f32 %v2628_v50, %v3340_v51  ;;  %v2630_v7 = vpop.eup %2629 }
 0x76f   : > { %v1593_v0 = vadd.f32 %v1592_v56, %v1591_v63 }
 0x771   : > { %2631 = vtanh.f32 %v1593_v0 }
 0x77b   : > { %v2632_v8 = vpop.eup %2631 }
 0x77c   : > { %v1595_v9 = vmul.f32 %v2632_v8, %v2630_v7 }
 0x77e   : > { %1598 = vst [vmem:[%s1597_s29] sm:$0xff] %v1595_v9  ;;  %1672 = vmatmul.mubr.f32.vlgmr.msra.gmra.mrb[14].mxu0 %v1595_v9  ;;  %1743 = vmatmul.mubr.f32.vlgmr.msra.gmra.mrb[14].mxu1 %v1595_v9 }
 0x851   : > { %v1673_v6 = vpop.f32.mrb[14].mxu0  ;;  %v1744_v11 = vpop.f32.mrb[14].mxu1 }
 0x852   : > { %v1749_v60 = vadd.f32 %v1673_v6, %v1603_v15  ;;  %v1675_v61 = vpop.f32.mrb[15].mxu0  ;;  %v1746_v2 = vpop.f32.mrb[15].mxu1  ;;  %v1751_v36 = vadd.f32 %v1744_v11, %v1605_v21 }
 0x853   : > { %v1750_v3 = vadd.f32 %v1675_v61, %v1604_v55  ;;  %v1752_v19 = vadd.f32 %v1746_v2, %v1606_v18 }
 0x854   : > { %v1955_v12 = vmul.f32 -1.442695, %v1749_v60 }
 0x855   : > { %v1956_v17 = vmul.f32 -1.442695, %v1750_v3  ;;  %v1957_v22 = vmul.f32 -1.442695, %v1752_v19 }
 0x856   : > { %2633 = vpow2.f32 %v1955_v12 }
 0x857   : > { %2635 = vpow2.f32 %v1956_v17 }
 0x858   : > { %2637 = vpow2.f32 %v1957_v22 }
 0x859   : > { %2639 = vtanh.f32 %v1751_v36 }
 0x860   : > { %v2634_v54 = vpop.eup %2633 }
 0x861   : > { %v2636_v24 = vpop.eup %2635  ;;  %v1756_v25 = vadd.f32 1.0, %v2634_v54 }
 0x862   : > { %v1762_v27 = vadd.f32 1.0, %v2636_v24  ;;  %v2638_v28 = vpop.eup %2637 }
 0x863   : > { %2641 = vrcp.f32 %v1756_v25  ;;  %v2640_v29 = vpop.eup %2639  ;;  %v1769_v37 = vadd.f32 1.0, %v2638_v28 }
 0x864   : > { %2643 = vrcp.f32 %v1762_v27 }
 0x865   : > { %2645 = vrcp.f32 %v1769_v37 }
 0x86d   : > { %v2642_v31 = vpop.eup %2641 }
 0x86e   : > { %v2644_v34 = vpop.eup %2643  ;;  %v1773_v35 = vmul.f32 %v2642_v31, %v2640_v29 }
 0x86f   : > { %v1772_v38 = vmul.f32 %v2644_v34, %v1593_v0  ;;  %v2646_v44 = vpop.eup %2645 }
 0x871   : > { %v1774_v43 = vadd.f32 %v1773_v35, %v1772_v38 }
 0x873   : > { %2647 = vtanh.f32 %v1774_v43 }
 0x87d   : > { %v2648_v45 = vpop.eup %2647 }
 0x87e   : > { %v1776_v48 = vmul.f32 %v2648_v45, %v2646_v44 }
 0x880   : > { %1779 = vst [vmem:[%s1778_s3] sm:$0xff] %v1776_v48 }
 0x881 PF: > { %p12_p11 = scmp.ge.s32.totalorder %s2754_s14, 4   ;;  %s3421_s9 = smov %s2703_s10 }
 0x882   : > { %s3422_s10 = smov %s2707_s11  ;;  %s3423_s11 = smov %s2764_s17 }
 0x883   : > { %s3424_s12 = smov %s2754_s14  ;;  %14 = sbr.rel (!%p12_p11) target bundleno = 3 (0x3), region = 115 }
 0x88a   :  { %1801 = vsyncpa [#allocation4], 1 }
 0x88b   :  { %1803 = vsyncpa [#allocation4 + $0x1], 1 }

// kernel: forward.6
= control target key start
LH: loop header
LB: loop body
LE: loop exit
PB: predicated region body
PF: predicated region fallthrough
CT: control target
= control target key end

     0   :  { %v1691_v3 = vmov 0.0   ;;  %s2981_s3 = inlined_call_operand.vmem [shape: f32[128,1024], index: 3, kind: input, shape index: {}]   ;;  %s2982_s1 = inlined_call_operand.vmem [shape: f32[64,128], index: 1, kind: input, shape index: {}]   ;;  %s2983_s2 = inlined_call_operand.vmem [shape: f32[128,1024], index: 2, kind: input, shape index: {}]   ;;  %s2984_s0 = inlined_call_operand.vmem [shape: f32[64,128], index: 0, kind: input, shape index: {}]   ;;  %s2985_s4 = inlined_call_operand.vmem [shape: f32[1,1024], index: 4, kind: input, shape index: {}]   ;;  %s2986_s5 = inlined_call_operand.vmem [shape: f32[64,1024], index: 5, kind: output, shape index: {}]  }
   0x1   :  { %v165_v0 = vld [vmem:[%s2981_s3 + $0x8] sm:$0xff]  ;;  %v167_v2 = vld [vmem:[%s2981_s3 + $0x18] sm:$0xff]  ;;  %356 = vmatprep.mubr.f32.mxu0 %v1691_v3  ;;  %469 = vmatprep.mubr.f32.mxu1 %v1691_v3  ;;  %v164_v6 = vld [vmem:[%s2981_s3] sm:$0xff] }
   0x2   :  { %v173_v1 = vld [vmem:[%s2981_s3 + $0x48] sm:$0xff]  ;;  %v175_v5 = vld [vmem:[%s2981_s3 + $0x58] sm:$0xff]  ;;  %v172_v7 = vld [vmem:[%s2981_s3 + $0x40] sm:$0xff] }
   0x3   :  { %v1370_v4 = vpack.c.bf16 %v173_v1, %v165_v0  ;;  %v1402_v8 = vpack.c.bf16 %v175_v5, %v167_v2  ;;  %v1372_v9 = vpack.c.bf16 %v172_v7, %v164_v6  ;;  %v166_v10 = vld [vmem:[%s2981_s3 + $0x10] sm:$0xff]  ;;  %v181_v12 = vld [vmem:[%s2981_s3 + $0x88] sm:$0xff]  ;;  %v183_v15 = vld [vmem:[%s2981_s3 + $0x98] sm:$0xff] }
   0x4   :  { %v174_v11 = vld [vmem:[%s2981_s3 + $0x50] sm:$0xff]  ;;  %v189_v14 = vld [vmem:[%s2981_s3 + $0xc8] sm:$0xff]  ;;  %v191_v16 = vld [vmem:[%s2981_s3 + $0xd8] sm:$0xff] }
   0x5   :  { %1371 = vmatprep.subr.bf16.mxu0 %v1370_v4  ;;  %v1404_v13 = vpack.c.bf16 %v174_v11, %v166_v10  ;;  %1403 = vmatprep.subr.bf16.mxu1 %v1402_v8  ;;  %v1374_v17 = vpack.c.bf16 %v189_v14, %v181_v12  ;;  %v1406_v18 = vpack.c.bf16 %v191_v16, %v183_v15  ;;  %v180_v19 = vld [vmem:[%s2981_s3 + $0x80] sm:$0xff]  ;;  %v182_v21 = vld [vmem:[%s2981_s3 + $0x90] sm:$0xff]  ;;  %v197_v24 = vld [vmem:[%s2981_s3 + $0x108] sm:$0xff] }
   0x6   :  { %1373 = vmatpush1.bf16.msra.mxu0 %v1372_v9  ;;  %v188_v20 = vld [vmem:[%s2981_s3 + $0xc0] sm:$0xff]  ;;  %v190_v23 = vld [vmem:[%s2981_s3 + $0xd0] sm:$0xff]  ;;  %v205_v25 = vld [vmem:[%s2981_s3 + $0x148] sm:$0xff] }
   0x7   :  { %1405 = vmatpush1.bf16.msra.mxu1 %v1404_v13  ;;  %v1376_v22 = vpack.c.bf16 %v188_v20, %v180_v19  ;;  %1375 = vmatprep.subr.bf16.mxu0 %v1374_v17  ;;  %v1408_v26 = vpack.c.bf16 %v190_v23, %v182_v21  ;;  %v1378_v27 = vpack.c.bf16 %v205_v25, %v197_v24  ;;  %v199_v28 = vld [vmem:[%s2981_s3 + $0x118] sm:$0xff]  ;;  %v196_v30 = vld [vmem:[%s2981_s3 + $0x100] sm:$0xff]  ;;  %v198_v33 = vld [vmem:[%s2981_s3 + $0x110] sm:$0xff] }
   0x8   :  { %1407 = vmatprep.subr.bf16.mxu1 %v1406_v18  ;;  %v207_v29 = vld [vmem:[%s2981_s3 + $0x158] sm:$0xff]  ;;  %v204_v32 = vld [vmem:[%s2981_s3 + $0x140] sm:$0xff]  ;;  %v206_v34 = vld [vmem:[%s2981_s3 + $0x150] sm:$0xff] }
   0x9   :  { %v1410_v31 = vpack.c.bf16 %v207_v29, %v199_v28  ;;  %v1380_v35 = vpack.c.bf16 %v204_v32, %v196_v30  ;;  %v213_v36 = vld [vmem:[%s2981_s3 + $0x188] sm:$0xff]  ;;  %v215_v38 = vld [vmem:[%s2981_s3 + $0x198] sm:$0xff]  ;;  %v1412_v39 = vpack.c.bf16 %v206_v34, %v198_v33  ;;  %v212_v42 = vld [vmem:[%s2981_s3 + $0x180] sm:$0xff] }
   0xa   :  { %1377 = vmatpush1.bf16.msra.mxu0 %v1376_v22  ;;  %v221_v37 = vld [vmem:[%s2981_s3 + $0x1c8] sm:$0xff]  ;;  %v223_v41 = vld [vmem:[%s2981_s3 + $0x1d8] sm:$0xff]  ;;  %v220_v43 = vld [vmem:[%s2981_s3 + $0x1c0] sm:$0xff] }
   0xb   :  { %1409 = vmatpush1.bf16.msra.mxu1 %v1408_v26  ;;  %1379 = vmatprep.subr.bf16.mxu0 %v1378_v27  ;;  %v1382_v40 = vpack.c.bf16 %v221_v37, %v213_v36  ;;  %v1414_v44 = vpack.c.bf16 %v223_v41, %v215_v38  ;;  %v214_v45 = vld [vmem:[%s2981_s3 + $0x190] sm:$0xff]  ;;  %v229_v47 = vld [vmem:[%s2981_s3 + $0x208] sm:$0xff]  ;;  %v231_v49 = vld [vmem:[%s2981_s3 + $0x218] sm:$0xff]  ;;  %v1384_v51 = vpack.c.bf16 %v220_v43, %v212_v42 }
   0xc   :  { %1411 = vmatprep.subr.bf16.mxu1 %v1410_v31  ;;  %v222_v46 = vld [vmem:[%s2981_s3 + $0x1d0] sm:$0xff]  ;;  %v237_v48 = vld [vmem:[%s2981_s3 + $0x248] sm:$0xff]  ;;  %v239_v50 = vld [vmem:[%s2981_s3 + $0x258] sm:$0xff] }
   0xd   :  { %v1416_v52 = vpack.c.bf16 %v222_v46, %v214_v45  ;;  %v1386_v53 = vpack.c.bf16 %v237_v48, %v229_v47  ;;  %v228_v54 = vld [vmem:[%s2981_s3 + $0x200] sm:$0xff]  ;;  %v230_v56 = vld [vmem:[%s2981_s3 + $0x210] sm:$0xff]  ;;  %v1418_v57 = vpack.c.bf16 %v239_v50, %v231_v49  ;;  %v245_v59 = vld [vmem:[%s2981_s3 + $0x288] sm:$0xff] }
   0xe   :  { %1381 = vmatpush1.bf16.msra.mxu0 %v1380_v35  ;;  %v236_v55 = vld [vmem:[%s2981_s3 + $0x240] sm:$0xff]  ;;  %v238_v58 = vld [vmem:[%s2981_s3 + $0x250] sm:$0xff]  ;;  %v253_v60 = vld [vmem:[%s2981_s3 + $0x2c8] sm:$0xff] }
   0xf   :  { %1413 = vmatpush1.bf16.msra.mxu1 %v1412_v39  ;;  %1383 = vmatprep.subr.bf16.mxu0 %v1382_v40  ;;  %v247_v61 = vld [vmem:[%s2981_s3 + $0x298] sm:$0xff]  ;;  %v1388_v63 = vpack.c.bf16 %v236_v55, %v228_v54  ;;  %v1420_v0 = vpack.c.bf16 %v238_v58, %v230_v56  ;;  %v1390_v1 = vpack.c.bf16 %v253_v60, %v245_v59  ;;  %v244_v2 = vld [vmem:[%s2981_s3 + $0x280] sm:$0xff]  ;;  %v246_v5 = vld [vmem:[%s2981_s3 + $0x290] sm:$0xff] }
  0x10   :  { %1415 = vmatprep.subr.bf16.mxu1 %v1414_v44  ;;  %v255_v62 = vld [vmem:[%s2981_s3 + $0x2d8] sm:$0xff]  ;;  %v252_v4 = vld [vmem:[%s2981_s3 + $0x2c0] sm:$0xff]  ;;  %v254_v7 = vld [vmem:[%s2981_s3 + $0x2d0] sm:$0xff] }
  0x11   :  { %v1422_v6 = vpack.c.bf16 %v255_v62, %v247_v61  ;;  %v261_v8 = vld [vmem:[%s2981_s3 + $0x308] sm:$0xff]  ;;  %v263_v10 = vld [vmem:[%s2981_s3 + $0x318] sm:$0xff]  ;;  %v1392_v12 = vpack.c.bf16 %v252_v4, %v244_v2  ;;  %v1424_v13 = vpack.c.bf16 %v254_v7, %v246_v5  ;;  %v260_v15 = vld [vmem:[%s2981_s3 + $0x300] sm:$0xff] }
  0x12   :  { %1385 = vmatpush1.bf16.msra.mxu0 %v1384_v51  ;;  %v269_v9 = vld [vmem:[%s2981_s3 + $0x348] sm:$0xff]  ;;  %v271_v11 = vld [vmem:[%s2981_s3 + $0x358] sm:$0xff]  ;;  %v268_v16 = vld [vmem:[%s2981_s3 + $0x340] sm:$0xff] }
  0x13   :  { %1417 = vmatpush1.bf16.msra.mxu1 %v1416_v52  ;;  %1387 = vmatprep.subr.bf16.mxu0 %v1386_v53  ;;  %v1394_v14 = vpack.c.bf16 %v269_v9, %v261_v8  ;;  %v262_v17 = vld [vmem:[%s2981_s3 + $0x310] sm:$0xff]  ;;  %v1426_v18 = vpack.c.bf16 %v271_v11, %v263_v10  ;;  %v277_v20 = vld [vmem:[%s2981_s3 + $0x388] sm:$0xff]  ;;  %v279_v22 = vld [vmem:[%s2981_s3 + $0x398] sm:$0xff]  ;;  %v1396_v24 = vpack.c.bf16 %v268_v16, %v260_v15 }
  0x14   :  { %1419 = vmatprep.subr.bf16.mxu1 %v1418_v57  ;;  %v270_v19 = vld [vmem:[%s2981_s3 + $0x350] sm:$0xff]  ;;  %v285_v21 = vld [vmem:[%s2981_s3 + $0x3c8] sm:$0xff]  ;;  %v287_v23 = vld [vmem:[%s2981_s3 + $0x3d8] sm:$0xff] }
  0x15   :  { %v1428_v25 = vpack.c.bf16 %v270_v19, %v262_v17  ;;  %v1398_v26 = vpack.c.bf16 %v285_v21, %v277_v20  ;;  %v276_v27 = vld [vmem:[%s2981_s3 + $0x380] sm:$0xff]  ;;  %v278_v29 = vld [vmem:[%s2981_s3 + $0x390] sm:$0xff]  ;;  %v1430_v30 = vpack.c.bf16 %v287_v23, %v279_v22  ;;  %v169_v32 = vld [vmem:[%s2981_s3 + $0x28] sm:$0xff] }
  0x16   :  { %1389 = vmatpush1.bf16.msra.mxu0 %v1388_v63  ;;  %v284_v28 = vld [vmem:[%s2981_s3 + $0x3c0] sm:$0xff]  ;;  %v286_v31 = vld [vmem:[%s2981_s3 + $0x3d0] sm:$0xff]  ;;  %v177_v33 = vld [vmem:[%s2981_s3 + $0x68] sm:$0xff] }
  0x17   :  { %1421 = vmatpush1.bf16.msra.mxu1 %v1420_v0  ;;  %1391 = vmatprep.subr.bf16.mxu0 %v1390_v1  ;;  %v171_v34 = vld [vmem:[%s2981_s3 + $0x38] sm:$0xff]  ;;  %v1400_v36 = vpack.c.bf16 %v284_v28, %v276_v27  ;;  %v1432_v37 = vpack.c.bf16 %v286_v31, %v278_v29  ;;  %v1434_v38 = vpack.c.bf16 %v177_v33, %v169_v32  ;;  %v168_v39 = vld [vmem:[%s2981_s3 + $0x20] sm:$0xff]  ;;  %v170_v42 = vld [vmem:[%s2981_s3 + $0x30] sm:$0xff] }
  0x18   :  { %1423 = vmatprep.subr.bf16.mxu1 %v1422_v6  ;;  %v179_v35 = vld [vmem:[%s2981_s3 + $0x78] sm:$0xff]  ;;  %v176_v40 = vld [vmem:[%s2981_s3 + $0x60] sm:$0xff]  ;;  %v178_v43 = vld [vmem:[%s2981_s3 + $0x70] sm:$0xff] }
  0x19   :  { %v1466_v41 = vpack.c.bf16 %v179_v35, %v171_v34  ;;  %v185_v44 = vld [vmem:[%s2981_s3 + $0xa8] sm:$0xff]  ;;  %v1949_v46 = vld [vmem:[%s2982_s1] sm:$0xff]  ;;  %v1436_v47 = vpack.c.bf16 %v176_v40, %v168_v39  ;;  %v187_v48 = vld [vmem:[%s2981_s3 + $0xb8] sm:$0xff]  ;;  %v1468_v50 = vpack.c.bf16 %v178_v43, %v170_v42 }
  0x1a   :  { %1393 = vmatpush1.bf16.msra.mxu0 %v1392_v12  ;;  %v193_v45 = vld [vmem:[%s2981_s3 + $0xe8] sm:$0xff]  ;;  %v195_v49 = vld [vmem:[%s2981_s3 + $0xf8] sm:$0xff]  ;;  %v184_v51 = vld [vmem:[%s2981_s3 + $0xa0] sm:$0xff] }
  0x1b   :  { %1425 = vmatpush1.bf16.msra.mxu1 %v1424_v13  ;;  %1395 = vmatprep.subr.bf16.mxu0 %v1394_v14  ;;  %v192_v52 = vld [vmem:[%s2981_s3 + $0xe0] sm:$0xff]  ;;  %v1438_v53 = vpack.c.bf16 %v193_v45, %v185_v44  ;;  %v186_v54 = vld [vmem:[%s2981_s3 + $0xb0] sm:$0xff]  ;;  %v1470_v56 = vpack.c.bf16 %v195_v49, %v187_v48  ;;  %v201_v57 = vld [vmem:[%s2981_s3 + $0x128] sm:$0xff] }
  0x1c   :  { %1427 = vmatprep.subr.bf16.mxu1 %v1426_v18  ;;  %v194_v55 = vld [vmem:[%s2981_s3 + $0xf0] sm:$0xff]  ;;  %v209_v58 = vld [vmem:[%s2981_s3 + $0x168] sm:$0xff]  ;;  %v1440_v60 = vpack.c.bf16 %v192_v52, %v184_v51  ;;  %v203_v61 = vld [vmem:[%s2981_s3 + $0x138] sm:$0xff] }
  0x1d   :  { %v1980_v59 = vld [vmem:[%s2982_s1 + $0x8] sm:$0xff]  ;;  %v211_v62 = vld [vmem:[%s2981_s3 + $0x178] sm:$0xff]  ;;  %v1472_v63 = vpack.c.bf16 %v194_v55, %v186_v54  ;;  %v200_v0 = vld [vmem:[%s2981_s3 + $0x120] sm:$0xff]  ;;  %v1442_v2 = vpack.c.bf16 %v209_v58, %v201_v57 }
  0x1e   :  { %1397 = vmatpush1.bf16.msra.mxu0 %v1396_v24  ;;  %v208_v1 = vld [vmem:[%s2981_s3 + $0x160] sm:$0xff]  ;;  %v202_v4 = vld [vmem:[%s2981_s3 + $0x130] sm:$0xff]  ;;  %v1474_v6 = vpack.c.bf16 %v211_v62, %v203_v61  ;;  %v217_v7 = vld [vmem:[%s2981_s3 + $0x1a8] sm:$0xff] }
  0x1f   :  { %1429 = vmatpush1.bf16.msra.mxu1 %v1428_v25  ;;  %1399 = vmatprep.subr.bf16.mxu0 %v1398_v26  ;;  %v210_v5 = vld [vmem:[%s2981_s3 + $0x170] sm:$0xff]  ;;  %v225_v8 = vld [vmem:[%s2981_s3 + $0x1e8] sm:$0xff]  ;;  %v1444_v10 = vpack.c.bf16 %v208_v1, %v200_v0  ;;  %v219_v11 = vld [vmem:[%s2981_s3 + $0x1b8] sm:$0xff] }
  0x20   :  { %1431 = vmatprep.subr.bf16.mxu1 %v1430_v30  ;;  %v2013_v9 = vld [vmem:[%s2982_s1 + $0x10] sm:$0xff]  ;;  %v227_v12 = vld [vmem:[%s2981_s3 + $0x1f8] sm:$0xff]  ;;  %v1476_v13 = vpack.c.bf16 %v210_v5, %v202_v4  ;;  %v216_v14 = vld [vmem:[%s2981_s3 + $0x1a0] sm:$0xff]  ;;  %v1446_v16 = vpack.c.bf16 %v225_v8, %v217_v7 }
  0x21   :  { %v224_v15 = vld [vmem:[%s2981_s3 + $0x1e0] sm:$0xff]  ;;  %v218_v17 = vld [vmem:[%s2981_s3 + $0x1b0] sm:$0xff]  ;;  %v1478_v19 = vpack.c.bf16 %v227_v12, %v219_v11  ;;  %v233_v20 = vld [vmem:[%s2981_s3 + $0x228] sm:$0xff] }
  0x22   :  { %1401 = vmatpush1.bf16.msra.mxu0 %v1400_v36  ;;  %v226_v18 = vld [vmem:[%s2981_s3 + $0x1f0] sm:$0xff]  ;;  %v241_v21 = vld [vmem:[%s2981_s3 + $0x268] sm:$0xff]  ;;  %v2046_v22 = vld [vmem:[%s2982_s1 + $0x18] sm:$0xff]  ;;  %v1448_v23 = vpack.c.bf16 %v224_v15, %v216_v14 }
  0x23   :  { %1433 = vmatpush1.bf16.msra.mxu1 %v1432_v37  ;;  %1435 = vmatprep.subr.bf16.mxu0 %v1434_v38  ;;  %v235_v24 = vld [vmem:[%s2981_s3 + $0x238] sm:$0xff]  ;;  %v1480_v26 = vpack.c.bf16 %v226_v18, %v218_v17  ;;  %v232_v27 = vld [vmem:[%s2981_s3 + $0x220] sm:$0xff]  ;;  %v1450_v29 = vpack.c.bf16 %v241_v21, %v233_v20  ;;  %v234_v30 = vld [vmem:[%s2981_s3 + $0x230] sm:$0xff] }
  0x24   :  { %1467 = vmatprep.subr.bf16.mxu1 %v1466_v41  ;;  %v243_v25 = vld [vmem:[%s2981_s3 + $0x278] sm:$0xff]  ;;  %v240_v28 = vld [vmem:[%s2981_s3 + $0x260] sm:$0xff]  ;;  %v242_v31 = vld [vmem:[%s2981_s3 + $0x270] sm:$0xff] }
  0x25   :  { %357 = vmatmul.mubr.f32.vlgmr.msra.gmra.mrb[0].mxu0 %v1949_v46  ;;  %v1482_v32 = vpack.c.bf16 %v243_v25, %v235_v24  ;;  %v249_v33 = vld [vmem:[%s2981_s3 + $0x2a8] sm:$0xff]  ;;  %v2079_v35 = vld [vmem:[%s2982_s1 + $0x20] sm:$0xff]  ;;  %v1452_v36 = vpack.c.bf16 %v240_v28, %v232_v27  ;;  %v251_v37 = vld [vmem:[%s2981_s3 + $0x2b8] sm:$0xff]  ;;  %v1484_v39 = vpack.c.bf16 %v242_v31, %v234_v30 }
  0x26   :  { %470 = vmatmul.mubr.f32.vlgmr.msra.gmra.mrb[0].mxu1 %v1949_v46  ;;  %1437 = vmatpush1.bf16.msra.mxu0 %v1436_v47  ;;  %v257_v34 = vld [vmem:[%s2981_s3 + $0x2e8] sm:$0xff]  ;;  %v259_v38 = vld [vmem:[%s2981_s3 + $0x2f8] sm:$0xff]  ;;  %v248_v40 = vld [vmem:[%s2981_s3 + $0x2a0] sm:$0xff] }
  0x27   :  { %1469 = vmatpush1.bf16.msra.mxu1 %v1468_v50  ;;  %362 = vmatprep.mubr.f32.mxu0 %v1691_v3  ;;  %v256_v41 = vld [vmem:[%s2981_s3 + $0x2e0] sm:$0xff]  ;;  %v1454_v42 = vpack.c.bf16 %v257_v34, %v249_v33  ;;  %v250_v43 = vld [vmem:[%s2981_s3 + $0x2b0] sm:$0xff]  ;;  %v1486_v45 = vpack.c.bf16 %v259_v38, %v251_v37  ;;  %v265_v47 = vld [vmem:[%s2981_s3 + $0x328] sm:$0xff] }
  0x28   :  { %475 = vmatprep.mubr.f32.mxu1 %v1691_v3  ;;  %1439 = vmatprep.subr.bf16.mxu0 %v1438_v53  ;;  %v258_v44 = vld [vmem:[%s2981_s3 + $0x2f0] sm:$0xff]  ;;  %v273_v48 = vld [vmem:[%s2981_s3 + $0x368] sm:$0xff]  ;;  %v1456_v50 = vpack.c.bf16 %v256_v41, %v248_v40  ;;  %v267_v51 = vld [vmem:[%s2981_s3 + $0x338] sm:$0xff] }
  0x29   :  { %363 = vmatmul.mubr.f32.gmra.mrb[2].mxu0 %v1980_v59  ;;  %1471 = vmatprep.subr.bf16.mxu1 %v1470_v56  ;;  %v2112_v49 = vld [vmem:[%s2982_s1 + $0x28] sm:$0xff]  ;;  %v275_v52 = vld [vmem:[%s2981_s3 + $0x378] sm:$0xff]  ;;  %v1488_v53 = vpack.c.bf16 %v258_v44, %v250_v43  ;;  %v264_v54 = vld [vmem:[%s2981_s3 + $0x320] sm:$0xff]  ;;  %v1458_v56 = vpack.c.bf16 %v273_v48, %v265_v47 }
  0x2a   :  { %476 = vmatmul.mubr.f32.gmra.mrb[2].mxu1 %v1980_v59  ;;  %1441 = vmatpush1.bf16.msra.mxu0 %v1440_v60  ;;  %v272_v55 = vld [vmem:[%s2981_s3 + $0x360] sm:$0xff]  ;;  %v266_v57 = vld [vmem:[%s2981_s3 + $0x330] sm:$0xff]  ;;  %v1490_v60 = vpack.c.bf16 %v275_v52, %v267_v51  ;;  %v281_v61 = vld [vmem:[%s2981_s3 + $0x3a8] sm:$0xff] }
  0x2b   :  { %1473 = vmatpush1.bf16.msra.mxu1 %v1472_v63  ;;  %368 = vmatprep.mubr.f32.mxu0 %v1691_v3  ;;  %v274_v58 = vld [vmem:[%s2981_s3 + $0x370] sm:$0xff]  ;;  %v289_v62 = vld [vmem:[%s2981_s3 + $0x3e8] sm:$0xff]  ;;  %v1460_v0 = vpack.c.bf16 %v272_v55, %v264_v54  ;;  %v283_v1 = vld [vmem:[%s2981_s3 + $0x3b8] sm:$0xff] }
  0x2c   :  { %481 = vmatprep.mubr.f32.mxu1 %v1691_v3  ;;  %1443 = vmatprep.subr.bf16.mxu0 %v1442_v2  ;;  %v2145_v63 = vld [vmem:[%s2982_s1 + $0x30] sm:$0xff]  ;;  %v291_v2 = vld [vmem:[%s2981_s3 + $0x3f8] sm:$0xff]  ;;  %v1492_v4 = vpack.c.bf16 %v274_v58, %v266_v57  ;;  %v280_v5 = vld [vmem:[%s2981_s3 + $0x3a0] sm:$0xff]  ;;  %v1462_v7 = vpack.c.bf16 %v289_v62, %v281_v61 }
  0x2d   :  { %369 = vmatmul.mubr.f32.gmra.mrb[4].mxu0 %v2013_v9  ;;  %1475 = vmatprep.subr.bf16.mxu1 %v1474_v6  ;;  %v288_v6 = vld [vmem:[%s2981_s3 + $0x3e0] sm:$0xff]  ;;  %v282_v8 = vld [vmem:[%s2981_s3 + $0x3b0] sm:$0xff]  ;;  %v1494_v11 = vpack.c.bf16 %v291_v2, %v283_v1  ;;  %v29_v12 = vld [vmem:[%s2983_s2 + $0x8] sm:$0xff] }
  0x2e   :  { %482 = vmatmul.mubr.f32.gmra.mrb[4].mxu1 %v2013_v9  ;;  %1445 = vmatpush1.bf16.msra.mxu0 %v1444_v10  ;;  %v290_v10 = vld [vmem:[%s2981_s3 + $0x3f0] sm:$0xff]  ;;  %v2178_v14 = vld [vmem:[%s2982_s1 + $0x38] sm:$0xff]  ;;  %v1464_v15 = vpack.c.bf16 %v288_v6, %v280_v5  ;;  %v36_v20 = vld [vmem:[%s2983_s2 + $0x40] sm:$0xff] }
  0x2f   :  { %1477 = vmatpush1.bf16.msra.mxu1 %v1476_v13  ;;  %374 = vmatprep.mubr.f32.mxu0 %v1691_v3  ;;  %v37_v13 = vld [vmem:[%s2983_s2 + $0x48] sm:$0xff]  ;;  %v39_v17 = vld [vmem:[%s2983_s2 + $0x58] sm:$0xff]  ;;  %v1496_v18 = vpack.c.bf16 %v290_v10, %v282_v8  ;;  %v38_v24 = vld [vmem:[%s2983_s2 + $0x50] sm:$0xff] }
  0x30   :  { %487 = vmatprep.mubr.f32.mxu1 %v1691_v3  ;;  %1447 = vmatprep.subr.bf16.mxu0 %v1446_v16  ;;  %v31_v16 = vld [vmem:[%s2983_s2 + $0x18] sm:$0xff]  ;;  %v1498_v21 = vpack.c.bf16 %v37_v13, %v29_v12  ;;  %v53_v27 = vld [vmem:[%s2983_s2 + $0xc8] sm:$0xff]  ;;  %v52_v33 = vld [vmem:[%s2983_s2 + $0xc0] sm:$0xff] }
  0x31   :  { %375 = vmatmul.mubr.f32.gmra.mrb[6].mxu0 %v2046_v22  ;;  %1479 = vmatprep.subr.bf16.mxu1 %v1478_v19  ;;  %v28_v19 = vld [vmem:[%s2983_s2] sm:$0xff]  ;;  %v1530_v25 = vpack.c.bf16 %v39_v17, %v31_v16  ;;  %v55_v30 = vld [vmem:[%s2983_s2 + $0xd8] sm:$0xff]  ;;  %v54_v37 = vld [vmem:[%s2983_s2 + $0xd0] sm:$0xff] }
  0x32   :  { %488 = vmatmul.mubr.f32.gmra.mrb[6].mxu1 %v2046_v22  ;;  %1449 = vmatpush1.bf16.msra.mxu0 %v1448_v23  ;;  %v30_v23 = vld [vmem:[%s2983_s2 + $0x10] sm:$0xff]  ;;  %v1500_v28 = vpack.c.bf16 %v36_v20, %v28_v19  ;;  %v69_v40 = vld [vmem:[%s2983_s2 + $0x148] sm:$0xff]  ;;  %v71_v43 = vld [vmem:[%s2983_s2 + $0x158] sm:$0xff] }
  0x33   :  { %1481 = vmatpush1.bf16.msra.mxu1 %v1480_v26  ;;  %380 = vmatprep.mubr.f32.mxu0 %v1691_v3  ;;  %v45_v26 = vld [vmem:[%s2983_s2 + $0x88] sm:$0xff]  ;;  %v1532_v31 = vpack.c.bf16 %v38_v24, %v30_v23  ;;  %v62_v48 = vld [vmem:[%s2983_s2 + $0x110] sm:$0xff]  ;;  %v79_v55 = vld [vmem:[%s2983_s2 + $0x198] sm:$0xff] }
  0x34   :  { %493 = vmatprep.mubr.f32.mxu1 %v1691_v3  ;;  %1451 = vmatprep.subr.bf16.mxu0 %v1450_v29  ;;  %v47_v29 = vld [vmem:[%s2983_s2 + $0x98] sm:$0xff]  ;;  %v1502_v34 = vpack.c.bf16 %v53_v27, %v45_v26  ;;  %v77_v52 = vld [vmem:[%s2983_s2 + $0x188] sm:$0xff]  ;;  %v76_v58 = vld [vmem:[%s2983_s2 + $0x180] sm:$0xff] }
  0x35   :  { %381 = vmatmul.mubr.f32.gmra.mrb[8].mxu0 %v2079_v35  ;;  %1483 = vmatprep.subr.bf16.mxu1 %v1482_v32  ;;  %v44_v32 = vld [vmem:[%s2983_s2 + $0x80] sm:$0xff]  ;;  %v1534_v38 = vpack.c.bf16 %v55_v30, %v47_v29  ;;  %v78_v61 = vld [vmem:[%s2983_s2 + $0x190] sm:$0xff]  ;;  %v93_v1 = vld [vmem:[%s2983_s2 + $0x208] sm:$0xff] }
  0x36   :  { %494 = vmatmul.mubr.f32.gmra.mrb[8].mxu1 %v2079_v35  ;;  %1453 = vmatpush1.bf16.msra.mxu0 %v1452_v36  ;;  %v46_v36 = vld [vmem:[%s2983_s2 + $0x90] sm:$0xff]  ;;  %v1504_v41 = vpack.c.bf16 %v52_v33, %v44_v32  ;;  %v101_v2 = vld [vmem:[%s2983_s2 + $0x248] sm:$0xff]  ;;  %v95_v5 = vld [vmem:[%s2983_s2 + $0x218] sm:$0xff] }
  0x37   :  { %1485 = vmatpush1.bf16.msra.mxu1 %v1484_v39  ;;  %386 = vmatprep.mubr.f32.mxu0 %v1691_v3  ;;  %v61_v39 = vld [vmem:[%s2983_s2 + $0x108] sm:$0xff]  ;;  %v1536_v44 = vpack.c.bf16 %v54_v37, %v46_v36  ;;  %v86_v62 = vld [vmem:[%s2983_s2 + $0x1d0] sm:$0xff]  ;;  %v103_v6 = vld [vmem:[%s2983_s2 + $0x258] sm:$0xff]  ;;  %v1514_v10 = vpack.c.bf16 %v101_v2, %v93_v1 }
  0x38   :  { %499 = vmatprep.mubr.f32.mxu1 %v1691_v3  ;;  %1455 = vmatprep.subr.bf16.mxu0 %v1454_v42  ;;  %v63_v42 = vld [vmem:[%s2983_s2 + $0x118] sm:$0xff]  ;;  %v1506_v47 = vpack.c.bf16 %v69_v40, %v61_v39  ;;  %v92_v8 = vld [vmem:[%s2983_s2 + $0x200] sm:$0xff]  ;;  %v102_v12 = vld [vmem:[%s2983_s2 + $0x250] sm:$0xff]  ;;  %v1546_v13 = vpack.c.bf16 %v103_v6, %v95_v5 }
  0x39   :  { %387 = vmatmul.mubr.f32.gmra.mrb[10].mxu0 %v2112_v49  ;;  %1487 = vmatprep.subr.bf16.mxu1 %v1486_v45  ;;  %v60_v45 = vld [vmem:[%s2983_s2 + $0x100] sm:$0xff]  ;;  %v1538_v51 = vpack.c.bf16 %v71_v43, %v63_v42  ;;  %v117_v16 = vld [vmem:[%s2983_s2 + $0x2c8] sm:$0xff]  ;;  %v119_v19 = vld [vmem:[%s2983_s2 + $0x2d8] sm:$0xff] }
  0x3a   :  { %500 = vmatmul.mubr.f32.gmra.mrb[10].mxu1 %v2112_v49  ;;  %1457 = vmatpush1.bf16.msra.mxu0 %v1456_v50  ;;  %v70_v50 = vld [vmem:[%s2983_s2 + $0x150] sm:$0xff]  ;;  %v125_v27 = vld [vmem:[%s2983_s2 + $0x308] sm:$0xff]  ;;  %v127_v30 = vld [vmem:[%s2983_s2 + $0x318] sm:$0xff] }
  0x3b   :  { %1489 = vmatpush1.bf16.msra.mxu1 %v1488_v53  ;;  %392 = vmatprep.mubr.f32.mxu0 %v1691_v3  ;;  %v85_v53 = vld [vmem:[%s2983_s2 + $0x1c8] sm:$0xff]  ;;  %v1540_v57 = vpack.c.bf16 %v70_v50, %v62_v48  ;;  %v110_v24 = vld [vmem:[%s2983_s2 + $0x290] sm:$0xff]  ;;  %v124_v33 = vld [vmem:[%s2983_s2 + $0x300] sm:$0xff] }
  0x3c   :  { %505 = vmatprep.mubr.f32.mxu1 %v1691_v3  ;;  %1459 = vmatprep.subr.bf16.mxu0 %v1458_v56  ;;  %v87_v56 = vld [vmem:[%s2983_s2 + $0x1d8] sm:$0xff]  ;;  %v126_v36 = vld [vmem:[%s2983_s2 + $0x310] sm:$0xff]  ;;  %v141_v39 = vld [vmem:[%s2983_s2 + $0x388] sm:$0xff] }
  0x3d   :  { %393 = vmatmul.mubr.f32.gmra.mrb[12].mxu0 %v2145_v63  ;;  %1491 = vmatprep.subr.bf16.mxu1 %v1490_v60  ;;  %v1510_v60 = vpack.c.bf16 %v85_v53, %v77_v52  ;;  %v134_v37 = vld [vmem:[%s2983_s2 + $0x350] sm:$0xff]  ;;  %v149_v40 = vld [vmem:[%s2983_s2 + $0x3c8] sm:$0xff]  ;;  %v143_v42 = vld [vmem:[%s2983_s2 + $0x398] sm:$0xff] }
  0x3e   :  { %506 = vmatmul.mubr.f32.gmra.mrb[12].mxu1 %v2145_v63  ;;  %1461 = vmatpush1.bf16.msra.mxu0 %v1460_v0  ;;  %v1542_v0 = vpack.c.bf16 %v87_v56, %v79_v55  ;;  %v151_v43 = vld [vmem:[%s2983_s2 + $0x3d8] sm:$0xff]  ;;  %v150_v48 = vld [vmem:[%s2983_s2 + $0x3d0] sm:$0xff]  ;;  %v41_v52 = vld [vmem:[%s2983_s2 + $0x68] sm:$0xff] }
  0x3f   :  { %1493 = vmatpush1.bf16.msra.mxu1 %v1492_v4  ;;  %398 = vmatprep.mubr.f32.mxu0 %v1691_v3  ;;  %v1558_v50 = vpack.c.bf16 %v151_v43, %v143_v42  ;;  %v43_v55 = vld [vmem:[%s2983_s2 + $0x78] sm:$0xff]  ;;  %v2435_v1 = vld [vmem:[%s2984_s0] sm:$0xff] }
  0x40   :  { %511 = vmatprep.mubr.f32.mxu1 %v1691_v3  ;;  %1463 = vmatprep.subr.bf16.mxu0 %v1462_v7  ;;  %v1544_v7 = vpack.c.bf16 %v86_v62, %v78_v61  ;;  %v49_v62 = vld [vmem:[%s2983_s2 + $0xa8] sm:$0xff]  ;;  %v59_v5 = vld [vmem:[%s2983_s2 + $0xf8] sm:$0xff] }
  0x41   :  { %399 = vmatmul.mubr.f32.gmra.mrb[14].mxu0 %v2178_v14  ;;  %1495 = vmatprep.subr.bf16.mxu1 %v1494_v11  ;;  %v94_v11 = vld [vmem:[%s2983_s2 + $0x210] sm:$0xff]  ;;  %v99_v43 = vld [vmem:[%s2983_s2 + $0x238] sm:$0xff] }
  0x42   :  { %512 = vmatmul.mubr.f32.gmra.mrb[14].mxu1 %v2178_v14  ;;  %1465 = vmatpush1.bf16.msra.mxu0 %v1464_v15  ;;  %v109_v15 = vld [vmem:[%s2983_s2 + $0x288] sm:$0xff]  ;;  %v1548_v20 = vpack.c.bf16 %v102_v12, %v94_v11 }
  0x43   :  { %1497 = vmatpush1.bf16.msra.mxu1 %v1496_v18  ;;  %582 = vmatprep.mubr.f32.mxu0 %v1691_v3  ;;  %v111_v18 = vld [vmem:[%s2983_s2 + $0x298] sm:$0xff]  ;;  %v1518_v23 = vpack.c.bf16 %v117_v16, %v109_v15  ;;  %v65_v12 = vld [vmem:[%s2983_s2 + $0x128] sm:$0xff] }
  0x44   :  { %695 = vmatprep.mubr.f32.mxu1 %v1691_v3  ;;  %1499 = vmatprep.subr.bf16.mxu0 %v1498_v21  ;;  %v108_v21 = vld [vmem:[%s2983_s2 + $0x280] sm:$0xff]  ;;  %v1550_v26 = vpack.c.bf16 %v119_v19, %v111_v18  ;;  %v2468_v15 = vld [vmem:[%s2984_s0 + $0x8] sm:$0xff]  ;;  %v75_v18 = vld [vmem:[%s2983_s2 + $0x178] sm:$0xff] }
  0x45   :  { %583 = vmatmul.mubr.f32.vlgmr.msra.gmra.mrb[16].mxu0 %v1949_v46  ;;  %1531 = vmatprep.subr.bf16.mxu1 %v1530_v25  ;;  %v118_v25 = vld [vmem:[%s2983_s2 + $0x2d0] sm:$0xff] }
  0x46   :  { %696 = vmatmul.mubr.f32.vlgmr.msra.gmra.mrb[16].mxu1 %v1949_v46  ;;  %1501 = vmatpush1.bf16.msra.mxu0 %v1500_v28  ;;  %v68_v46 = vld [vmem:[%s2983_s2 + $0x140] sm:$0xff]  ;;  %v133_v28 = vld [vmem:[%s2983_s2 + $0x348] sm:$0xff]  ;;  %v1552_v32 = vpack.c.bf16 %v118_v25, %v110_v24  ;;  %v74_v24 = vld [vmem:[%s2983_s2 + $0x170] sm:$0xff] }
  0x47   :  { %1533 = vmatpush1.bf16.msra.mxu1 %v1532_v31  ;;  %588 = vmatprep.mubr.f32.mxu0 %v1691_v3  ;;  %v1508_v54 = vpack.c.bf16 %v68_v46, %v60_v45  ;;  %v135_v31 = vld [vmem:[%s2983_s2 + $0x358] sm:$0xff]  ;;  %v140_v45 = vld [vmem:[%s2983_s2 + $0x380] sm:$0xff]  ;;  %v1526_v46 = vpack.c.bf16 %v149_v40, %v141_v39  ;;  %v97_v39 = vld [vmem:[%s2983_s2 + $0x228] sm:$0xff] }
  0x48   :  { %701 = vmatprep.mubr.f32.mxu1 %v1691_v3  ;;  %1503 = vmatprep.subr.bf16.mxu0 %v1502_v34  ;;  %v1522_v34 = vpack.c.bf16 %v133_v28, %v125_v27  ;;  %v89_v27 = vld [vmem:[%s2983_s2 + $0x1e8] sm:$0xff]  ;;  %v2501_v28 = vld [vmem:[%s2984_s0 + $0x10] sm:$0xff] }
  0x49   :  { %589 = vmatmul.mubr.f32.gmra.mrb[18].mxu0 %v1980_v59  ;;  %1535 = vmatprep.subr.bf16.mxu1 %v1534_v38  ;;  %v1554_v38 = vpack.c.bf16 %v135_v31, %v127_v30  ;;  %v83_v30 = vld [vmem:[%s2983_s2 + $0x1b8] sm:$0xff]  ;;  %v105_v40 = vld [vmem:[%s2983_s2 + $0x268] sm:$0xff] }
  0x4a   :  { %702 = vmatmul.mubr.f32.gmra.mrb[18].mxu1 %v1980_v59  ;;  %1505 = vmatpush1.bf16.msra.mxu0 %v1504_v41  ;;  %v84_v59 = vld [vmem:[%s2983_s2 + $0x1c0] sm:$0xff]  ;;  %v91_v31 = vld [vmem:[%s2983_s2 + $0x1f8] sm:$0xff] }
  0x4b   :  { %1537 = vmatpush1.bf16.msra.mxu1 %v1536_v44  ;;  %594 = vmatprep.mubr.f32.mxu0 %v1691_v3  ;;  %v1512_v4 = vpack.c.bf16 %v84_v59, %v76_v58  ;;  %v1556_v44 = vpack.c.bf16 %v134_v37, %v126_v36  ;;  %v34_v59 = vld [vmem:[%s2983_s2 + $0x30] sm:$0xff] }
  0x4c   :  { %707 = vmatprep.mubr.f32.mxu1 %v1691_v3  ;;  %1507 = vmatprep.subr.bf16.mxu0 %v1506_v47  ;;  %v142_v47 = vld [vmem:[%s2983_s2 + $0x390] sm:$0xff] }
  0x4d   :  { %595 = vmatmul.mubr.f32.gmra.mrb[20].mxu0 %v2013_v9  ;;  %1539 = vmatprep.subr.bf16.mxu1 %v1538_v51  ;;  %v33_v51 = vld [vmem:[%s2983_s2 + $0x28] sm:$0xff]  ;;  %v1560_v56 = vpack.c.bf16 %v150_v48, %v142_v47  ;;  %v82_v36 = vld [vmem:[%s2983_s2 + $0x1b0] sm:$0xff]  ;;  %v1578_v47 = vpack.c.bf16 %v105_v40, %v97_v39 }
  0x4e   :  { %708 = vmatmul.mubr.f32.gmra.mrb[20].mxu1 %v2013_v9  ;;  %1509 = vmatpush1.bf16.msra.mxu0 %v1508_v54  ;;  %v100_v9 = vld [vmem:[%s2983_s2 + $0x240] sm:$0xff]  ;;  %v35_v54 = vld [vmem:[%s2983_s2 + $0x38] sm:$0xff]  ;;  %v1562_v58 = vpack.c.bf16 %v41_v52, %v33_v51  ;;  %v90_v37 = vld [vmem:[%s2983_s2 + $0x1f0] sm:$0xff] }
  0x4f   :  { %1541 = vmatpush1.bf16.msra.mxu1 %v1540_v57  ;;  %600 = vmatprep.mubr.f32.mxu0 %v1691_v3  ;;  %v1516_v17 = vpack.c.bf16 %v100_v9, %v92_v8  ;;  %v32_v57 = vld [vmem:[%s2983_s2 + $0x20] sm:$0xff]  ;;  %v1594_v61 = vpack.c.bf16 %v43_v55, %v35_v54  ;;  %v50_v9 = vld [vmem:[%s2983_s2 + $0xb0] sm:$0xff]  ;;  %v113_v52 = vld [vmem:[%s2983_s2 + $0x2a8] sm:$0xff] }
  0x50   :  { %713 = vmatprep.mubr.f32.mxu1 %v1691_v3  ;;  %1511 = vmatprep.subr.bf16.mxu0 %v1510_v60  ;;  %v42_v60 = vld [vmem:[%s2983_s2 + $0x70] sm:$0xff]  ;;  %v2567_v54 = vld [vmem:[%s2984_s0 + $0x20] sm:$0xff] }
  0x51   :  { %601 = vmatmul.mubr.f32.gmra.mrb[22].mxu0 %v2046_v22  ;;  %1543 = vmatprep.subr.bf16.mxu1 %v1542_v0  ;;  %v57_v0 = vld [vmem:[%s2983_s2 + $0xe8] sm:$0xff]  ;;  %v1596_v6 = vpack.c.bf16 %v42_v60, %v34_v59  ;;  %v98_v48 = vld [vmem:[%s2983_s2 + $0x230] sm:$0xff]  ;;  %v120_v59 = vld [vmem:[%s2983_s2 + $0x2e0] sm:$0xff] }
  0x52   :  { %714 = vmatmul.mubr.f32.gmra.mrb[22].mxu1 %v2046_v22  ;;  %1513 = vmatpush1.bf16.msra.mxu0 %v1512_v4  ;;  %v116_v22 = vld [vmem:[%s2983_s2 + $0x2c0] sm:$0xff]  ;;  %v51_v4 = vld [vmem:[%s2983_s2 + $0xb8] sm:$0xff]  ;;  %v1566_v8 = vpack.c.bf16 %v57_v0, %v49_v62  ;;  %v122_v62 = vld [vmem:[%s2983_s2 + $0x2f0] sm:$0xff] }
  0x53   :  { %1545 = vmatpush1.bf16.msra.mxu1 %v1544_v7  ;;  %606 = vmatprep.mubr.f32.mxu0 %v1691_v3  ;;  %v1520_v29 = vpack.c.bf16 %v116_v22, %v108_v21  ;;  %v56_v7 = vld [vmem:[%s2983_s2 + $0xe0] sm:$0xff]  ;;  %v1598_v11 = vpack.c.bf16 %v59_v5, %v51_v4  ;;  %v137_v4 = vld [vmem:[%s2983_s2 + $0x368] sm:$0xff] }
  0x54   :  { %719 = vmatprep.mubr.f32.mxu1 %v1691_v3  ;;  %1515 = vmatprep.subr.bf16.mxu0 %v1514_v10  ;;  %v58_v10 = vld [vmem:[%s2983_s2 + $0xf0] sm:$0xff]  ;;  %v72_v21 = vld [vmem:[%s2983_s2 + $0x160] sm:$0xff]  ;;  %v2600_v5 = vld [vmem:[%s2984_s0 + $0x28] sm:$0xff] }
  0x55   :  { %607 = vmatmul.mubr.f32.gmra.mrb[24].mxu0 %v2079_v35  ;;  %1547 = vmatprep.subr.bf16.mxu1 %v1546_v13  ;;  %v73_v13 = vld [vmem:[%s2983_s2 + $0x168] sm:$0xff]  ;;  %v1600_v19 = vpack.c.bf16 %v58_v10, %v50_v9  ;;  %v128_v9 = vld [vmem:[%s2983_s2 + $0x320] sm:$0xff] }
  0x56   :  { %720 = vmatmul.mubr.f32.gmra.mrb[24].mxu1 %v2079_v35  ;;  %1517 = vmatpush1.bf16.msra.mxu0 %v1516_v17  ;;  %v132_v35 = vld [vmem:[%s2983_s2 + $0x340] sm:$0xff]  ;;  %v67_v17 = vld [vmem:[%s2983_s2 + $0x138] sm:$0xff]  ;;  %v1570_v22 = vpack.c.bf16 %v73_v13, %v65_v12  ;;  %v130_v12 = vld [vmem:[%s2983_s2 + $0x330] sm:$0xff] }
  0x57   :  { %1549 = vmatpush1.bf16.msra.mxu1 %v1548_v20  ;;  %612 = vmatprep.mubr.f32.mxu0 %v1691_v3  ;;  %v1524_v41 = vpack.c.bf16 %v132_v35, %v124_v33  ;;  %v64_v20 = vld [vmem:[%s2983_s2 + $0x120] sm:$0xff]  ;;  %v1602_v25 = vpack.c.bf16 %v75_v18, %v67_v17  ;;  %v138_v13 = vld [vmem:[%s2983_s2 + $0x370] sm:$0xff]  ;;  %v145_v17 = vld [vmem:[%s2983_s2 + $0x3a8] sm:$0xff] }
  0x58   :  { %725 = vmatprep.mubr.f32.mxu1 %v1691_v3  ;;  %1519 = vmatprep.subr.bf16.mxu0 %v1518_v23  ;;  %v66_v23 = vld [vmem:[%s2983_s2 + $0x130] sm:$0xff]  ;;  %v80_v33 = vld [vmem:[%s2983_s2 + $0x1a0] sm:$0xff]  ;;  %v153_v18 = vld [vmem:[%s2983_s2 + $0x3e8] sm:$0xff] }
  0x59   :  { %613 = vmatmul.mubr.f32.gmra.mrb[26].mxu0 %v2112_v49  ;;  %1551 = vmatprep.subr.bf16.mxu1 %v1550_v26  ;;  %v81_v26 = vld [vmem:[%s2983_s2 + $0x1a8] sm:$0xff]  ;;  %v88_v35 = vld [vmem:[%s2983_s2 + $0x1e0] sm:$0xff] }
  0x5a   :  { %726 = vmatmul.mubr.f32.gmra.mrb[26].mxu1 %v2112_v49  ;;  %1521 = vmatpush1.bf16.msra.mxu0 %v1520_v29  ;;  %v148_v49 = vld [vmem:[%s2983_s2 + $0x3c0] sm:$0xff]  ;;  %v1572_v29 = vpack.c.bf16 %v72_v21, %v64_v20  ;;  %v1576_v42 = vpack.c.bf16 %v88_v35, %v80_v33  ;;  %v147_v21 = vld [vmem:[%s2983_s2 + $0x3b8] sm:$0xff] }
  0x5b   :  { %1553 = vmatpush1.bf16.msra.mxu1 %v1552_v32  ;;  %618 = vmatprep.mubr.f32.mxu0 %v1691_v3  ;;  %v1528_v53 = vpack.c.bf16 %v148_v49, %v140_v45  ;;  %v1604_v32 = vpack.c.bf16 %v74_v24, %v66_v23  ;;  %v1608_v45 = vpack.c.bf16 %v90_v37, %v82_v36  ;;  %v96_v49 = vld [vmem:[%s2983_s2 + $0x220] sm:$0xff] }
  0x5c   :  { %731 = vmatprep.mubr.f32.mxu1 %v1691_v3  ;;  %1523 = vmatprep.subr.bf16.mxu0 %v1522_v34  ;;  %v1574_v34 = vpack.c.bf16 %v89_v27, %v81_v26  ;;  %v136_v10 = vld [vmem:[%s2983_s2 + $0x360] sm:$0xff]  ;;  %v1620_v23 = vpack.c.bf16 %v138_v13, %v130_v12  ;;  %v1590_v26 = vpack.c.bf16 %v153_v18, %v145_v17  ;;  %v146_v27 = vld [vmem:[%s2983_s2 + $0x3b0] sm:$0xff] }
  0x5d   :  { %619 = vmatmul.mubr.f32.gmra.mrb[28].mxu0 %v2145_v63  ;;  %1555 = vmatprep.subr.bf16.mxu1 %v1554_v38  ;;  %v1606_v38 = vpack.c.bf16 %v91_v31, %v83_v30  ;;  %v1588_v20 = vpack.c.bf16 %v136_v10, %v128_v9  ;;  %v144_v24 = vld [vmem:[%s2983_s2 + $0x3a0] sm:$0xff]  ;;  %v27_v31 = vld [vmem:[%s2984_s0 + $0x38] sm:$0xff] }
  0x5e   :  { %732 = vmatmul.mubr.f32.gmra.mrb[28].mxu1 %v2145_v63  ;;  %1525 = vmatpush1.bf16.msra.mxu0 %v1524_v41  ;;  %v40_v63 = vld [vmem:[%s2983_s2 + $0x60] sm:$0xff]  ;;  %v2534_v41 = vld [vmem:[%s2984_s0 + $0x18] sm:$0xff] }
  0x5f   :  { %1557 = vmatpush1.bf16.msra.mxu1 %v1556_v44  ;;  %624 = vmatprep.mubr.f32.mxu0 %v1691_v3  ;;  %v1564_v2 = vpack.c.bf16 %v40_v63, %v32_v57  ;;  %v107_v44 = vld [vmem:[%s2983_s2 + $0x278] sm:$0xff]  ;;  %v2692_v35 = vld [vmem:[%s2985_s4] sm:$0xff] }
  0x60   :  { %737 = vmatprep.mubr.f32.mxu1 %v1691_v3  ;;  %1527 = vmatprep.subr.bf16.mxu0 %v1526_v46  ;;  %v104_v46 = vld [vmem:[%s2983_s2 + $0x260] sm:$0xff]  ;;  %v1610_v51 = vpack.c.bf16 %v107_v44, %v99_v43  ;;  %v123_v57 = vld [vmem:[%s2983_s2 + $0x2f8] sm:$0xff] }
  0x61   :  { %625 = vmatmul.mubr.f32.gmra.mrb[30].mxu0 %v2178_v14  ;;  %1559 = vmatprep.subr.bf16.mxu1 %v1558_v50  ;;  %v106_v50 = vld [vmem:[%s2983_s2 + $0x270] sm:$0xff]  ;;  %v1580_v55 = vpack.c.bf16 %v104_v46, %v96_v49 }
  0x62   :  { %738 = vmatmul.mubr.f32.gmra.mrb[30].mxu1 %v2178_v14  ;;  %1529 = vmatpush1.bf16.msra.mxu0 %v1528_v53  ;;  %v48_v14 = vld [vmem:[%s2983_s2 + $0xa0] sm:$0xff]  ;;  %v121_v53 = vld [vmem:[%s2983_s2 + $0x2e8] sm:$0xff]  ;;  %v1612_v63 = vpack.c.bf16 %v106_v50, %v98_v48 }
  0x63   :  { %1561 = vmatpush1.bf16.msra.mxu1 %v1560_v56  ;;  %808 = vmatprep.mubr.f32.mxu0 %v1691_v3  ;;  %v1568_v16 = vpack.c.bf16 %v56_v7, %v48_v14  ;;  %v115_v56 = vld [vmem:[%s2983_s2 + $0x2b8] sm:$0xff]  ;;  %v1582_v60 = vpack.c.bf16 %v121_v53, %v113_v52 }
  0x64   :  { %921 = vmatprep.mubr.f32.mxu1 %v1691_v3  ;;  %1563 = vmatprep.subr.bf16.mxu0 %v1562_v58  ;;  %v112_v58 = vld [vmem:[%s2983_s2 + $0x2a0] sm:$0xff]  ;;  %v1614_v0 = vpack.c.bf16 %v123_v57, %v115_v56  ;;  %v131_v14 = vld [vmem:[%s2983_s2 + $0x338] sm:$0xff] }
  0x65   :  { %809 = vmatmul.mubr.f32.vlgmr.msra.gmra.mrb[0].mxu0 %v2435_v1  ;;  %1595 = vmatprep.subr.bf16.mxu1 %v1594_v61  ;;  %v114_v61 = vld [vmem:[%s2983_s2 + $0x2b0] sm:$0xff]  ;;  %v139_v7 = vld [vmem:[%s2983_s2 + $0x378] sm:$0xff] }
  0x66   :  { %922 = vmatmul.mubr.f32.vlgmr.msra.gmra.mrb[0].mxu1 %v2435_v1  ;;  %1565 = vmatpush1.bf16.msra.mxu0 %v1564_v2  ;;  %v129_v2 = vld [vmem:[%s2983_s2 + $0x328] sm:$0xff] }
  0x67   :  { %1597 = vmatpush1.bf16.msra.mxu1 %v1596_v6  ;;  %814 = vmatprep.mubr.f32.mxu0 %v1691_v3  ;;  %v1584_v6 = vpack.c.bf16 %v120_v59, %v112_v58 }
  0x68   :  { %927 = vmatprep.mubr.f32.mxu1 %v1691_v3  ;;  %1567 = vmatprep.subr.bf16.mxu0 %v1566_v8  ;;  %v1616_v8 = vpack.c.bf16 %v122_v62, %v114_v61 }
  0x69   :  { %815 = vmatmul.mubr.f32.gmra.mrb[2].mxu0 %v2468_v15  ;;  %1599 = vmatprep.subr.bf16.mxu1 %v1598_v11  ;;  %v1586_v11 = vpack.c.bf16 %v137_v4, %v129_v2 }
  0x6a   :  { %928 = vmatmul.mubr.f32.gmra.mrb[2].mxu1 %v2468_v15  ;;  %1569 = vmatpush1.bf16.msra.mxu0 %v1568_v16  ;;  %v1618_v16 = vpack.c.bf16 %v139_v7, %v131_v14 }
  0x6b   :  { %1601 = vmatpush1.bf16.msra.mxu1 %v1600_v19  ;;  %820 = vmatprep.mubr.f32.mxu0 %v1691_v3  ;;  %v26_v19 = vld [vmem:[%s2984_s0 + $0x30] sm:$0xff] }
  0x6c   :  { %933 = vmatprep.mubr.f32.mxu1 %v1691_v3  ;;  %1571 = vmatprep.subr.bf16.mxu0 %v1570_v22  ;;  %v155_v22 = vld [vmem:[%s2983_s2 + $0x3f8] sm:$0xff] }
  0x6d   :  { %821 = vmatmul.mubr.f32.gmra.mrb[4].mxu0 %v2501_v28  ;;  %1603 = vmatprep.subr.bf16.mxu1 %v1602_v25  ;;  %v152_v25 = vld [vmem:[%s2983_s2 + $0x3e0] sm:$0xff]  ;;  %v1622_v30 = vpack.c.bf16 %v155_v22, %v147_v21 }
  0x6e   :  { %934 = vmatmul.mubr.f32.gmra.mrb[4].mxu1 %v2501_v28  ;;  %1573 = vmatpush1.bf16.msra.mxu0 %v1572_v29  ;;  %v154_v29 = vld [vmem:[%s2983_s2 + $0x3f0] sm:$0xff] }
  0x6f   :  { %1605 = vmatpush1.bf16.msra.mxu1 %v1604_v32  ;;  %826 = vmatprep.mubr.f32.mxu0 %v1691_v3  ;;  %v1592_v32 = vpack.c.bf16 %v152_v25, %v144_v24  ;;  %v1624_v33 = vpack.c.bf16 %v154_v29, %v146_v27 }
  0x70   :  { %939 = vmatprep.mubr.f32.mxu1 %v1691_v3  ;;  %1575 = vmatprep.subr.bf16.mxu0 %v1574_v34 }
  0x71   :  { %827 = vmatmul.mubr.f32.gmra.mrb[6].mxu0 %v2534_v41  ;;  %1607 = vmatprep.subr.bf16.mxu1 %v1606_v38 }
  0x72   :  { %940 = vmatmul.mubr.f32.gmra.mrb[6].mxu1 %v2534_v41  ;;  %1577 = vmatpush1.bf16.msra.mxu0 %v1576_v42 }
  0x73   :  { %1609 = vmatpush1.bf16.msra.mxu1 %v1608_v45  ;;  %832 = vmatprep.mubr.f32.mxu0 %v1691_v3 }
  0x74   :  { %945 = vmatprep.mubr.f32.mxu1 %v1691_v3  ;;  %1579 = vmatprep.subr.bf16.mxu0 %v1578_v47 }
  0x75   :  { %833 = vmatmul.mubr.f32.gmra.mrb[8].mxu0 %v2567_v54  ;;  %1611 = vmatprep.subr.bf16.mxu1 %v1610_v51 }
  0x76   :  { %946 = vmatmul.mubr.f32.gmra.mrb[8].mxu1 %v2567_v54  ;;  %1581 = vmatpush1.bf16.msra.mxu0 %v1580_v55 }
  0x77   :  { %1613 = vmatpush1.bf16.msra.mxu1 %v1612_v63  ;;  %838 = vmatprep.mubr.f32.mxu0 %v1691_v3 }
  0x78   :  { %951 = vmatprep.mubr.f32.mxu1 %v1691_v3  ;;  %1583 = vmatprep.subr.bf16.mxu0 %v1582_v60 }
  0x79   :  { %839 = vmatmul.mubr.f32.gmra.mrb[10].mxu0 %v2600_v5  ;;  %1615 = vmatprep.subr.bf16.mxu1 %v1614_v0 }
  0x7a   :  { %952 = vmatmul.mubr.f32.gmra.mrb[10].mxu1 %v2600_v5  ;;  %1585 = vmatpush1.bf16.msra.mxu0 %v1584_v6 }
  0x7b   :  { %1617 = vmatpush1.bf16.msra.mxu1 %v1616_v8  ;;  %844 = vmatprep.mubr.f32.mxu0 %v1691_v3 }
  0x7c   :  { %957 = vmatprep.mubr.f32.mxu1 %v1691_v3  ;;  %1587 = vmatprep.subr.bf16.mxu0 %v1586_v11 }
  0x7d   :  { %845 = vmatmul.mubr.f32.gmra.mrb[12].mxu0 %v26_v19  ;;  %1619 = vmatprep.subr.bf16.mxu1 %v1618_v16 }
  0x7e   :  { %958 = vmatmul.mubr.f32.gmra.mrb[12].mxu1 %v26_v19  ;;  %1589 = vmatpush1.bf16.msra.mxu0 %v1588_v20 }
  0x7f   :  { %1621 = vmatpush1.bf16.msra.mxu1 %v1620_v23  ;;  %850 = vmatprep.mubr.f32.mxu0 %v1691_v3 }
  0x80   :  { %963 = vmatprep.mubr.f32.mxu1 %v1691_v3  ;;  %1591 = vmatprep.subr.bf16.mxu0 %v1590_v26 }
  0x81   :  { %851 = vmatmul.mubr.f32.gmra.mrb[14].mxu0 %v27_v31  ;;  %1623 = vmatprep.subr.bf16.mxu1 %v1622_v30 }
  0x82   :  { %964 = vmatmul.mubr.f32.gmra.mrb[14].mxu1 %v27_v31  ;;  %1593 = vmatpush1.bf16.msra.mxu0 %v1592_v32 }
  0x83   :  { %1625 = vmatpush1.bf16.msra.mxu1 %v1624_v33  ;;  %1034 = vmatprep.mubr.f32.mxu0 %v1691_v3 }
  0x84   :  { %1147 = vmatprep.mubr.f32.mxu1 %v1691_v3 }
  0x85   :  { %1035 = vmatmul.mubr.f32.vlgmr.msra.gmra.mrb[16].mxu0 %v2435_v1 }
  0x86   :  { %1148 = vmatmul.mubr.f32.vlgmr.msra.gmra.mrb[16].mxu1 %v2435_v1  ;;  %1040 = vmatprep.mubr.f32.mxu0 %v1691_v3  ;;  %v1198_v1 = vlaneseq }
  0x87   :  { %1153 = vmatprep.mubr.f32.mxu1 %v1691_v3 }
  0x89   :  { %1041 = vmatmul.mubr.f32.gmra.mrb[18].mxu0 %v2468_v15 }
  0x8a   :  { %1154 = vmatmul.mubr.f32.gmra.mrb[18].mxu1 %v2468_v15  ;;  %1046 = vmatprep.mubr.f32.mxu0 %v1691_v3  ;;  %v2686_v15 = vshrl.u32 %v1198_v1, 7 }
  0x8b   :  { %1159 = vmatprep.mubr.f32.mxu1 %v1691_v3 }
  0x8c   :  { %v1208_v34 = vsub.s32 2, %v2686_v15  ;;  %v1204_v36 = vsub.s32 1, %v2686_v15  ;;  %v1212_v37 = vsub.s32 3, %v2686_v15  ;;  %v1216_v33 = vsub.s32 4, %v2686_v15 }
  0x8d   :  { %1047 = vmatmul.mubr.f32.gmra.mrb[20].mxu0 %v2501_v28 }
  0x8e   :  { %1160 = vmatmul.mubr.f32.gmra.mrb[20].mxu1 %v2501_v28  ;;  %1052 = vmatprep.mubr.f32.mxu0 %v1691_v3  ;;  %v1200_v28 = vsub.s32 0, %v2686_v15  ;;  %v2701_v38 = vrot.slane %v2692_v35, %v1208_v34  ;;  %v2704_v39 = vrot.slane %v2692_v35, %v1204_v36  ;;  %v2707_v40 = vrot.slane %v2692_v35, %v1212_v37 }
  0x8f   :  { %1165 = vmatprep.mubr.f32.mxu1 %v1691_v3  ;;  %v1224_v36 = vsub.s32 6, %v2686_v15  ;;  %v1220_v37 = vsub.s32 5, %v2686_v15 }
  0x91   :  { %1053 = vmatmul.mubr.f32.gmra.mrb[22].mxu0 %v2534_v41 }
  0x92   :  { %1166 = vmatmul.mubr.f32.gmra.mrb[22].mxu1 %v2534_v41  ;;  %1058 = vmatprep.mubr.f32.mxu0 %v1691_v3 }
  0x93   :  { %1171 = vmatprep.mubr.f32.mxu1 %v1691_v3 }
  0x95   :  { %1059 = vmatmul.mubr.f32.gmra.mrb[24].mxu0 %v2567_v54 }
  0x96   :  { %1172 = vmatmul.mubr.f32.gmra.mrb[24].mxu1 %v2567_v54  ;;  %1064 = vmatprep.mubr.f32.mxu0 %v1691_v3 }
  0x97   :  { %1177 = vmatprep.mubr.f32.mxu1 %v1691_v3 }
  0x99   :  { %1065 = vmatmul.mubr.f32.gmra.mrb[26].mxu0 %v2600_v5 }
  0x9a   :  { %1178 = vmatmul.mubr.f32.gmra.mrb[26].mxu1 %v2600_v5  ;;  %1070 = vmatprep.mubr.f32.mxu0 %v1691_v3 }
  0x9b   :  { %1183 = vmatprep.mubr.f32.mxu1 %v1691_v3 }
  0x9d   :  { %1071 = vmatmul.mubr.f32.gmra.mrb[28].mxu0 %v26_v19 }
  0x9e   :  { %1184 = vmatmul.mubr.f32.gmra.mrb[28].mxu1 %v26_v19  ;;  %1076 = vmatprep.mubr.f32.mxu0 %v1691_v3 }
  0x9f   :  { %1189 = vmatprep.mubr.f32.mxu1 %v1691_v3  ;;  %v2698_v3 = vrot.slane %v2692_v35, %v1200_v28 }
  0xa1   :  { %1077 = vmatmul.mubr.f32.gmra.mrb[30].mxu0 %v27_v31 }
  0xa2   :  { %1190 = vmatmul.mubr.f32.gmra.mrb[30].mxu1 %v27_v31 }
 0x138   :  { %v810_v41 = vpop.f32.mrb[0].mxu0 }
 0x139   :  { %v1238_v42 = vadd.f32 %v2698_v3, %v810_v41  ;;  %v923_v43 = vpop.f32.mrb[0].mxu1  ;;  %v812_v44 = vpop.f32.mrb[1].mxu0 }
 0x13a   :  { %v1240_v45 = vadd.f32 %v2701_v38, %v923_v43  ;;  %v1239_v49 = vadd.f32 %v2704_v39, %v812_v44  ;;  %v925_v46 = vpop.f32.mrb[1].mxu1 }
 0x13b   :  { %1302 = vst [vmem:[%s2986_s5] sm:$0xff] %v1238_v42  ;;  %v1241_v47 = vadd.f32 %v2707_v40, %v925_v46  ;;  %v1228_v42 = vsub.s32 7, %v2686_v15  ;;  %v2827_v46 = vrot.slane %v2692_v35, %v1216_v33 }
 0x13c   :  { %1304 = vst [vmem:[%s2986_s5 + $0x10] sm:$0xff] %v1240_v45  ;;  %1303 = vst [vmem:[%s2986_s5 + $0x8] sm:$0xff] %v1239_v49  ;;  %v816_v48 = vpop.f32.mrb[2].mxu0 }
 0x13d   :  { %1305 = vst [vmem:[%s2986_s5 + $0x18] sm:$0xff] %v1241_v47  ;;  %v1246_v50 = vadd.f32 %v2698_v3, %v816_v48  ;;  %v929_v51 = vpop.f32.mrb[2].mxu1  ;;  %v818_v52 = vpop.f32.mrb[3].mxu0 }
 0x13e   :  { %v1248_v53 = vadd.f32 %v2701_v38, %v929_v51  ;;  %v1247_v54 = vadd.f32 %v2704_v39, %v818_v52  ;;  %v931_v55 = vpop.f32.mrb[3].mxu1  ;;  %v2835_v51 = vrot.slane %v2692_v35, %v1220_v37  ;;  %v2842_v52 = vrot.slane %v2692_v35, %v1228_v42 }
 0x13f   :  { %1310 = vst [vmem:[%s2986_s5 + $0x40] sm:$0xff] %v1246_v50  ;;  %v1249_v56 = vadd.f32 %v2707_v40, %v931_v55  ;;  %v2832_v50 = vrot.slane %v2692_v35, %v1224_v36 }
 0x140   :  { %1312 = vst [vmem:[%s2986_s5 + $0x50] sm:$0xff] %v1248_v53  ;;  %1311 = vst [vmem:[%s2986_s5 + $0x48] sm:$0xff] %v1247_v54  ;;  %v822_v57 = vpop.f32.mrb[4].mxu0 }
 0x141   :  { %1313 = vst [vmem:[%s2986_s5 + $0x58] sm:$0xff] %v1249_v56  ;;  %v1254_v63 = vadd.f32 %v2698_v3, %v822_v57  ;;  %v935_v58 = vpop.f32.mrb[4].mxu1  ;;  %v824_v59 = vpop.f32.mrb[5].mxu0 }
 0x142   :  { %v1256_v60 = vadd.f32 %v2701_v38, %v935_v58  ;;  %v1255_v61 = vadd.f32 %v2704_v39, %v824_v59  ;;  %v937_v62 = vpop.f32.mrb[5].mxu1 }
 0x143   :  { %1318 = vst [vmem:[%s2986_s5 + $0x80] sm:$0xff] %v1254_v63  ;;  %v1257_v0 = vadd.f32 %v2707_v40, %v937_v62 }
 0x144   :  { %1320 = vst [vmem:[%s2986_s5 + $0x90] sm:$0xff] %v1256_v60  ;;  %1319 = vst [vmem:[%s2986_s5 + $0x88] sm:$0xff] %v1255_v61  ;;  %v828_v2 = vpop.f32.mrb[6].mxu0 }
 0x145   :  { %1321 = vst [vmem:[%s2986_s5 + $0x98] sm:$0xff] %v1257_v0  ;;  %v1262_v4 = vadd.f32 %v2698_v3, %v828_v2  ;;  %v941_v5 = vpop.f32.mrb[6].mxu1  ;;  %v830_v6 = vpop.f32.mrb[7].mxu0 }
 0x146   :  { %v1264_v14 = vadd.f32 %v2701_v38, %v941_v5  ;;  %v1263_v7 = vadd.f32 %v2704_v39, %v830_v6  ;;  %v943_v8 = vpop.f32.mrb[7].mxu1 }
 0x147   :  { %1326 = vst [vmem:[%s2986_s5 + $0xc0] sm:$0xff] %v1262_v4  ;;  %v1265_v9 = vadd.f32 %v2707_v40, %v943_v8 }
 0x148   :  { %1328 = vst [vmem:[%s2986_s5 + $0xd0] sm:$0xff] %v1264_v14  ;;  %1327 = vst [vmem:[%s2986_s5 + $0xc8] sm:$0xff] %v1263_v7  ;;  %v834_v10 = vpop.f32.mrb[8].mxu0 }
 0x149   :  { %1329 = vst [vmem:[%s2986_s5 + $0xd8] sm:$0xff] %v1265_v9  ;;  %v1270_v11 = vadd.f32 %v2698_v3, %v834_v10  ;;  %v947_v12 = vpop.f32.mrb[8].mxu1  ;;  %v836_v13 = vpop.f32.mrb[9].mxu0 }
 0x14a   :  { %v1272_v16 = vadd.f32 %v2701_v38, %v947_v12  ;;  %v1271_v17 = vadd.f32 %v2704_v39, %v836_v13  ;;  %v949_v18 = vpop.f32.mrb[9].mxu1 }
 0x14b   :  { %1334 = vst [vmem:[%s2986_s5 + $0x100] sm:$0xff] %v1270_v11  ;;  %v1273_v19 = vadd.f32 %v2707_v40, %v949_v18 }
 0x14c   :  { %1336 = vst [vmem:[%s2986_s5 + $0x110] sm:$0xff] %v1272_v16  ;;  %1335 = vst [vmem:[%s2986_s5 + $0x108] sm:$0xff] %v1271_v17  ;;  %v840_v20 = vpop.f32.mrb[10].mxu0 }
 0x14d   :  { %1337 = vst [vmem:[%s2986_s5 + $0x118] sm:$0xff] %v1273_v19  ;;  %v1278_v21 = vadd.f32 %v2698_v3, %v840_v20  ;;  %v953_v22 = vpop.f32.mrb[10].mxu1  ;;  %v842_v23 = vpop.f32.mrb[11].mxu0 }
 0x14e   :  { %v1280_v24 = vadd.f32 %v2701_v38, %v953_v22  ;;  %v1279_v25 = vadd.f32 %v2704_v39, %v842_v23  ;;  %v955_v26 = vpop.f32.mrb[11].mxu1 }
 0x14f   :  { %1342 = vst [vmem:[%s2986_s5 + $0x140] sm:$0xff] %v1278_v21  ;;  %v1281_v27 = vadd.f32 %v2707_v40, %v955_v26 }
 0x150   :  { %1344 = vst [vmem:[%s2986_s5 + $0x150] sm:$0xff] %v1280_v24  ;;  %1343 = vst [vmem:[%s2986_s5 + $0x148] sm:$0xff] %v1279_v25  ;;  %v846_v29 = vpop.f32.mrb[12].mxu0 }
 0x151   :  { %1345 = vst [vmem:[%s2986_s5 + $0x158] sm:$0xff] %v1281_v27  ;;  %v1286_v30 = vadd.f32 %v2698_v3, %v846_v29  ;;  %v959_v31 = vpop.f32.mrb[12].mxu1  ;;  %v848_v32 = vpop.f32.mrb[13].mxu0 }
 0x152   :  { %v1288_v1 = vadd.f32 %v2701_v38, %v959_v31  ;;  %v1287_v28 = vadd.f32 %v2704_v39, %v848_v32  ;;  %v961_v34 = vpop.f32.mrb[13].mxu1 }
 0x153   :  { %1350 = vst [vmem:[%s2986_s5 + $0x180] sm:$0xff] %v1286_v30  ;;  %v1289_v41 = vadd.f32 %v2707_v40, %v961_v34 }
 0x154   :  { %1352 = vst [vmem:[%s2986_s5 + $0x190] sm:$0xff] %v1288_v1  ;;  %1351 = vst [vmem:[%s2986_s5 + $0x188] sm:$0xff] %v1287_v28  ;;  %v852_v43 = vpop.f32.mrb[14].mxu0 }
 0x155   :  { %1353 = vst [vmem:[%s2986_s5 + $0x198] sm:$0xff] %v1289_v41  ;;  %v1294_v44 = vadd.f32 %v2698_v3, %v852_v43  ;;  %v965_v45 = vpop.f32.mrb[14].mxu1  ;;  %v854_v49 = vpop.f32.mrb[15].mxu0 }
 0x156   :  { %v1296_v15 = vadd.f32 %v2701_v38, %v965_v45  ;;  %v1295_v47 = vadd.f32 %v2704_v39, %v854_v49  ;;  %v967_v48 = vpop.f32.mrb[15].mxu1 }
 0x157   :  { %1358 = vst [vmem:[%s2986_s5 + $0x1c0] sm:$0xff] %v1294_v44  ;;  %v1297_v3 = vadd.f32 %v2707_v40, %v967_v48 }
 0x158   :  { %1360 = vst [vmem:[%s2986_s5 + $0x1d0] sm:$0xff] %v1296_v15  ;;  %1359 = vst [vmem:[%s2986_s5 + $0x1c8] sm:$0xff] %v1295_v47  ;;  %v1036_v38 = vpop.f32.mrb[16].mxu0 }
 0x159   :  { %1361 = vst [vmem:[%s2986_s5 + $0x1d8] sm:$0xff] %v1297_v3  ;;  %v1242_v39 = vadd.f32 %v2827_v46, %v1036_v38  ;;  %v1149_v53 = vpop.f32.mrb[16].mxu1  ;;  %v1038_v40 = vpop.f32.mrb[17].mxu0 }
 0x15a   :  { %v1244_v35 = vadd.f32 %v2832_v50, %v1149_v53  ;;  %v1243_v54 = vadd.f32 %v2835_v51, %v1038_v40  ;;  %v1151_v55 = vpop.f32.mrb[17].mxu1 }
 0x15b   :  { %1306 = vst [vmem:[%s2986_s5 + $0x20] sm:$0xff] %v1242_v39  ;;  %v1245_v56 = vadd.f32 %v2842_v52, %v1151_v55 }
 0x15c   :  { %1308 = vst [vmem:[%s2986_s5 + $0x30] sm:$0xff] %v1244_v35  ;;  %1307 = vst [vmem:[%s2986_s5 + $0x28] sm:$0xff] %v1243_v54  ;;  %v1042_v57 = vpop.f32.mrb[18].mxu0 }
 0x15d   :  { %1309 = vst [vmem:[%s2986_s5 + $0x38] sm:$0xff] %v1245_v56  ;;  %v1250_v63 = vadd.f32 %v2827_v46, %v1042_v57  ;;  %v1155_v58 = vpop.f32.mrb[18].mxu1  ;;  %v1044_v59 = vpop.f32.mrb[19].mxu0 }
 0x15e   :  { %v1252_v60 = vadd.f32 %v2832_v50, %v1155_v58  ;;  %v1251_v61 = vadd.f32 %v2835_v51, %v1044_v59  ;;  %v1157_v62 = vpop.f32.mrb[19].mxu1 }
 0x15f   :  { %1314 = vst [vmem:[%s2986_s5 + $0x60] sm:$0xff] %v1250_v63  ;;  %v1253_v0 = vadd.f32 %v2842_v52, %v1157_v62 }
 0x160   :  { %1316 = vst [vmem:[%s2986_s5 + $0x70] sm:$0xff] %v1252_v60  ;;  %1315 = vst [vmem:[%s2986_s5 + $0x68] sm:$0xff] %v1251_v61  ;;  %v1048_v2 = vpop.f32.mrb[20].mxu0 }
 0x161   :  { %1317 = vst [vmem:[%s2986_s5 + $0x78] sm:$0xff] %v1253_v0  ;;  %v1258_v4 = vadd.f32 %v2827_v46, %v1048_v2  ;;  %v1161_v5 = vpop.f32.mrb[20].mxu1  ;;  %v1050_v6 = vpop.f32.mrb[21].mxu0 }
 0x162   :  { %v1260_v14 = vadd.f32 %v2832_v50, %v1161_v5  ;;  %v1259_v7 = vadd.f32 %v2835_v51, %v1050_v6  ;;  %v1163_v8 = vpop.f32.mrb[21].mxu1 }
 0x163   :  { %1322 = vst [vmem:[%s2986_s5 + $0xa0] sm:$0xff] %v1258_v4  ;;  %v1261_v9 = vadd.f32 %v2842_v52, %v1163_v8 }
 0x164   :  { %1324 = vst [vmem:[%s2986_s5 + $0xb0] sm:$0xff] %v1260_v14  ;;  %1323 = vst [vmem:[%s2986_s5 + $0xa8] sm:$0xff] %v1259_v7  ;;  %v1054_v10 = vpop.f32.mrb[22].mxu0 }
 0x165   :  { %1325 = vst [vmem:[%s2986_s5 + $0xb8] sm:$0xff] %v1261_v9  ;;  %v1266_v11 = vadd.f32 %v2827_v46, %v1054_v10  ;;  %v1167_v12 = vpop.f32.mrb[22].mxu1  ;;  %v1056_v13 = vpop.f32.mrb[23].mxu0 }
 0x166   :  { %v1268_v16 = vadd.f32 %v2832_v50, %v1167_v12  ;;  %v1267_v17 = vadd.f32 %v2835_v51, %v1056_v13  ;;  %v1169_v18 = vpop.f32.mrb[23].mxu1 }
 0x167   :  { %1330 = vst [vmem:[%s2986_s5 + $0xe0] sm:$0xff] %v1266_v11  ;;  %v1269_v19 = vadd.f32 %v2842_v52, %v1169_v18 }
 0x168   :  { %1332 = vst [vmem:[%s2986_s5 + $0xf0] sm:$0xff] %v1268_v16  ;;  %1331 = vst [vmem:[%s2986_s5 + $0xe8] sm:$0xff] %v1267_v17  ;;  %v1060_v20 = vpop.f32.mrb[24].mxu0 }
 0x169   :  { %1333 = vst [vmem:[%s2986_s5 + $0xf8] sm:$0xff] %v1269_v19  ;;  %v1274_v21 = vadd.f32 %v2827_v46, %v1060_v20  ;;  %v1173_v22 = vpop.f32.mrb[24].mxu1  ;;  %v1062_v23 = vpop.f32.mrb[25].mxu0 }
 0x16a   :  { %v1276_v24 = vadd.f32 %v2832_v50, %v1173_v22  ;;  %v1275_v25 = vadd.f32 %v2835_v51, %v1062_v23  ;;  %v1175_v26 = vpop.f32.mrb[25].mxu1 }
 0x16b   :  { %1338 = vst [vmem:[%s2986_s5 + $0x120] sm:$0xff] %v1274_v21  ;;  %v1277_v27 = vadd.f32 %v2842_v52, %v1175_v26 }
 0x16c   :  { %1340 = vst [vmem:[%s2986_s5 + $0x130] sm:$0xff] %v1276_v24  ;;  %1339 = vst [vmem:[%s2986_s5 + $0x128] sm:$0xff] %v1275_v25  ;;  %v1066_v29 = vpop.f32.mrb[26].mxu0 }
 0x16d   :  { %1341 = vst [vmem:[%s2986_s5 + $0x138] sm:$0xff] %v1277_v27  ;;  %v1282_v30 = vadd.f32 %v2827_v46, %v1066_v29  ;;  %v1179_v31 = vpop.f32.mrb[26].mxu1  ;;  %v1068_v32 = vpop.f32.mrb[27].mxu0 }
 0x16e   :  { %v1284_v33 = vadd.f32 %v2832_v50, %v1179_v31  ;;  %v1283_v1 = vadd.f32 %v2835_v51, %v1068_v32  ;;  %v1181_v28 = vpop.f32.mrb[27].mxu1 }
 0x16f   :  { %1346 = vst [vmem:[%s2986_s5 + $0x160] sm:$0xff] %v1282_v30  ;;  %v1285_v34 = vadd.f32 %v2842_v52, %v1181_v28 }
 0x170   :  { %1348 = vst [vmem:[%s2986_s5 + $0x170] sm:$0xff] %v1284_v33  ;;  %1347 = vst [vmem:[%s2986_s5 + $0x168] sm:$0xff] %v1283_v1  ;;  %v1072_v36 = vpop.f32.mrb[28].mxu0 }
 0x171   :  { %1349 = vst [vmem:[%s2986_s5 + $0x178] sm:$0xff] %v1285_v34  ;;  %v1290_v37 = vadd.f32 %v2827_v46, %v1072_v36  ;;  %v1185_v41 = vpop.f32.mrb[28].mxu1  ;;  %v1074_v42 = vpop.f32.mrb[29].mxu0 }
 0x172   :  { %v1292_v43 = vadd.f32 %v2832_v50, %v1185_v41  ;;  %v1291_v44 = vadd.f32 %v2835_v51, %v1074_v42  ;;  %v1187_v45 = vpop.f32.mrb[29].mxu1 }
 0x173   :  { %1354 = vst [vmem:[%s2986_s5 + $0x1a0] sm:$0xff] %v1290_v37  ;;  %v1293_v49 = vadd.f32 %v2842_v52, %v1187_v45 }
 0x174   :  { %1356 = vst [vmem:[%s2986_s5 + $0x1b0] sm:$0xff] %v1292_v43  ;;  %1355 = vst [vmem:[%s2986_s5 + $0x1a8] sm:$0xff] %v1291_v44  ;;  %v1078_v15 = vpop.f32.mrb[30].mxu0 }
 0x175   :  { %1357 = vst [vmem:[%s2986_s5 + $0x1b8] sm:$0xff] %v1293_v49  ;;  %v1298_v47 = vadd.f32 %v2827_v46, %v1078_v15  ;;  %v1191_v48 = vpop.f32.mrb[30].mxu1  ;;  %v1080_v3 = vpop.f32.mrb[31].mxu0 }
 0x176   :  { %v1300_v38 = vadd.f32 %v2832_v50, %v1191_v48  ;;  %v1299_v39 = vadd.f32 %v2835_v51, %v1080_v3  ;;  %v1193_v53 = vpop.f32.mrb[31].mxu1 }
 0x177   :  { %1362 = vst [vmem:[%s2986_s5 + $0x1e0] sm:$0xff] %v1298_v47  ;;  %v1301_v40 = vadd.f32 %v2842_v52, %v1193_v53 }
 0x178   :  { %1364 = vst [vmem:[%s2986_s5 + $0x1f0] sm:$0xff] %v1300_v38  ;;  %1363 = vst [vmem:[%s2986_s5 + $0x1e8] sm:$0xff] %v1299_v39 }
 0x179   :  { %1365 = vst [vmem:[%s2986_s5 + $0x1f8] sm:$0xff] %v1301_v40 }

// kernel: forward.7
= control target key start
LH: loop header
LB: loop body
LE: loop exit
PB: predicated region body
PF: predicated region fallthrough
CT: control target
= control target key end

     0   :  { %v2629_v7 = vmov 0.0   ;;  %vm2631_vm0 = vmmov 0   ;;  %vm1766_vm1 = vcmask 64512   ;;  %s3448_s0 = inlined_call_operand.vmem [shape: f32[8,8,1024], index: 0, kind: input, shape index: {}, may-alias: {0,1}]   ;;  %s3449_s1 = inlined_call_operand.vmem [shape: f32[8,8,1024], index: 1, kind: input, shape index: {}, may-alias: {0,1}]   ;;  %s3450_s2 = inlined_call_operand.vmem [shape: f32[2,128,512], index: 2, kind: input, shape index: {}]   ;;  %s3451_s3 = inlined_call_operand.vmem [shape: f32[256,8], index: 3, kind: input, shape index: {}]   ;;  %s3452_s4 = inlined_call_operand.vmem [shape: f32[1,8], index: 4, kind: input, shape index: {}]   ;;  %s3453_s5 = inlined_call_operand.vmem [shape: f32[8,8], index: 5, kind: output, shape index: {}]  }
   0x1   :  { %v105_v0 = vld [vmem:[%s3450_s2 + $0x8] sm:$0xff]  ;;  %v104_v2 = vld [vmem:[%s3450_s2] sm:$0xff]  ;;  %236 = vmatprep.mubr.f32.mxu0 %v2629_v7  ;;  %307 = vmatprep.mubr.f32.mxu1 %v2629_v7  ;;  %v107_v19 = vld [vmem:[%s3450_s2 + $0x18] sm:$0xff] }
   0x2   :  { %v109_v1 = vld [vmem:[%s3450_s2 + $0x28] sm:$0xff]  ;;  %v108_v4 = vld [vmem:[%s3450_s2 + $0x20] sm:$0xff]  ;;  %v111_v20 = vld [vmem:[%s3450_s2 + $0x38] sm:$0xff] }
   0x3   :  { %v2671_v3 = vpack.c.bf16 %v109_v1, %v105_v0  ;;  %v113_v5 = vld [vmem:[%s3450_s2 + $0x48] sm:$0xff]  ;;  %v2684_v8 = vpack.c.bf16 %v108_v4, %v104_v2  ;;  %v112_v10 = vld [vmem:[%s3450_s2 + $0x40] sm:$0xff]  ;;  %v2725_v22 = vpack.c.bf16 %v111_v20, %v107_v19  ;;  %v106_v23 = vld [vmem:[%s3450_s2 + $0x10] sm:$0xff] }
   0x4   :  { %v117_v6 = vld [vmem:[%s3450_s2 + $0x68] sm:$0xff]  ;;  %v116_v11 = vld [vmem:[%s3450_s2 + $0x60] sm:$0xff]  ;;  %v110_v24 = vld [vmem:[%s3450_s2 + $0x30] sm:$0xff] }
   0x5   :  { %v2686_v9 = vpack.c.bf16 %v117_v6, %v113_v5  ;;  %v121_v12 = vld [vmem:[%s3450_s2 + $0x88] sm:$0xff]  ;;  %1923 = vmatprep.subr.bf16.mxu0 %v2671_v3  ;;  %v2702_v14 = vpack.c.bf16 %v116_v11, %v112_v10  ;;  %v120_v15 = vld [vmem:[%s3450_s2 + $0x80] sm:$0xff]  ;;  %v2733_v25 = vpack.c.bf16 %v110_v24, %v106_v23  ;;  %1955 = vmatprep.subr.bf16.mxu1 %v2725_v22  ;;  %v115_v27 = vld [vmem:[%s3450_s2 + $0x58] sm:$0xff] }
   0x6   :  { %v125_v13 = vld [vmem:[%s3450_s2 + $0xa8] sm:$0xff]  ;;  %1925 = vmatpush1.bf16.msra.mxu0 %v2684_v8  ;;  %v124_v16 = vld [vmem:[%s3450_s2 + $0xa0] sm:$0xff]  ;;  %v119_v28 = vld [vmem:[%s3450_s2 + $0x78] sm:$0xff] }
   0x7   :  { %1927 = vmatprep.subr.bf16.mxu0 %v2686_v9  ;;  %v2711_v17 = vpack.c.bf16 %v125_v13, %v121_v12  ;;  %v129_v18 = vld [vmem:[%s3450_s2 + $0xc8] sm:$0xff]  ;;  %v2736_v26 = vpack.c.bf16 %v124_v16, %v120_v15  ;;  %v114_v29 = vld [vmem:[%s3450_s2 + $0x50] sm:$0xff]  ;;  %v128_v31 = vld [vmem:[%s3450_s2 + $0xc0] sm:$0xff]  ;;  %1957 = vmatpush1.bf16.msra.mxu1 %v2733_v25  ;;  %v2758_v33 = vpack.c.bf16 %v119_v28, %v115_v27 }
   0x8   :  { %v133_v21 = vld [vmem:[%s3450_s2 + $0xe8] sm:$0xff]  ;;  %v132_v32 = vld [vmem:[%s3450_s2 + $0xe0] sm:$0xff]  ;;  %v118_v34 = vld [vmem:[%s3450_s2 + $0x70] sm:$0xff] }
   0x9   :  { %v2749_v30 = vpack.c.bf16 %v133_v21, %v129_v18  ;;  %v137_v35 = vld [vmem:[%s3450_s2 + $0x108] sm:$0xff]  ;;  %v2769_v37 = vpack.c.bf16 %v118_v34, %v114_v29  ;;  %v123_v38 = vld [vmem:[%s3450_s2 + $0x98] sm:$0xff]  ;;  %1959 = vmatprep.subr.bf16.mxu1 %v2758_v33  ;;  %v122_v40 = vld [vmem:[%s3450_s2 + $0x90] sm:$0xff]  ;;  %v2785_v42 = vpack.c.bf16 %v132_v32, %v128_v31 }
   0xa   :  { %1929 = vmatpush1.bf16.msra.mxu0 %v2702_v14  ;;  %v141_v36 = vld [vmem:[%s3450_s2 + $0x128] sm:$0xff]  ;;  %v127_v39 = vld [vmem:[%s3450_s2 + $0xb8] sm:$0xff]  ;;  %v126_v41 = vld [vmem:[%s3450_s2 + $0xb0] sm:$0xff] }
   0xb   :  { %1931 = vmatprep.subr.bf16.mxu0 %v2711_v17  ;;  %v136_v43 = vld [vmem:[%s3450_s2 + $0x100] sm:$0xff]  ;;  %v2793_v45 = vpack.c.bf16 %v127_v39, %v123_v38  ;;  %v2796_v46 = vpack.c.bf16 %v141_v36, %v137_v35  ;;  %1961 = vmatpush1.bf16.msra.mxu1 %v2769_v37  ;;  %v145_v47 = vld [vmem:[%s3450_s2 + $0x148] sm:$0xff]  ;;  %v2802_v48 = vpack.c.bf16 %v126_v41, %v122_v40  ;;  %v131_v49 = vld [vmem:[%s3450_s2 + $0xd8] sm:$0xff] }
   0xc   :  { %v140_v44 = vld [vmem:[%s3450_s2 + $0x120] sm:$0xff]  ;;  %v135_v50 = vld [vmem:[%s3450_s2 + $0xf8] sm:$0xff]  ;;  %v149_v51 = vld [vmem:[%s3450_s2 + $0x168] sm:$0xff] }
   0xd   :  { %1963 = vmatprep.subr.bf16.mxu1 %v2793_v45  ;;  %v2814_v52 = vpack.c.bf16 %v135_v50, %v131_v49  ;;  %v130_v53 = vld [vmem:[%s3450_s2 + $0xd0] sm:$0xff]  ;;  %v2823_v55 = vpack.c.bf16 %v140_v44, %v136_v43  ;;  %v139_v56 = vld [vmem:[%s3450_s2 + $0x118] sm:$0xff]  ;;  %v2832_v58 = vpack.c.bf16 %v149_v51, %v145_v47  ;;  %v144_v59 = vld [vmem:[%s3450_s2 + $0x140] sm:$0xff] }
   0xe   :  { %1933 = vmatpush1.bf16.msra.mxu0 %v2736_v26  ;;  %v134_v54 = vld [vmem:[%s3450_s2 + $0xf0] sm:$0xff]  ;;  %v143_v57 = vld [vmem:[%s3450_s2 + $0x138] sm:$0xff]  ;;  %v148_v60 = vld [vmem:[%s3450_s2 + $0x160] sm:$0xff] }
   0xf   :  { %1935 = vmatprep.subr.bf16.mxu0 %v2749_v30  ;;  %1965 = vmatpush1.bf16.msra.mxu1 %v2802_v48  ;;  %v153_v61 = vld [vmem:[%s3450_s2 + $0x188] sm:$0xff]  ;;  %v2844_v62 = vpack.c.bf16 %v134_v54, %v130_v53  ;;  %v2850_v0 = vpack.c.bf16 %v143_v57, %v139_v56  ;;  %v138_v1 = vld [vmem:[%s3450_s2 + $0x110] sm:$0xff]  ;;  %v147_v4 = vld [vmem:[%s3450_s2 + $0x158] sm:$0xff]  ;;  %v2865_v6 = vpack.c.bf16 %v148_v60, %v144_v59 }
  0x10   :  { %v157_v63 = vld [vmem:[%s3450_s2 + $0x1a8] sm:$0xff]  ;;  %1967 = vmatprep.subr.bf16.mxu1 %v2814_v52  ;;  %v142_v2 = vld [vmem:[%s3450_s2 + $0x130] sm:$0xff]  ;;  %v151_v5 = vld [vmem:[%s3450_s2 + $0x178] sm:$0xff] }
  0x11   :  { %v2868_v10 = vpack.c.bf16 %v157_v63, %v153_v61  ;;  %v152_v11 = vld [vmem:[%s3450_s2 + $0x180] sm:$0xff]  ;;  %v161_v13 = vld [vmem:[%s3450_s2 + $0x1c8] sm:$0xff]  ;;  %v2880_v15 = vpack.c.bf16 %v142_v2, %v138_v1  ;;  %v2886_v18 = vpack.c.bf16 %v151_v5, %v147_v4  ;;  %v146_v19 = vld [vmem:[%s3450_s2 + $0x150] sm:$0xff] }
  0x12   :  { %1937 = vmatpush1.bf16.msra.mxu0 %v2785_v42  ;;  %v156_v12 = vld [vmem:[%s3450_s2 + $0x1a0] sm:$0xff]  ;;  %v165_v16 = vld [vmem:[%s3450_s2 + $0x1e8] sm:$0xff]  ;;  %v150_v20 = vld [vmem:[%s3450_s2 + $0x170] sm:$0xff] }
  0x13   :  { %1939 = vmatprep.subr.bf16.mxu0 %v2796_v46  ;;  %1969 = vmatpush1.bf16.msra.mxu1 %v2844_v62  ;;  %v155_v21 = vld [vmem:[%s3450_s2 + $0x198] sm:$0xff]  ;;  %v2901_v24 = vpack.c.bf16 %v156_v12, %v152_v11  ;;  %v2904_v27 = vpack.c.bf16 %v165_v16, %v161_v13  ;;  %v160_v28 = vld [vmem:[%s3450_s2 + $0x1c0] sm:$0xff]  ;;  %v2913_v31 = vpack.c.bf16 %v150_v20, %v146_v19  ;;  %v154_v34 = vld [vmem:[%s3450_s2 + $0x190] sm:$0xff] }
  0x14   :  { %1971 = vmatprep.subr.bf16.mxu1 %v2850_v0  ;;  %v159_v23 = vld [vmem:[%s3450_s2 + $0x1b8] sm:$0xff]  ;;  %v164_v29 = vld [vmem:[%s3450_s2 + $0x1e0] sm:$0xff]  ;;  %v158_v35 = vld [vmem:[%s3450_s2 + $0x1b0] sm:$0xff] }
  0x15   :  { %v2916_v32 = vpack.c.bf16 %v159_v23, %v155_v21  ;;  %v163_v36 = vld [vmem:[%s3450_s2 + $0x1d8] sm:$0xff]  ;;  %v2931_v39 = vpack.c.bf16 %v164_v29, %v160_v28  ;;  %v2935_v40 = vpack.c.bf16 %v158_v35, %v154_v34  ;;  %v162_v43 = vld [vmem:[%s3450_s2 + $0x1d0] sm:$0xff]  ;;  %v24_v49 = vld [vmem:[%s3448_s0] sm:$0xff] }
  0x16   :  { %1941 = vmatpush1.bf16.msra.mxu0 %v2823_v55  ;;  %v167_v38 = vld [vmem:[%s3450_s2 + $0x1f8] sm:$0xff]  ;;  %v166_v44 = vld [vmem:[%s3450_s2 + $0x1f0] sm:$0xff]  ;;  %v26_v50 = vld [vmem:[%s3448_s0 + $0x8] sm:$0xff] }
  0x17   :  { %1943 = vmatprep.subr.bf16.mxu0 %v2832_v58  ;;  %1973 = vmatpush1.bf16.msra.mxu1 %v2880_v15  ;;  %v2938_v41 = vpack.c.bf16 %v167_v38, %v163_v36  ;;  %v2948_v47 = vpack.c.bf16 %v166_v44, %v162_v43  ;;  %v30_v60 = vld [vmem:[%s3448_s0 + $0x18] sm:$0xff]  ;;  %v28_v2 = vld [vmem:[%s3448_s0 + $0x10] sm:$0xff]  ;;  %v32_v44 = vld [vmem:[%s3448_s0 + $0x40] sm:$0xff] }
  0x18   :  { %1975 = vmatprep.subr.bf16.mxu1 %v2886_v18 }
  0x1a   :  { %1945 = vmatpush1.bf16.msra.mxu0 %v2865_v6 }
  0x1b   :  { %1947 = vmatprep.subr.bf16.mxu0 %v2868_v10  ;;  %1977 = vmatpush1.bf16.msra.mxu1 %v2913_v31 }
  0x1c   :  { %1979 = vmatprep.subr.bf16.mxu1 %v2916_v32 }
  0x1e   :  { %1949 = vmatpush1.bf16.msra.mxu0 %v2901_v24 }
  0x1f   :  { %1951 = vmatprep.subr.bf16.mxu0 %v2904_v27  ;;  %1981 = vmatpush1.bf16.msra.mxu1 %v2935_v40 }
  0x20   :  { %1983 = vmatprep.subr.bf16.mxu1 %v2938_v41 }
  0x22   :  { %1953 = vmatpush1.bf16.msra.mxu0 %v2931_v39 }
  0x23   :  { %1987 = vmatprep.subr.bf16.mxu0 %v2671_v3  ;;  %1985 = vmatpush1.bf16.msra.mxu1 %v2948_v47 }
  0x24   :  { %2019 = vmatprep.subr.bf16.mxu1 %v2725_v22 }
  0x25   :  { %237 = vmatmul.mubr.f32.vlgmr.msra.gmra.mrb[0].mxu0 %v2629_v7 }
  0x26   :  { %1989 = vmatpush1.bf16.msra.mxu0 %v2684_v8  ;;  %411 = vmatprep.mubr.f32.mxu0 %v2629_v7 }
  0x27   :  { %1991 = vmatprep.subr.bf16.mxu0 %v2686_v9  ;;  %308 = vmatmul.mubr.f32.vlgmr.msra.gmra.mrb[0].mxu1 %v2629_v7 }
  0x28   :  { %2021 = vmatpush1.bf16.msra.mxu1 %v2733_v25  ;;  %482 = vmatprep.mubr.f32.mxu1 %v2629_v7 }
  0x29   :  { %2023 = vmatprep.subr.bf16.mxu1 %v2758_v33 }
  0x2a   :  { %1993 = vmatpush1.bf16.msra.mxu0 %v2702_v14 }
  0x2b   :  { %1995 = vmatprep.subr.bf16.mxu0 %v2711_v17 }
  0x2c   :  { %2025 = vmatpush1.bf16.msra.mxu1 %v2769_v37 }
  0x2d   :  { %2027 = vmatprep.subr.bf16.mxu1 %v2793_v45 }
  0x2e   :  { %1997 = vmatpush1.bf16.msra.mxu0 %v2736_v26 }
  0x2f   :  { %1999 = vmatprep.subr.bf16.mxu0 %v2749_v30 }
  0x30   :  { %2029 = vmatpush1.bf16.msra.mxu1 %v2802_v48 }
  0x31   :  { %2031 = vmatprep.subr.bf16.mxu1 %v2814_v52 }
  0x32   :  { %2001 = vmatpush1.bf16.msra.mxu0 %v2785_v42 }
  0x33   :  { %2003 = vmatprep.subr.bf16.mxu0 %v2796_v46 }
  0x34   :  { %2033 = vmatpush1.bf16.msra.mxu1 %v2844_v62 }
  0x35   :  { %2035 = vmatprep.subr.bf16.mxu1 %v2850_v0 }
  0x36   :  { %2005 = vmatpush1.bf16.msra.mxu0 %v2823_v55 }
  0x37   :  { %2007 = vmatprep.subr.bf16.mxu0 %v2832_v58 }
  0x38   :  { %2037 = vmatpush1.bf16.msra.mxu1 %v2880_v15 }
  0x39   :  { %2039 = vmatprep.subr.bf16.mxu1 %v2886_v18 }
  0x3a   :  { %2009 = vmatpush1.bf16.msra.mxu0 %v2865_v6 }
  0x3b   :  { %2011 = vmatprep.subr.bf16.mxu0 %v2868_v10 }
  0x3c   :  { %2041 = vmatpush1.bf16.msra.mxu1 %v2913_v31 }
  0x3d   :  { %2043 = vmatprep.subr.bf16.mxu1 %v2916_v32 }
  0x3e   :  { %2013 = vmatpush1.bf16.msra.mxu0 %v2901_v24 }
  0x3f   :  { %2015 = vmatprep.subr.bf16.mxu0 %v2904_v27 }
  0x40   :  { %2045 = vmatpush1.bf16.msra.mxu1 %v2935_v40 }
  0x41   :  { %2047 = vmatprep.subr.bf16.mxu1 %v2938_v41 }
  0x42   :  { %2017 = vmatpush1.bf16.msra.mxu0 %v2931_v39 }
  0x43   :  { %2051 = vmatprep.subr.bf16.mxu0 %v2671_v3 }
  0x44   :  { %2049 = vmatpush1.bf16.msra.mxu1 %v2948_v47 }
  0x45   :  { %2083 = vmatprep.subr.bf16.mxu1 %v2725_v22 }
  0xf8   :  { %v238_v51 = vpop.f32.mrb[0].mxu0 }
  0xf9   :  { %v314_v53 = vadd.f32 %v238_v51, %v24_v49  ;;  %v240_v54 = vpop.f32.mrb[1].mxu0  ;;  %v34_v49 = vld [vmem:[%s3448_s0 + $0x48] sm:$0xff] }
  0xfa   :  { %v315_v56 = vadd.f32 %v240_v54, %v26_v50  ;;  %v309_v61 = vpop.f32.mrb[0].mxu1 }
  0xfb   :  { %v1788_v57 = vmul.f32 -1.442695, %v314_v53  ;;  %v311_v63 = vpop.f32.mrb[1].mxu1  ;;  %v316_v5 = vadd.f32 %v309_v61, %v28_v2  ;;  %v38_v61 = vld [vmem:[%s3448_s0 + $0x58] sm:$0xff] }
  0xfc   :  { %v1789_v59 = vmul.f32 -1.442695, %v315_v56  ;;  %v317_v1 = vadd.f32 %v311_v63, %v30_v60 }
  0xfd   :  { %2485 = vpow2.f32 %v1788_v57 }
  0xfe   :  { %2487 = vpow2.f32 %v1789_v59  ;;  %v1790_v4 = vmul.f32 -1.442695, %v317_v1  ;;  %v36_v1 = vld [vmem:[%s3448_s0 + $0x50] sm:$0xff] }
 0x100   :  { %2489 = vpow2.f32 %v1790_v4 }
 0x101   :  { %2491 = vtanh.f32 %v316_v5 }
 0x107   :  { %v2486_v11 = vpop.eup %2485 }
 0x108   :  { %v2488_v12 = vpop.eup %2487  ;;  %v321_v13 = vadd.f32 1.0, %v2486_v11 }
 0x109   :  { %v327_v16 = vadd.f32 1.0, %v2488_v12 }
 0x10a   :  { %2493 = vrcp.f32 %v321_v13  ;;  %v2490_v19 = vpop.eup %2489 }
 0x10b   :  { %2495 = vrcp.f32 %v327_v16  ;;  %v2492_v20 = vpop.eup %2491  ;;  %v334_v23 = vadd.f32 1.0, %v2490_v19 }
 0x10d   :  { %2497 = vrcp.f32 %v334_v23 }
 0x114   :  { %v2494_v21 = vpop.eup %2493 }
 0x115   :  { %v2496_v28 = vpop.eup %2495  ;;  %v338_v29 = vmul.f32 %v2494_v21, %v2492_v20 }
 0x116   :  { %v337_v34 = vmul.f32 0.0, %v2496_v28 }
 0x117   :  { %v2498_v36 = vpop.eup %2497 }
 0x118   :  { %v3002_v35 = vadd.f32 %v338_v29, %v337_v34 }
 0x11a   :  { %2499 = vtanh.f32 %v3002_v35 }
 0x124   :  { %v2500_v38 = vpop.eup %2499 }
 0x125   :  { %v341_v43 = vmul.f32 %v2500_v38, %v2498_v36 }
 0x127   :  { %412 = vmatmul.mubr.f32.vlgmr.msra.gmra.mrb[2].mxu0 %v341_v43  ;;  %483 = vmatmul.mubr.f32.vlgmr.msra.gmra.mrb[2].mxu1 %v341_v43 }
 0x128   :  { %2053 = vmatpush1.bf16.msra.mxu0 %v2684_v8  ;;  %2085 = vmatpush1.bf16.msra.mxu1 %v2733_v25 }
 0x129   :  { %2055 = vmatprep.subr.bf16.mxu0 %v2686_v9  ;;  %2087 = vmatprep.subr.bf16.mxu1 %v2758_v33 }
 0x12a   :  { %586 = vmatprep.mubr.f32.mxu0 %v2629_v7  ;;  %657 = vmatprep.mubr.f32.mxu1 %v2629_v7 }
 0x12c   :  { %2057 = vmatpush1.bf16.msra.mxu0 %v2702_v14  ;;  %2089 = vmatpush1.bf16.msra.mxu1 %v2769_v37 }
 0x12d   :  { %2059 = vmatprep.subr.bf16.mxu0 %v2711_v17  ;;  %2091 = vmatprep.subr.bf16.mxu1 %v2793_v45 }
 0x130   :  { %2061 = vmatpush1.bf16.msra.mxu0 %v2736_v26  ;;  %2093 = vmatpush1.bf16.msra.mxu1 %v2802_v48 }
 0x131   :  { %2063 = vmatprep.subr.bf16.mxu0 %v2749_v30  ;;  %2095 = vmatprep.subr.bf16.mxu1 %v2814_v52 }
 0x134   :  { %2065 = vmatpush1.bf16.msra.mxu0 %v2785_v42  ;;  %2097 = vmatpush1.bf16.msra.mxu1 %v2844_v62 }
 0x135   :  { %2067 = vmatprep.subr.bf16.mxu0 %v2796_v46  ;;  %2099 = vmatprep.subr.bf16.mxu1 %v2850_v0 }
 0x138   :  { %2069 = vmatpush1.bf16.msra.mxu0 %v2823_v55  ;;  %2101 = vmatpush1.bf16.msra.mxu1 %v2880_v15 }
 0x139   :  { %2071 = vmatprep.subr.bf16.mxu0 %v2832_v58  ;;  %2103 = vmatprep.subr.bf16.mxu1 %v2886_v18 }
 0x13c   :  { %2073 = vmatpush1.bf16.msra.mxu0 %v2865_v6  ;;  %2105 = vmatpush1.bf16.msra.mxu1 %v2913_v31 }
 0x13d   :  { %2075 = vmatprep.subr.bf16.mxu0 %v2868_v10  ;;  %2107 = vmatprep.subr.bf16.mxu1 %v2916_v32 }
 0x140   :  { %2077 = vmatpush1.bf16.msra.mxu0 %v2901_v24  ;;  %2109 = vmatpush1.bf16.msra.mxu1 %v2935_v40 }
 0x141   :  { %2079 = vmatprep.subr.bf16.mxu0 %v2904_v27  ;;  %2111 = vmatprep.subr.bf16.mxu1 %v2938_v41 }
 0x144   :  { %2081 = vmatpush1.bf16.msra.mxu0 %v2931_v39  ;;  %2113 = vmatpush1.bf16.msra.mxu1 %v2948_v47 }
 0x145   :  { %2115 = vmatprep.subr.bf16.mxu0 %v2671_v3  ;;  %2147 = vmatprep.subr.bf16.mxu1 %v2725_v22 }
 0x1fa   :  { %v413_v50 = vpop.f32.mrb[2].mxu0  ;;  %v484_v51 = vpop.f32.mrb[2].mxu1 }
 0x1fb   :  { %v489_v53 = vadd.f32 %v413_v50, %v32_v44  ;;  %v415_v54 = vpop.f32.mrb[3].mxu0  ;;  %v486_v56 = vpop.f32.mrb[3].mxu1  ;;  %v491_v4 = vadd.f32 %v484_v51, %v36_v1  ;;  %v42_v44 = vld [vmem:[%s3448_s0 + $0x88] sm:$0xff] }
 0x1fc   :  { %v490_v57 = vadd.f32 %v415_v54, %v34_v49  ;;  %v492_v63 = vadd.f32 %v486_v56, %v38_v61 }
 0x1fd   :  { %v1791_v59 = vmul.f32 -1.442695, %v489_v53 }
 0x1fe   :  { %v1792_v60 = vmul.f32 -1.442695, %v490_v57  ;;  %v1793_v2 = vmul.f32 -1.442695, %v492_v63  ;;  %v44_v63 = vld [vmem:[%s3448_s0 + $0x90] sm:$0xff] }
 0x1ff   :  { %2501 = vpow2.f32 %v1791_v59 }
 0x200   :  { %2503 = vpow2.f32 %v1792_v60  ;;  %v46_v60 = vld [vmem:[%s3448_s0 + $0x98] sm:$0xff] }
 0x201   :  { %2505 = vpow2.f32 %v1793_v2 }
 0x202   :  { %2507 = vtanh.f32 %v491_v4 }
 0x209   :  { %v2502_v5 = vpop.eup %2501 }
 0x20a   :  { %v2504_v11 = vpop.eup %2503  ;;  %v496_v12 = vadd.f32 1.0, %v2502_v5 }
 0x20b   :  { %v502_v13 = vadd.f32 1.0, %v2504_v11  ;;  %v2506_v16 = vpop.eup %2505 }
 0x20c   :  { %2509 = vrcp.f32 %v496_v12  ;;  %v2508_v19 = vpop.eup %2507  ;;  %v509_v28 = vadd.f32 1.0, %v2506_v16 }
 0x20d   :  { %2511 = vrcp.f32 %v502_v13 }
 0x20e   :  { %2513 = vrcp.f32 %v509_v28 }
 0x216   :  { %v2510_v20 = vpop.eup %2509 }
 0x217   :  { %v2512_v21 = vpop.eup %2511  ;;  %v513_v23 = vmul.f32 %v2510_v20, %v2508_v19 }
 0x218   :  { %v512_v29 = vmul.f32 %v2512_v21, %v3002_v35  ;;  %v2514_v36 = vpop.eup %2513  ;;  %v40_v35 = vld [vmem:[%s3448_s0 + $0x80] sm:$0xff] }
 0x21a   :  { %v3052_v34 = vadd.f32 %v513_v23, %v512_v29 }
 0x21c   :  { %2515 = vtanh.f32 %v3052_v34 }
 0x226   :  { %v2516_v38 = vpop.eup %2515 }
 0x227   :  { %v516_v43 = vmul.f32 %v2516_v38, %v2514_v36 }
 0x229   :  { %587 = vmatmul.mubr.f32.vlgmr.msra.gmra.mrb[4].mxu0 %v516_v43  ;;  %658 = vmatmul.mubr.f32.vlgmr.msra.gmra.mrb[4].mxu1 %v516_v43 }
 0x22a   :  { %2117 = vmatpush1.bf16.msra.mxu0 %v2684_v8  ;;  %2149 = vmatpush1.bf16.msra.mxu1 %v2733_v25 }
 0x22b   :  { %2119 = vmatprep.subr.bf16.mxu0 %v2686_v9  ;;  %2151 = vmatprep.subr.bf16.mxu1 %v2758_v33 }
 0x22c   :  { %761 = vmatprep.mubr.f32.mxu0 %v2629_v7  ;;  %832 = vmatprep.mubr.f32.mxu1 %v2629_v7 }
 0x22e   :  { %2121 = vmatpush1.bf16.msra.mxu0 %v2702_v14  ;;  %2153 = vmatpush1.bf16.msra.mxu1 %v2769_v37 }
 0x22f   :  { %2123 = vmatprep.subr.bf16.mxu0 %v2711_v17  ;;  %2155 = vmatprep.subr.bf16.mxu1 %v2793_v45 }
 0x232   :  { %2125 = vmatpush1.bf16.msra.mxu0 %v2736_v26  ;;  %2157 = vmatpush1.bf16.msra.mxu1 %v2802_v48 }
 0x233   :  { %2127 = vmatprep.subr.bf16.mxu0 %v2749_v30  ;;  %2159 = vmatprep.subr.bf16.mxu1 %v2814_v52 }
 0x236   :  { %2129 = vmatpush1.bf16.msra.mxu0 %v2785_v42  ;;  %2161 = vmatpush1.bf16.msra.mxu1 %v2844_v62 }
 0x237   :  { %2131 = vmatprep.subr.bf16.mxu0 %v2796_v46  ;;  %2163 = vmatprep.subr.bf16.mxu1 %v2850_v0 }
 0x23a   :  { %2133 = vmatpush1.bf16.msra.mxu0 %v2823_v55  ;;  %2165 = vmatpush1.bf16.msra.mxu1 %v2880_v15 }
 0x23b   :  { %2135 = vmatprep.subr.bf16.mxu0 %v2832_v58  ;;  %2167 = vmatprep.subr.bf16.mxu1 %v2886_v18 }
 0x23e   :  { %2137 = vmatpush1.bf16.msra.mxu0 %v2865_v6  ;;  %2169 = vmatpush1.bf16.msra.mxu1 %v2913_v31 }
 0x23f   :  { %2139 = vmatprep.subr.bf16.mxu0 %v2868_v10  ;;  %2171 = vmatprep.subr.bf16.mxu1 %v2916_v32 }
 0x242   :  { %2141 = vmatpush1.bf16.msra.mxu0 %v2901_v24  ;;  %2173 = vmatpush1.bf16.msra.mxu1 %v2935_v40 }
 0x243   :  { %2143 = vmatprep.subr.bf16.mxu0 %v2904_v27  ;;  %2175 = vmatprep.subr.bf16.mxu1 %v2938_v41 }
 0x246   :  { %2145 = vmatpush1.bf16.msra.mxu0 %v2931_v39  ;;  %2177 = vmatpush1.bf16.msra.mxu1 %v2948_v47 }
 0x247   :  { %2179 = vmatprep.subr.bf16.mxu0 %v2671_v3  ;;  %2211 = vmatprep.subr.bf16.mxu1 %v2725_v22 }
 0x2fc   :  { %v588_v49 = vpop.f32.mrb[4].mxu0  ;;  %v659_v50 = vpop.f32.mrb[4].mxu1 }
 0x2fd   :  { %v664_v51 = vadd.f32 %v588_v49, %v40_v35  ;;  %v590_v53 = vpop.f32.mrb[5].mxu0  ;;  %v661_v54 = vpop.f32.mrb[5].mxu1  ;;  %v666_v2 = vadd.f32 %v659_v50, %v44_v63  ;;  %v50_v35 = vld [vmem:[%s3448_s0 + $0xc8] sm:$0xff] }
 0x2fe   :  { %v665_v56 = vadd.f32 %v590_v53, %v42_v44  ;;  %v667_v61 = vadd.f32 %v661_v54, %v46_v60 }
 0x2ff   :  { %v1794_v57 = vmul.f32 -1.442695, %v664_v51 }
 0x300   :  { %v1795_v59 = vmul.f32 -1.442695, %v665_v56  ;;  %v1796_v1 = vmul.f32 -1.442695, %v667_v61  ;;  %v52_v61 = vld [vmem:[%s3448_s0 + $0xd0] sm:$0xff] }
 0x301   :  { %2517 = vpow2.f32 %v1794_v57 }
 0x302   :  { %2519 = vpow2.f32 %v1795_v59  ;;  %v54_v59 = vld [vmem:[%s3448_s0 + $0xd8] sm:$0xff] }
 0x303   :  { %2521 = vpow2.f32 %v1796_v1 }
 0x304   :  { %2523 = vtanh.f32 %v666_v2 }
 0x30b   :  { %v2518_v4 = vpop.eup %2517 }
 0x30c   :  { %v2520_v5 = vpop.eup %2519  ;;  %v671_v11 = vadd.f32 1.0, %v2518_v4 }
 0x30d   :  { %v677_v12 = vadd.f32 1.0, %v2520_v5  ;;  %v2522_v13 = vpop.eup %2521 }
 0x30e   :  { %2525 = vrcp.f32 %v671_v11  ;;  %v2524_v16 = vpop.eup %2523  ;;  %v684_v23 = vadd.f32 1.0, %v2522_v13 }
 0x30f   :  { %2527 = vrcp.f32 %v677_v12 }
 0x310   :  { %2529 = vrcp.f32 %v684_v23 }
 0x318   :  { %v2526_v19 = vpop.eup %2525 }
 0x319   :  { %v2528_v20 = vpop.eup %2527  ;;  %v688_v21 = vmul.f32 %v2526_v19, %v2524_v16 }
 0x31a   :  { %v687_v28 = vmul.f32 %v2528_v20, %v3052_v34  ;;  %v2530_v36 = vpop.eup %2529  ;;  %v48_v34 = vld [vmem:[%s3448_s0 + $0xc0] sm:$0xff] }
 0x31c   :  { %v3102_v29 = vadd.f32 %v688_v21, %v687_v28 }
 0x31e   :  { %2531 = vtanh.f32 %v3102_v29 }
 0x328   :  { %v2532_v38 = vpop.eup %2531 }
 0x329   :  { %v691_v43 = vmul.f32 %v2532_v38, %v2530_v36 }
 0x32b   :  { %762 = vmatmul.mubr.f32.vlgmr.msra.gmra.mrb[6].mxu0 %v691_v43  ;;  %833 = vmatmul.mubr.f32.vlgmr.msra.gmra.mrb[6].mxu1 %v691_v43 }
 0x32c   :  { %2181 = vmatpush1.bf16.msra.mxu0 %v2684_v8  ;;  %2213 = vmatpush1.bf16.msra.mxu1 %v2733_v25 }
 0x32d   :  { %2183 = vmatprep.subr.bf16.mxu0 %v2686_v9  ;;  %2215 = vmatprep.subr.bf16.mxu1 %v2758_v33 }
 0x32e   :  { %936 = vmatprep.mubr.f32.mxu0 %v2629_v7  ;;  %1007 = vmatprep.mubr.f32.mxu1 %v2629_v7 }
 0x330   :  { %2185 = vmatpush1.bf16.msra.mxu0 %v2702_v14  ;;  %2217 = vmatpush1.bf16.msra.mxu1 %v2769_v37 }
 0x331   :  { %2187 = vmatprep.subr.bf16.mxu0 %v2711_v17  ;;  %2219 = vmatprep.subr.bf16.mxu1 %v2793_v45 }
 0x334   :  { %2189 = vmatpush1.bf16.msra.mxu0 %v2736_v26  ;;  %2221 = vmatpush1.bf16.msra.mxu1 %v2802_v48 }
 0x335   :  { %2191 = vmatprep.subr.bf16.mxu0 %v2749_v30  ;;  %2223 = vmatprep.subr.bf16.mxu1 %v2814_v52 }
 0x338   :  { %2193 = vmatpush1.bf16.msra.mxu0 %v2785_v42  ;;  %2225 = vmatpush1.bf16.msra.mxu1 %v2844_v62 }
 0x339   :  { %2195 = vmatprep.subr.bf16.mxu0 %v2796_v46  ;;  %2227 = vmatprep.subr.bf16.mxu1 %v2850_v0 }
 0x33c   :  { %2197 = vmatpush1.bf16.msra.mxu0 %v2823_v55  ;;  %2229 = vmatpush1.bf16.msra.mxu1 %v2880_v15 }
 0x33d   :  { %2199 = vmatprep.subr.bf16.mxu0 %v2832_v58  ;;  %2231 = vmatprep.subr.bf16.mxu1 %v2886_v18 }
 0x340   :  { %2201 = vmatpush1.bf16.msra.mxu0 %v2865_v6  ;;  %2233 = vmatpush1.bf16.msra.mxu1 %v2913_v31 }
 0x341   :  { %2203 = vmatprep.subr.bf16.mxu0 %v2868_v10  ;;  %2235 = vmatprep.subr.bf16.mxu1 %v2916_v32 }
 0x344   :  { %2205 = vmatpush1.bf16.msra.mxu0 %v2901_v24  ;;  %2237 = vmatpush1.bf16.msra.mxu1 %v2935_v40 }
 0x345   :  { %2207 = vmatprep.subr.bf16.mxu0 %v2904_v27  ;;  %2239 = vmatprep.subr.bf16.mxu1 %v2938_v41 }
 0x348   :  { %2209 = vmatpush1.bf16.msra.mxu0 %v2931_v39  ;;  %2241 = vmatpush1.bf16.msra.mxu1 %v2948_v47 }
 0x349   :  { %2243 = vmatprep.subr.bf16.mxu0 %v2671_v3  ;;  %2275 = vmatprep.subr.bf16.mxu1 %v2725_v22 }
 0x3fe   :  { %v763_v44 = vpop.f32.mrb[6].mxu0  ;;  %v834_v49 = vpop.f32.mrb[6].mxu1 }
 0x3ff   :  { %v839_v50 = vadd.f32 %v763_v44, %v48_v34  ;;  %v765_v51 = vpop.f32.mrb[7].mxu0  ;;  %v836_v53 = vpop.f32.mrb[7].mxu1  ;;  %v841_v1 = vadd.f32 %v834_v49, %v52_v61  ;;  %v58_v34 = vld [vmem:[%s3448_s0 + $0x108] sm:$0xff] }
 0x400   :  { %v840_v54 = vadd.f32 %v765_v51, %v50_v35  ;;  %v842_v60 = vadd.f32 %v836_v53, %v54_v59 }
 0x401   :  { %v1797_v56 = vmul.f32 -1.442695, %v839_v50 }
 0x402   :  { %v1798_v57 = vmul.f32 -1.442695, %v840_v54  ;;  %v1799_v63 = vmul.f32 -1.442695, %v842_v60  ;;  %v60_v60 = vld [vmem:[%s3448_s0 + $0x110] sm:$0xff] }
 0x403   :  { %2533 = vpow2.f32 %v1797_v56 }
 0x404   :  { %2535 = vpow2.f32 %v1798_v57  ;;  %v62_v57 = vld [vmem:[%s3448_s0 + $0x118] sm:$0xff] }
 0x405   :  { %2537 = vpow2.f32 %v1799_v63 }
 0x406   :  { %2539 = vtanh.f32 %v841_v1 }
 0x40d   :  { %v2534_v2 = vpop.eup %2533 }
 0x40e   :  { %v2536_v4 = vpop.eup %2535  ;;  %v846_v5 = vadd.f32 1.0, %v2534_v2 }
 0x40f   :  { %v852_v11 = vadd.f32 1.0, %v2536_v4  ;;  %v2538_v12 = vpop.eup %2537 }
 0x410   :  { %2541 = vrcp.f32 %v846_v5  ;;  %v2540_v13 = vpop.eup %2539  ;;  %v859_v21 = vadd.f32 1.0, %v2538_v12 }
 0x411   :  { %2543 = vrcp.f32 %v852_v11 }
 0x412   :  { %2545 = vrcp.f32 %v859_v21 }
 0x41a   :  { %v2542_v16 = vpop.eup %2541 }
 0x41b   :  { %v2544_v19 = vpop.eup %2543  ;;  %v863_v20 = vmul.f32 %v2542_v16, %v2540_v13 }
 0x41c   :  { %v862_v23 = vmul.f32 %v2544_v19, %v3102_v29  ;;  %v2546_v36 = vpop.eup %2545  ;;  %v56_v29 = vld [vmem:[%s3448_s0 + $0x100] sm:$0xff] }
 0x41e   :  { %v3152_v28 = vadd.f32 %v863_v20, %v862_v23 }
 0x420   :  { %2547 = vtanh.f32 %v3152_v28 }
 0x42a   :  { %v2548_v38 = vpop.eup %2547 }
 0x42b   :  { %v866_v43 = vmul.f32 %v2548_v38, %v2546_v36 }
 0x42d   :  { %937 = vmatmul.mubr.f32.vlgmr.msra.gmra.mrb[8].mxu0 %v866_v43  ;;  %1008 = vmatmul.mubr.f32.vlgmr.msra.gmra.mrb[8].mxu1 %v866_v43 }
 0x42e   :  { %2245 = vmatpush1.bf16.msra.mxu0 %v2684_v8  ;;  %2277 = vmatpush1.bf16.msra.mxu1 %v2733_v25 }
 0x42f   :  { %2247 = vmatprep.subr.bf16.mxu0 %v2686_v9  ;;  %2279 = vmatprep.subr.bf16.mxu1 %v2758_v33 }
 0x430   :  { %1111 = vmatprep.mubr.f32.mxu0 %v2629_v7  ;;  %1182 = vmatprep.mubr.f32.mxu1 %v2629_v7 }
 0x432   :  { %2249 = vmatpush1.bf16.msra.mxu0 %v2702_v14  ;;  %2281 = vmatpush1.bf16.msra.mxu1 %v2769_v37 }
 0x433   :  { %2251 = vmatprep.subr.bf16.mxu0 %v2711_v17  ;;  %2283 = vmatprep.subr.bf16.mxu1 %v2793_v45 }
 0x436   :  { %2253 = vmatpush1.bf16.msra.mxu0 %v2736_v26  ;;  %2285 = vmatpush1.bf16.msra.mxu1 %v2802_v48 }
 0x437   :  { %2255 = vmatprep.subr.bf16.mxu0 %v2749_v30  ;;  %2287 = vmatprep.subr.bf16.mxu1 %v2814_v52 }
 0x43a   :  { %2257 = vmatpush1.bf16.msra.mxu0 %v2785_v42  ;;  %2289 = vmatpush1.bf16.msra.mxu1 %v2844_v62 }
 0x43b   :  { %2259 = vmatprep.subr.bf16.mxu0 %v2796_v46  ;;  %2291 = vmatprep.subr.bf16.mxu1 %v2850_v0 }
 0x43e   :  { %2261 = vmatpush1.bf16.msra.mxu0 %v2823_v55  ;;  %2293 = vmatpush1.bf16.msra.mxu1 %v2880_v15 }
 0x43f   :  { %2263 = vmatprep.subr.bf16.mxu0 %v2832_v58  ;;  %2295 = vmatprep.subr.bf16.mxu1 %v2886_v18 }
 0x442   :  { %2265 = vmatpush1.bf16.msra.mxu0 %v2865_v6  ;;  %2297 = vmatpush1.bf16.msra.mxu1 %v2913_v31 }
 0x443   :  { %2267 = vmatprep.subr.bf16.mxu0 %v2868_v10  ;;  %2299 = vmatprep.subr.bf16.mxu1 %v2916_v32 }
 0x446   :  { %2269 = vmatpush1.bf16.msra.mxu0 %v2901_v24  ;;  %2301 = vmatpush1.bf16.msra.mxu1 %v2935_v40 }
 0x447   :  { %2271 = vmatprep.subr.bf16.mxu0 %v2904_v27  ;;  %2303 = vmatprep.subr.bf16.mxu1 %v2938_v41 }
 0x44a   :  { %2273 = vmatpush1.bf16.msra.mxu0 %v2931_v39  ;;  %2305 = vmatpush1.bf16.msra.mxu1 %v2948_v47 }
 0x44b   :  { %2307 = vmatprep.subr.bf16.mxu0 %v2671_v3  ;;  %2339 = vmatprep.subr.bf16.mxu1 %v2725_v22 }
 0x500   :  { %v938_v35 = vpop.f32.mrb[8].mxu0  ;;  %v1009_v44 = vpop.f32.mrb[8].mxu1 }
 0x501   :  { %v1014_v49 = vadd.f32 %v938_v35, %v56_v29  ;;  %v940_v50 = vpop.f32.mrb[9].mxu0  ;;  %v1011_v51 = vpop.f32.mrb[9].mxu1  ;;  %v1016_v63 = vadd.f32 %v1009_v44, %v60_v60  ;;  %v66_v29 = vld [vmem:[%s3448_s0 + $0x148] sm:$0xff] }
 0x502   :  { %v1015_v53 = vadd.f32 %v940_v50, %v58_v34  ;;  %v1017_v59 = vadd.f32 %v1011_v51, %v62_v57 }
 0x503   :  { %v1800_v54 = vmul.f32 -1.442695, %v1014_v49 }
 0x504   :  { %v1801_v56 = vmul.f32 -1.442695, %v1015_v53  ;;  %v1802_v61 = vmul.f32 -1.442695, %v1017_v59 }
 0x505   :  { %2549 = vpow2.f32 %v1800_v54 }
 0x506   :  { %2551 = vpow2.f32 %v1801_v56  ;;  %v68_v56 = vld [vmem:[%s3448_s0 + $0x150] sm:$0xff] }
 0x507   :  { %2553 = vpow2.f32 %v1802_v61 }
 0x508   :  { %2555 = vtanh.f32 %v1016_v63 }
 0x50f   :  { %v2550_v1 = vpop.eup %2549 }
 0x510   :  { %v2552_v2 = vpop.eup %2551  ;;  %v1021_v4 = vadd.f32 1.0, %v2550_v1 }
 0x511   :  { %v1027_v5 = vadd.f32 1.0, %v2552_v2  ;;  %v2554_v11 = vpop.eup %2553 }
 0x512   :  { %2557 = vrcp.f32 %v1021_v4  ;;  %v2556_v12 = vpop.eup %2555  ;;  %v1034_v20 = vadd.f32 1.0, %v2554_v11 }
 0x513   :  { %2559 = vrcp.f32 %v1027_v5 }
 0x514   :  { %2561 = vrcp.f32 %v1034_v20 }
 0x51c   :  { %v2558_v13 = vpop.eup %2557 }
 0x51d   :  { %v2560_v16 = vpop.eup %2559  ;;  %v1038_v19 = vmul.f32 %v2558_v13, %v2556_v12 }
 0x51e   :  { %v1037_v21 = vmul.f32 %v2560_v16, %v3152_v28  ;;  %v2562_v36 = vpop.eup %2561  ;;  %v64_v28 = vld [vmem:[%s3448_s0 + $0x140] sm:$0xff] }
 0x520   :  { %v3202_v23 = vadd.f32 %v1038_v19, %v1037_v21 }
 0x522   :  { %2563 = vtanh.f32 %v3202_v23 }
 0x52c   :  { %v2564_v38 = vpop.eup %2563 }
 0x52d   :  { %v1041_v43 = vmul.f32 %v2564_v38, %v2562_v36 }
 0x52f   :  { %1112 = vmatmul.mubr.f32.vlgmr.msra.gmra.mrb[10].mxu0 %v1041_v43  ;;  %1183 = vmatmul.mubr.f32.vlgmr.msra.gmra.mrb[10].mxu1 %v1041_v43  ;;  %v1602_v43 = vld [vmem:[%s3451_s3 + $0x80] sm:$0xff] }
 0x530   :  { %2309 = vmatpush1.bf16.msra.mxu0 %v2684_v8  ;;  %2341 = vmatpush1.bf16.msra.mxu1 %v2733_v25 }
 0x531   :  { %2311 = vmatprep.subr.bf16.mxu0 %v2686_v9  ;;  %2343 = vmatprep.subr.bf16.mxu1 %v2758_v33 }
 0x532   :  { %1286 = vmatprep.mubr.f32.mxu0 %v2629_v7  ;;  %1357 = vmatprep.mubr.f32.mxu1 %v2629_v7 }
 0x534   :  { %2313 = vmatpush1.bf16.msra.mxu0 %v2702_v14  ;;  %2345 = vmatpush1.bf16.msra.mxu1 %v2769_v37 }
 0x535   :  { %2315 = vmatprep.subr.bf16.mxu0 %v2711_v17  ;;  %2347 = vmatprep.subr.bf16.mxu1 %v2793_v45 }
 0x538   :  { %2317 = vmatpush1.bf16.msra.mxu0 %v2736_v26  ;;  %2349 = vmatpush1.bf16.msra.mxu1 %v2802_v48 }
 0x539   :  { %2319 = vmatprep.subr.bf16.mxu0 %v2749_v30  ;;  %2351 = vmatprep.subr.bf16.mxu1 %v2814_v52 }
 0x53c   :  { %2321 = vmatpush1.bf16.msra.mxu0 %v2785_v42  ;;  %2353 = vmatpush1.bf16.msra.mxu1 %v2844_v62 }
 0x53d   :  { %2323 = vmatprep.subr.bf16.mxu0 %v2796_v46  ;;  %2355 = vmatprep.subr.bf16.mxu1 %v2850_v0 }
 0x540   :  { %2325 = vmatpush1.bf16.msra.mxu0 %v2823_v55  ;;  %2357 = vmatpush1.bf16.msra.mxu1 %v2880_v15 }
 0x541   :  { %2327 = vmatprep.subr.bf16.mxu0 %v2832_v58  ;;  %2359 = vmatprep.subr.bf16.mxu1 %v2886_v18 }
 0x544   :  { %2329 = vmatpush1.bf16.msra.mxu0 %v2865_v6  ;;  %2361 = vmatpush1.bf16.msra.mxu1 %v2913_v31 }
 0x545   :  { %2331 = vmatprep.subr.bf16.mxu0 %v2868_v10  ;;  %2363 = vmatprep.subr.bf16.mxu1 %v2916_v32 }
 0x548   :  { %2333 = vmatpush1.bf16.msra.mxu0 %v2901_v24  ;;  %2365 = vmatpush1.bf16.msra.mxu1 %v2935_v40 }
 0x549   :  { %2335 = vmatprep.subr.bf16.mxu0 %v2904_v27  ;;  %2367 = vmatprep.subr.bf16.mxu1 %v2938_v41 }
 0x54c   :  { %2337 = vmatpush1.bf16.msra.mxu0 %v2931_v39  ;;  %2369 = vmatpush1.bf16.msra.mxu1 %v2948_v47 }
 0x54d   :  { %2371 = vmatprep.subr.bf16.mxu0 %v2671_v3  ;;  %2403 = vmatprep.subr.bf16.mxu1 %v2725_v22  ;;  %v70_v3 = vld [vmem:[%s3448_s0 + $0x158] sm:$0xff] }
 0x602   :  { %v1113_v34 = vpop.f32.mrb[10].mxu0  ;;  %v1184_v35 = vpop.f32.mrb[10].mxu1 }
 0x603   :  { %v1189_v44 = vadd.f32 %v1113_v34, %v64_v28  ;;  %v1115_v49 = vpop.f32.mrb[11].mxu0  ;;  %v1186_v50 = vpop.f32.mrb[11].mxu1  ;;  %v1191_v59 = vadd.f32 %v1184_v35, %v68_v56  ;;  %v1603_v28 = vld [vmem:[%s3451_s3 + $0x88] sm:$0xff]  ;;  %v1586_v34 = vld [vmem:[%s3451_s3] sm:$0xff]  ;;  %v1814_v56 = vld [vmem:[%s3449_s1 + $0x1f8] sm:$0xff] }
 0x604   :  { %v1190_v51 = vadd.f32 %v1115_v49, %v66_v29  ;;  %v1192_v22 = vadd.f32 %v1186_v50, %v70_v3  ;;  %v2435_v29 = vpack.c.bf16 %v1603_v28, %v1602_v43  ;;  %v1587_v35 = vld [vmem:[%s3451_s3 + $0x8] sm:$0xff]  ;;  %v1604_v50 = vld [vmem:[%s3451_s3 + $0x90] sm:$0xff] }
 0x605   :  { %v1803_v53 = vmul.f32 -1.442695, %v1189_v44  ;;  %v2630_v44 = vmov 0.0|0.0   ;;  %v2459_v49 = vpack.c.bf16 %v1587_v35, %v1586_v34  ;;  %v1588_v3 = vld [vmem:[%s3451_s3 + $0x10] sm:$0xff]  ;;  %v82_v43 = vld [vmem:[%s3448_s0 + $0x1c8] sm:$0xff] }
 0x606   :  { %v1804_v54 = vmul.f32 -1.442695, %v1190_v51  ;;  %v1805_v57 = vmul.f32 -1.442695, %v1192_v22  ;;  %v1605_v51 = vld [vmem:[%s3451_s3 + $0x98] sm:$0xff] }
 0x607   :  { %2565 = vpow2.f32 %v1803_v53  ;;  %v1589_v22 = vld [vmem:[%s3451_s3 + $0x18] sm:$0xff] }
 0x608   :  { %2567 = vpow2.f32 %v1804_v54  ;;  %v2438_v54 = vpack.c.bf16 %v1605_v51, %v1604_v50 }
 0x609   :  { %2569 = vpow2.f32 %v1805_v57  ;;  %v2462_v57 = vpack.c.bf16 %v1589_v22, %v1588_v3  ;;  %v84_v3 = vld [vmem:[%s3448_s0 + $0x1d0] sm:$0xff] }
 0x60a   :  { %2571 = vtanh.f32 %v1191_v59 }
 0x611   :  { %v2566_v60 = vpop.eup %2565 }
 0x612   :  { %v2568_v61 = vpop.eup %2567  ;;  %v1196_v63 = vadd.f32 1.0, %v2566_v60  ;;  %v1816_v60 = vmul.f32 -1.442695, %v1814_v56 }
 0x613   :  { %v1202_v1 = vadd.f32 1.0, %v2568_v61  ;;  %v2570_v2 = vpop.eup %2569  ;;  %v1813_v61 = vld [vmem:[%s3449_s1 + $0x1f0] sm:$0xff] }
 0x614   :  { %2573 = vrcp.f32 %v1196_v63  ;;  %v2572_v4 = vpop.eup %2571  ;;  %v1209_v13 = vadd.f32 1.0, %v2570_v2  ;;  %v1606_v63 = vld [vmem:[%s3451_s3 + $0xa0] sm:$0xff] }
 0x615   :  { %2575 = vrcp.f32 %v1202_v1  ;;  %v1607_v1 = vld [vmem:[%s3451_s3 + $0xa8] sm:$0xff] }
 0x616   :  { %2577 = vrcp.f32 %v1209_v13  ;;  %v2441_v2 = vpack.c.bf16 %v1607_v1, %v1606_v63  ;;  %v1609_v13 = vld [vmem:[%s3451_s3 + $0xb8] sm:$0xff] }
 0x61e   :  { %v2574_v5 = vpop.eup %2573 }
 0x61f   :  { %v2576_v11 = vpop.eup %2575  ;;  %v1213_v12 = vmul.f32 %v2574_v5, %v2572_v4  ;;  %v1590_v4 = vld [vmem:[%s3451_s3 + $0x20] sm:$0xff]  ;;  %v1591_v5 = vld [vmem:[%s3451_s3 + $0x28] sm:$0xff] }
 0x620   :  { %v1212_v16 = vmul.f32 %v2576_v11, %v3202_v23  ;;  %v2578_v20 = vpop.eup %2577  ;;  %v1812_v23 = vld [vmem:[%s3449_s1 + $0x1e0] sm:$0xff]  ;;  %v2465_v11 = vpack.c.bf16 %v1591_v5, %v1590_v4 }
 0x621   :  { %v1815_v38 = vmul.f32 -1.442695, %v1812_v23 }
 0x622   :  { %v3252_v19 = vadd.f32 %v1213_v12, %v1212_v16  ;;  %v1608_v12 = vld [vmem:[%s3451_s3 + $0xb0] sm:$0xff] }
 0x623   :  { %v2444_v16 = vpack.c.bf16 %v1609_v13, %v1608_v12 }
 0x624   :  { %2579 = vtanh.f32 %v3252_v19 }
 0x62e   :  { %v2580_v21 = vpop.eup %2579 }
 0x62f   :  { %v1216_v36 = vmul.f32 %v2580_v21, %v2578_v20  ;;  %v1593_v20 = vld [vmem:[%s3451_s3 + $0x38] sm:$0xff] }
 0x631   :  { %1287 = vmatmul.mubr.f32.vlgmr.msra.gmra.mrb[12].mxu0 %v1216_v36  ;;  %1358 = vmatmul.mubr.f32.vlgmr.msra.gmra.mrb[12].mxu1 %v1216_v36  ;;  %v1610_v36 = vld [vmem:[%s3451_s3 + $0xc0] sm:$0xff] }
 0x632   :  { %2373 = vmatpush1.bf16.msra.mxu0 %v2684_v8  ;;  %2405 = vmatpush1.bf16.msra.mxu1 %v2733_v25  ;;  %v72_v8 = vld [vmem:[%s3448_s0 + $0x180] sm:$0xff] }
 0x633   :  { %2375 = vmatprep.subr.bf16.mxu0 %v2686_v9  ;;  %2407 = vmatprep.subr.bf16.mxu1 %v2758_v33  ;;  %v74_v9 = vld [vmem:[%s3448_s0 + $0x188] sm:$0xff] }
 0x634   :  { %1461 = vmatprep.mubr.f32.mxu0 %v2629_v7  ;;  %1532 = vmatprep.mubr.f32.mxu1 %v2629_v7 }
 0x636   :  { %2377 = vmatpush1.bf16.msra.mxu0 %v2702_v14  ;;  %2409 = vmatpush1.bf16.msra.mxu1 %v2769_v37 }
 0x637   :  { %2379 = vmatprep.subr.bf16.mxu0 %v2711_v17  ;;  %2411 = vmatprep.subr.bf16.mxu1 %v2793_v45  ;;  %v78_v45 = vld [vmem:[%s3448_s0 + $0x198] sm:$0xff] }
 0x63a   :  { %2381 = vmatpush1.bf16.msra.mxu0 %v2736_v26  ;;  %2413 = vmatpush1.bf16.msra.mxu1 %v2802_v48  ;;  %v76_v48 = vld [vmem:[%s3448_s0 + $0x190] sm:$0xff] }
 0x63b   :  { %2383 = vmatprep.subr.bf16.mxu0 %v2749_v30  ;;  %2415 = vmatprep.subr.bf16.mxu1 %v2814_v52 }
 0x63e   :  { %2385 = vmatpush1.bf16.msra.mxu0 %v2785_v42  ;;  %2417 = vmatpush1.bf16.msra.mxu1 %v2844_v62 }
 0x63f   :  { %2387 = vmatprep.subr.bf16.mxu0 %v2796_v46  ;;  %2419 = vmatprep.subr.bf16.mxu1 %v2850_v0 }
 0x642   :  { %2389 = vmatpush1.bf16.msra.mxu0 %v2823_v55  ;;  %2421 = vmatpush1.bf16.msra.mxu1 %v2880_v15 }
 0x643   :  { %2391 = vmatprep.subr.bf16.mxu0 %v2832_v58  ;;  %2423 = vmatprep.subr.bf16.mxu1 %v2886_v18 }
 0x646   :  { %2393 = vmatpush1.bf16.msra.mxu0 %v2865_v6  ;;  %2425 = vmatpush1.bf16.msra.mxu1 %v2913_v31 }
 0x647   :  { %2395 = vmatprep.subr.bf16.mxu0 %v2868_v10  ;;  %2427 = vmatprep.subr.bf16.mxu1 %v2916_v32 }
 0x64a   :  { %2397 = vmatpush1.bf16.msra.mxu0 %v2901_v24  ;;  %2429 = vmatpush1.bf16.msra.mxu1 %v2935_v40 }
 0x64b   :  { %2399 = vmatprep.subr.bf16.mxu0 %v2904_v27  ;;  %2431 = vmatprep.subr.bf16.mxu1 %v2938_v41 }
 0x64e   :  { %2401 = vmatpush1.bf16.msra.mxu0 %v2931_v39  ;;  %2433 = vmatpush1.bf16.msra.mxu1 %v2948_v47 }
 0x64f   :  { %2434 = vmatprep.subr.bf16.mxu0 %v2630_v44  ;;  %2458 = vmatprep.subr.bf16.mxu1 %v2630_v44 }
 0x704   :  { %v1288_v14 = vpop.f32.mrb[12].mxu0  ;;  %v1359_v17 = vpop.f32.mrb[12].mxu1 }
 0x705   :  { %v1364_v25 = vadd.f32 %v1288_v14, %v72_v8  ;;  %v1290_v26 = vpop.f32.mrb[13].mxu0  ;;  %v1361_v30 = vpop.f32.mrb[13].mxu1  ;;  %v1366_v55 = vadd.f32 %v1359_v17, %v76_v48  ;;  %v1611_v8 = vld [vmem:[%s3451_s3 + $0xc8] sm:$0xff]  ;;  %v1594_v14 = vld [vmem:[%s3451_s3 + $0x40] sm:$0xff]  ;;  %v1596_v48 = vld [vmem:[%s3451_s3 + $0x50] sm:$0xff] }
 0x706   :  { %v1365_v33 = vadd.f32 %v1290_v26, %v74_v9  ;;  %v1367_v46 = vadd.f32 %v1361_v30, %v78_v45  ;;  %v2447_v9 = vpack.c.bf16 %v1611_v8, %v1610_v36  ;;  %v1595_v17 = vld [vmem:[%s3451_s3 + $0x48] sm:$0xff] }
 0x707   :  { %v1806_v37 = vmul.f32 -1.442695, %v1364_v25  ;;  %v2471_v26 = vpack.c.bf16 %v1595_v17, %v1594_v14 }
 0x708   :  { %v1807_v42 = vmul.f32 -1.442695, %v1365_v33  ;;  %v1808_v52 = vmul.f32 -1.442695, %v1367_v46 }
 0x709   :  { %2581 = vpow2.f32 %v1806_v37  ;;  %v1612_v37 = vld [vmem:[%s3451_s3 + $0xd0] sm:$0xff] }
 0x70a   :  { %2583 = vpow2.f32 %v1807_v42  ;;  %v1613_v42 = vld [vmem:[%s3451_s3 + $0xd8] sm:$0xff] }
 0x70b   :  { %2585 = vpow2.f32 %v1808_v52  ;;  %v2450_v46 = vpack.c.bf16 %v1613_v42, %v1612_v37  ;;  %v1597_v52 = vld [vmem:[%s3451_s3 + $0x58] sm:$0xff] }
 0x70c   :  { %2587 = vtanh.f32 %v1366_v55  ;;  %v1614_v55 = vld [vmem:[%s3451_s3 + $0xe0] sm:$0xff] }
 0x713   :  { %v2582_v58 = vpop.eup %2581 }
 0x714   :  { %v2584_v62 = vpop.eup %2583  ;;  %v1371_v0 = vadd.f32 1.0, %v2582_v58 }
 0x715   :  { %v1377_v6 = vadd.f32 1.0, %v2584_v62  ;;  %v2586_v10 = vpop.eup %2585  ;;  %v2474_v62 = vpack.c.bf16 %v1597_v52, %v1596_v48 }
 0x716   :  { %2589 = vrcp.f32 %v1371_v0  ;;  %v2588_v15 = vpop.eup %2587  ;;  %v1384_v31 = vadd.f32 1.0, %v2586_v10  ;;  %v1615_v0 = vld [vmem:[%s3451_s3 + $0xe8] sm:$0xff] }
 0x717   :  { %2591 = vrcp.f32 %v1377_v6  ;;  %v1598_v6 = vld [vmem:[%s3451_s3 + $0x60] sm:$0xff]  ;;  %v1599_v10 = vld [vmem:[%s3451_s3 + $0x68] sm:$0xff] }
 0x718   :  { %2593 = vrcp.f32 %v1384_v31  ;;  %v1601_v31 = vld [vmem:[%s3451_s3 + $0x78] sm:$0xff] }
 0x720   :  { %v2590_v18 = vpop.eup %2589 }
 0x721   :  { %v2592_v24 = vpop.eup %2591  ;;  %v1388_v27 = vmul.f32 %v2590_v18, %v2588_v15  ;;  %v2453_v15 = vpack.c.bf16 %v1615_v0, %v1614_v55  ;;  %v2477_v18 = vpack.c.bf16 %v1599_v10, %v1598_v6 }
 0x722   :  { %v1387_v32 = vmul.f32 %v2592_v24, %v3252_v19  ;;  %v2594_v40 = vpop.eup %2593  ;;  %v1592_v19 = vld [vmem:[%s3451_s3 + $0x30] sm:$0xff] }
 0x723   :  { %v2468_v21 = vpack.c.bf16 %v1593_v20, %v1592_v19  ;;  %v1616_v24 = vld [vmem:[%s3451_s3 + $0xf0] sm:$0xff] }
 0x724   :  { %v3300_v39 = vadd.f32 %v1388_v27, %v1387_v32  ;;  %v1617_v27 = vld [vmem:[%s3451_s3 + $0xf8] sm:$0xff] }
 0x725   :  { %v2456_v32 = vpack.c.bf16 %v1617_v27, %v1616_v24 }
 0x726   :  { %2595 = vtanh.f32 %v3300_v39 }
 0x727   :  { %2597 = vpow2.f32 %v1815_v38  ;;  %v80_v38 = vld [vmem:[%s3448_s0 + $0x1c0] sm:$0xff] }
 0x730   :  { %v2596_v41 = vpop.eup %2595 }
 0x731   :  { %v1391_v47 = vmul.f32 %v2596_v41, %v2594_v40  ;;  %v2598_v53 = vpop.eup %2597 }
 0x732   :  { %v1573_v59 = vadd.f32 1.0, %v2598_v53  ;;  %v86_v53 = vld [vmem:[%s3448_s0 + $0x1d8] sm:$0xff] }
 0x733   :  { %1462 = vmatmul.mubr.f32.vlgmr.msra.gmra.mrb[14].mxu0 %v1391_v47  ;;  %1533 = vmatmul.mubr.f32.vlgmr.msra.gmra.mrb[14].mxu1 %v1391_v47 }
 0x734   :  { %2436 = vmatpush3.bf16.msra.mxu0 %v2435_v29  ;;  %2460 = vmatpush3.bf16.msra.mxu1 %v2459_v49  ;;  %2599 = vrcp.f32 %v1573_v59 }
 0x735   :  { %2437 = vmatprep.subr.bf16.mxu0 %v2630_v44  ;;  %2461 = vmatprep.subr.bf16.mxu1 %v2630_v44  ;;  %2601 = vtanh.f32 %v1813_v61 }
 0x736   :  { %2603 = vpow2.f32 %v1816_v60  ;;  %1884 = vmatprep.mubr.msk.f32.mxu0 %vm2631_vm0, %v2629_v7  ;;  %1919 = vmatprep.mubr.msk.f32.mxu1 %vm2631_vm0, %v2629_v7  ;;  %v1600_v7 = vld [vmem:[%s3451_s3 + $0x70] sm:$0xff] }
 0x737   :  { %v2480_v40 = vpack.c.bf16 %v1601_v31, %v1600_v7 }
 0x738   :  { %2439 = vmatpush3.bf16.msra.mxu0 %v2438_v54  ;;  %2463 = vmatpush3.bf16.msra.mxu1 %v2462_v57 }
 0x739   :  { %2440 = vmatprep.subr.bf16.mxu0 %v2630_v44  ;;  %2464 = vmatprep.subr.bf16.mxu1 %v2630_v44 }
 0x73c   :  { %2442 = vmatpush3.bf16.msra.mxu0 %v2441_v2  ;;  %2466 = vmatpush3.bf16.msra.mxu1 %v2465_v11 }
 0x73d   :  { %2443 = vmatprep.subr.bf16.mxu0 %v2630_v44  ;;  %2467 = vmatprep.subr.bf16.mxu1 %v2630_v44 }
 0x73e   :  { %v2600_v25 = vpop.eup %2599 }
 0x73f   :  { %v2602_v30 = vpop.eup %2601 }
 0x740   :  { %2445 = vmatpush3.bf16.msra.mxu0 %v2444_v16  ;;  %2469 = vmatpush3.bf16.msra.mxu1 %v2468_v21  ;;  %v2604_v33 = vpop.eup %2603  ;;  %v1583_v45 = vmul.f32 %v2602_v30, %v2600_v25 }
 0x741   :  { %2446 = vmatprep.subr.bf16.mxu0 %v2630_v44  ;;  %2470 = vmatprep.subr.bf16.mxu1 %v2630_v44  ;;  %v1580_v58 = vadd.f32 1.0, %v2604_v33 }
 0x742   :  { %2605 = vtanh.f32 %v1583_v45 }
 0x743   :  { %2607 = vrcp.f32 %v1580_v58 }
 0x744   :  { %2448 = vmatpush3.bf16.msra.mxu0 %v2447_v9  ;;  %2472 = vmatpush3.bf16.msra.mxu1 %v2471_v26  ;;  %v1817_v9 = vld [vmem:[%s3452_s4] ss:$0 sm:$0xff] }
 0x745   :  { %2449 = vmatprep.subr.bf16.mxu0 %v2630_v44  ;;  %2473 = vmatprep.subr.bf16.mxu1 %v2630_v44 }
 0x748   :  { %2451 = vmatpush3.bf16.msra.mxu0 %v2450_v46  ;;  %2475 = vmatpush3.bf16.msra.mxu1 %v2474_v62 }
 0x749   :  { %2452 = vmatprep.subr.bf16.mxu0 %v2630_v44  ;;  %2476 = vmatprep.subr.bf16.mxu1 %v2630_v44 }
 0x74c   :  { %2454 = vmatpush3.bf16.msra.mxu0 %v2453_v15  ;;  %2478 = vmatpush3.bf16.msra.mxu1 %v2477_v18  ;;  %v2606_v41 = vpop.eup %2605 }
 0x74d   :  { %2455 = vmatprep.subr.bf16.mxu0 %v2630_v44  ;;  %2479 = vmatprep.subr.bf16.mxu1 %v2630_v44  ;;  %v2608_v47 = vpop.eup %2607 }
 0x74e   :  { %v1585_v23 = vmul.f32 %v2608_v47, %v2606_v41 }
 0x750   :  { %2457 = vmatpush3.bf16.msra.mxu0 %v2456_v32  ;;  %2481 = vmatpush3.bf16.msra.mxu1 %v2480_v40 }
 0x753   :  { %1885 = vmatmul.mubr.f32.vlgmr.msra.gmra.mrb[16].mxu0 %v1585_v23 }
 0x806   :  { %v1463_v28 = vpop.f32.mrb[14].mxu0  ;;  %v1534_v29 = vpop.f32.mrb[14].mxu1 }
 0x807   :  { %v1539_v34 = vadd.f32 %v1463_v28, %v80_v38  ;;  %v1465_v35 = vpop.f32.mrb[15].mxu0  ;;  %v1536_v49 = vpop.f32.mrb[15].mxu1  ;;  %v1541_v56 = vadd.f32 %v1534_v29, %v84_v3 }
 0x808   :  { %v1540_v44 = vadd.f32 %v1465_v35, %v82_v43  ;;  %v1542_v54 = vadd.f32 %v1536_v49, %v86_v53 }
 0x809   :  { %v1809_v50 = vmul.f32 -1.442695, %v1539_v34 }
 0x80a   :  { %v1810_v51 = vmul.f32 -1.442695, %v1540_v44  ;;  %v1811_v22 = vmul.f32 -1.442695, %v1542_v54 }
 0x80b   :  { %2609 = vpow2.f32 %v1809_v50 }
 0x80c   :  { %2611 = vpow2.f32 %v1810_v51 }
 0x80d   :  { %2613 = vpow2.f32 %v1811_v22 }
 0x80e   :  { %2615 = vtanh.f32 %v1541_v56 }
 0x815   :  { %v2610_v57 = vpop.eup %2609 }
 0x816   :  { %v2612_v59 = vpop.eup %2611  ;;  %v1546_v60 = vadd.f32 1.0, %v2610_v57 }
 0x817   :  { %v1552_v61 = vadd.f32 1.0, %v2612_v59  ;;  %v2614_v63 = vpop.eup %2613 }
 0x818   :  { %2617 = vrcp.f32 %v1546_v60  ;;  %v2616_v1 = vpop.eup %2615  ;;  %v1559_v11 = vadd.f32 1.0, %v2614_v63 }
 0x819   :  { %2619 = vrcp.f32 %v1552_v61 }
 0x81a   :  { %2621 = vrcp.f32 %v1559_v11 }
 0x822   :  { %v2618_v2 = vpop.eup %2617 }
 0x823   :  { %v2620_v4 = vpop.eup %2619  ;;  %v1563_v5 = vmul.f32 %v2618_v2, %v2616_v1 }
 0x824   :  { %v1562_v12 = vmul.f32 %v2620_v4, %v3300_v39  ;;  %v2622_v16 = vpop.eup %2621 }
 0x826   :  { %v1564_v13 = vadd.f32 %v1563_v5, %v1562_v12  ;;  %v1684_v21 = vpop.f32.mrb[16].mxu0 }
 0x827   :  { %v1886_v36 = vpop.f32.mrb[17].mxu0 }
 0x828   :  { %2623 = vtanh.f32 %v1564_v13 }
 0x832   :  { %v2624_v19 = vpop.eup %2623 }
 0x833   :  { %v1566_v20 = vmul.f32 %v2624_v19, %v2622_v16 }
 0x835   :  { %1920 = vmatmul.mubr.f32.vlgmr.msra.gmra.mrb[16].mxu1 %v1566_v20 }
 0x908   :  { %v1754_v8 = vpop.f32.mrb[16].mxu1 }
 0x909   :  { %v1755_v14 = vadd.f32 %v1754_v8, %v1684_v21  ;;  %v1921_v17 = vpop.f32.mrb[17].mxu1 }
 0x90b   :  { %v1765_v25 = vadd.f32 %v1817_v9, %v1755_v14 }
 0x90d   :  { %v1767_v39 = vsel %vm1766_vm1, %v1765_v25, -inf }
 0x90e   :  { %1768 = vmax.xlane.f32.xlu0 %v1767_v39 }
 0x99b   :  { %v1769_v26 = vpop.xlane.xlu0 %1768 }
 0x99c   :  { %v1770_v30 = vsub.f32 %v1765_v25, %v1769_v26 }
 0x99e   :  { %v1771_v33 = vmul.f32 1.442695, %v1770_v30 }
 0x9a0   :  { %2625 = vpow2.f32 %v1771_v33 }
 0x9aa   :  { %v2626_v37 = vpop.eup %2625 }
 0x9ab   :  { %v1773_v42 = vsel %vm1766_vm1, %v2626_v37, 0.0 }
 0x9ac   :  { %1774 = vadd.xlane.f32.xlu0 %v1773_v42 }
 0xa39   :  { %v1775_v45 = vpop.xlane.xlu0 %1774 }
 0xa3a   :  { %2627 = vlog2.f32 %v1775_v45 }
 0xa44   :  { %v2628_v46 = vpop.eup %2627 }
 0xa45   :  { %v1777_v48 = vmul.f32 0.6931472, %v2628_v46 }
 0xa47   :  { %v1778_v52 = vsub.f32 %v1770_v30, %v1777_v48 }
 0xa49   :  { %1779 = vst.msk [vmem:[%s3453_s5] sm:$0xff] %vm1766_vm1, %v1778_v52 }

</bundles_post_ra>
